<compile_context>
chip_gen: v6e
topology: v6e:2x2x1
jax: 0.10.0
libtpu: 0.0.40
codegen_flags: <defaults>
</compile_context>

<pallas_src>
import functools

import jax
import jax.numpy as jnp
from jax.experimental import pallas as pl
from jax.experimental.pallas import tpu as pltpu


def _round_up(x, m):
    return (x + m - 1) // m * m


def _sigmoid(x):
    # one EUP push instead of exp + divide
    return 0.5 * jnp.tanh(0.5 * x) + 0.5


def _device_kind():
    try:
        return jax.devices()[0].device_kind.lower()
    except Exception:
        return ""


# ---------------------------------------------------------------------------
# Capability probe: does this Pallas build accept pl.Buffered(1) on a
# grid-invariant input (single-buffered weights)?  Must run OUTSIDE jit.
# ---------------------------------------------------------------------------
_BUFFERED_SUPPORT = None


def _probe_buffered():
    global _BUFFERED_SUPPORT
    if _BUFFERED_SUPPORT is not None:
        return _BUFFERED_SUPPORT
    try:
        buffered_one = pl.Buffered(1)

        def k(a_ref, w_ref, o_ref):
            o_ref[...] = a_ref[...] + w_ref[...]

        a = jnp.zeros((16, 128), jnp.float32)
        w = jnp.zeros((8, 128), jnp.float32)
        fn = pl.pallas_call(
            k,
            out_shape=jax.ShapeDtypeStruct((16, 128), jnp.float32),
            grid=(2,),
            in_specs=[
                pl.BlockSpec((8, 128), lambda i: (i, 0)),
                pl.BlockSpec((8, 128), lambda i: (0, 0),
                             pipeline_mode=buffered_one),
            ],
            out_specs=pl.BlockSpec((8, 128), lambda i: (i, 0)),
        )
        jax.block_until_ready(fn(a, w))
        _BUFFERED_SUPPORT = True
    except Exception:
        _BUFFERED_SUPPORT = False
    return _BUFFERED_SUPPORT


# ---------------------------------------------------------------------------
# VMEM footprint estimate (bytes) for the fused kernel at a given tiling.
# ---------------------------------------------------------------------------
def _vmem_bytes(tt, tb, e_pad, h_pad, num_layers, weight_copies):
    h4 = 4 * h_pad
    x_in = 2 * tt * tb * e_pad * 2                       # bf16, double buffered
    y_out = 2 * tt * tb * h_pad * 2                      # bf16, double buffered
    hc_out = 2 * 2 * num_layers * tb * h_pad * 4         # h & c outputs (f32) x2 buf
    w = weight_copies * 2 * (e_pad + (2 * num_layers - 1) * h_pad) * h4
    bias = weight_copies * num_layers * h4 * 4
    state = 2 * num_layers * tb * h_pad * 4              # h/c scratch
    act = tt * tb * h_pad * 2                            # inter-layer activations
    xw = tt * tb * h4 * 4                                # hoisted x-projection
    gates = 4 * tb * h4 * 4                              # live gate temporaries (rough)
    return x_in + y_out + hc_out + w + bias + state + act + xw + gates


# ---------------------------------------------------------------------------
# Fused multi-layer LSTM kernel.
# grid = (B_blocks, T_blocks); per grid step, each layer:
#   (a) projection loop: xw[i] = x_i @ W_ih + b  (off the serial chain)
#   (b) recurrence loop: gates = xw[i] + h_prev @ W_hh, gate math, write y
# h/c per layer carried in VMEM scratch across time blocks; final h/c are
# snapshotted after the (static) number of real steps of the last time block.
# ---------------------------------------------------------------------------
def _make_lstm_stack_kernel(num_layers, tt, h_pad, r_last, unroll):
    h4 = 4 * h_pad

    def kernel(*refs):
        x_ref, w_ih0_ref, w_hh_ref, b_ref = refs[:4]
        pos = 4
        if num_layers > 1:
            w_ihr_ref = refs[pos]
            pos += 1
        (y_ref, h_out_ref, c_out_ref,
         h_scr, c_scr, act_scr, xw_scr) = refs[pos:]

        t_blk = pl.program_id(1)
        n_t = pl.num_programs(1)

        @pl.when(t_blk == 0)
        def _init():
            h_scr[...] = jnp.zeros_like(h_scr)
            c_scr[...] = jnp.zeros_like(c_scr)

        for layer in range(num_layers):
            if layer == 0:
                in_ref = x_ref                      # (tt, tb, E_pad) bf16
                w_ih = w_ih0_ref[...]               # (E_pad, 4H) bf16
            else:
                in_ref = act_scr                    # previous layer's output
                w_ih = w_ihr_ref[layer - 1]         # (H_pad, 4H) bf16
            w_hh = w_hh_ref[layer]                  # (H_pad, 4H) bf16
            bias = b_ref[layer]                     # (1, 4H)    f32
            out_ref = y_ref if layer == num_layers - 1 else act_scr

            # ---- hoisted input projection (+ bias): no serial dependency ----
            def proj(i, carry, in_ref=in_ref, w_ih=w_ih, bias=bias):
                xw_scr[i] = jnp.dot(in_ref[i], w_ih,
                                    preferred_element_type=jnp.float32) + bias
                return carry

            jax.lax.fori_loop(0, tt, proj, 0, unroll=unroll)

            # ---- serial recurrence: only h @ W_hh + gate math on the chain ----
            def step(i, carry, w_hh=w_hh, out_ref=out_ref):
                h_prev, c_prev = carry              # (tb, H_pad) f32
                gates = xw_scr[i] + jnp.dot(
                    h_prev.astype(jnp.bfloat16), w_hh,
                    preferred_element_type=jnp.float32)
                i_g = _sigmoid(gates[:, 0 * h_pad:1 * h_pad])
                f_g = _sigmoid(gates[:, 1 * h_pad:2 * h_pad])
                g_g = jnp.tanh(gates[:, 2 * h_pad:3 * h_pad])
                o_g = _sigmoid(gates[:, 3 * h_pad:4 * h_pad])
                c_new = f_g * c_prev + i_g * g_g
                h_new = o_g * jnp.tanh(c_new)
                out_ref[i] = h_new.astype(out_ref.dtype)
                return h_new, c_new

            h_mid, c_mid = jax.lax.fori_loop(
                0, r_last, step, (h_scr[layer], c_scr[layer]),
                unroll=min(unroll, r_last))

            # Final hidden/cell state = state after the real last timestep
            # (only meaningful on the last time block).
            @pl.when(t_blk == n_t - 1)
            def _snapshot(layer=layer, h_mid=h_mid, c_mid=c_mid):
                h_out_ref[layer] = h_mid
                c_out_ref[layer] = c_mid

            if r_last < tt:
                # Free-run through padded timesteps (outputs are discarded by
                # the wrapper; state only matters on non-last blocks where all
                # timesteps are real, so this is exact).
                h_fin, c_fin = jax.lax.fori_loop(
                    r_last, tt, step, (h_mid, c_mid),
                    unroll=min(unroll, tt - r_last))
            else:
                h_fin, c_fin = h_mid, c_mid

            h_scr[layer] = h_fin
            c_scr[layer] = c_fin

    return kernel


def lstm_stack(x, w_ih0, w_ih_rest, w_hh, b, *, t_real, tt, tb,
               single_buffer_weights, vmem_limit):
    """All LSTM layers over the full (padded) sequence in one pallas_call.

    x         : (T_pad, B_pad, E_pad) bf16, time-major
    w_ih0     : (E_pad, 4*H_pad) bf16
    w_ih_rest : (L-1, H_pad, 4*H_pad) bf16 or None
    w_hh      : (L, H_pad, 4*H_pad) bf16
    b         : (L, 1, 4*H_pad) f32
    returns   : y (T_pad, B_pad, H_pad) bf16, h (L, B_pad, H_pad) f32, c f32
    """
    t_pad, b_pad, e_pad = x.shape
    num_layers, h_pad, h4 = w_hh.shape
    n_bb = b_pad // tb
    n_tt = t_pad // tt
    r_last = t_real - (n_tt - 1) * tt          # real steps in the last time block
    unroll = tt if tt <= 16 else 8

    kernel = _make_lstm_stack_kernel(num_layers, tt, h_pad, r_last, unroll)

    def wspec(shape, idx_map):
        # Grid-invariant operands: single-buffer when supported (VMEM hygiene,
        # matters most on v7x where VMEM is 64 MiB/TC).
        if single_buffer_weights:
            return pl.BlockSpec(shape, idx_map, pipeline_mode=pl.Buffered(1))
        return pl.BlockSpec(shape, idx_map)

    in_specs = [
        pl.BlockSpec((tt, tb, e_pad), lambda bb, ti: (ti, bb, 0)),
        wspec((e_pad, h4), lambda bb, ti: (0, 0)),
        wspec((num_layers, h_pad, h4), lambda bb, ti: (0, 0, 0)),
        wspec((num_layers, 1, h4), lambda bb, ti: (0, 0, 0)),
    ]
    inputs = [x, w_ih0, w_hh, b]
    if num_layers > 1:
        in_specs.append(wspec((num_layers - 1, h_pad, h4),
                              lambda bb, ti: (0, 0, 0)))
        inputs.append(w_ih_rest)

    out_specs = [
        pl.BlockSpec((tt, tb, h_pad), lambda bb, ti: (ti, bb, 0)),
        pl.BlockSpec((num_layers, tb, h_pad), lambda bb, ti: (0, bb, 0)),
        pl.BlockSpec((num_layers, tb, h_pad), lambda bb, ti: (0, bb, 0)),
    ]
    out_shapes = (
        jax.ShapeDtypeStruct((t_pad, b_pad, h_pad), jnp.bfloat16),
        jax.ShapeDtypeStruct((num_layers, b_pad, h_pad), jnp.float32),
        jax.ShapeDtypeStruct((num_layers, b_pad, h_pad), jnp.float32),
    )

    grid_spec = pltpu.PrefetchScalarGridSpec(
        num_scalar_prefetch=0,
        grid=(n_bb, n_tt),
        in_specs=in_specs,
        out_specs=out_specs,
        scratch_shapes=[
            pltpu.VMEM((num_layers, tb, h_pad), jnp.float32),   # h state
            pltpu.VMEM((num_layers, tb, h_pad), jnp.float32),   # c state
            pltpu.VMEM((tt, tb, h_pad), jnp.bfloat16),          # inter-layer act
            pltpu.VMEM((tt, tb, h4), jnp.float32),              # hoisted x-proj
        ],
    )

    return pl.pallas_call(
        kernel,
        out_shape=out_shapes,
        grid_spec=grid_spec,
        compiler_params=pltpu.CompilerParams(
            dimension_semantics=("parallel", "arbitrary"),
            vmem_limit_bytes=vmem_limit,
        ),
    )(*inputs)


# ---------------------------------------------------------------------------
# Parameter construction (raw PyTorch-layout params, f32)
# ---------------------------------------------------------------------------
def init_encoder_params(key, vocab_size, embed_dim, hidden_dim, num_layers, pad_idx):
    keys = jax.random.split(key, 1 + 4 * num_layers)
    emb = jax.random.normal(keys[0], (vocab_size, embed_dim), jnp.float32)
    emb = emb.at[pad_idx].set(0.0)

    k = 1.0 / jnp.sqrt(jnp.float32(hidden_dim))
    layers = []
    for l in range(num_layers):
        in_dim = embed_dim if l == 0 else hidden_dim
        kw = keys[1 + 4 * l: 1 + 4 * (l + 1)]
        layers.append({
            "w_ih": jax.random.uniform(kw[0], (4 * hidden_dim, in_dim), jnp.float32, -k, k),
            "w_hh": jax.random.uniform(kw[1], (4 * hidden_dim, hidden_dim), jnp.float32, -k, k),
            "b_ih": jax.random.uniform(kw[2], (4 * hidden_dim,), jnp.float32, -k, k),
            "b_hh": jax.random.uniform(kw[3], (4 * hidden_dim,), jnp.float32, -k, k),
        })
    return {"embedding": emb, "layers": layers}


# ---------------------------------------------------------------------------
# One-time kernel-layout preparation: pad E/H to 128, bf16 weights/embedding.
# ---------------------------------------------------------------------------
def _prep_weight(w, h, h_pad, in_dim, in_pad):
    # w: (4H, in_dim) PyTorch layout -> (in_pad, 4*H_pad), gate blocks 128-aligned.
    w = w.reshape(4, h, in_dim)
    w = jnp.pad(w, ((0, 0), (0, h_pad - h), (0, in_pad - in_dim)))
    return jnp.transpose(w, (2, 0, 1)).reshape(in_pad, 4 * h_pad)


def prepare_kernel_params(raw):
    _probe_buffered()   # capability check (outside jit)

    emb = raw["embedding"]
    _, e = emb.shape
    h = raw["layers"][0]["w_hh"].shape[1]
    e_pad = _round_up(e, 128)
    h_pad = _round_up(h, 128)
    h4 = 4 * h_pad

    emb_p = jnp.pad(emb, ((0, 0), (0, e_pad - e))).astype(jnp.bfloat16)

    w_ih0 = _prep_weight(raw["layers"][0]["w_ih"], h, h_pad, e, e_pad)
    w_ih0 = w_ih0.astype(jnp.bfloat16)
    w_hh = jnp.stack([_prep_weight(l["w_hh"], h, h_pad, h, h_pad)
                      for l in raw["layers"]]).astype(jnp.bfloat16)
    if len(raw["layers"]) > 1:
        w_ih_rest = jnp.stack([_prep_weight(l["w_ih"], h, h_pad, h, h_pad)
                               for l in raw["layers"][1:]]).astype(jnp.bfloat16)
    else:
        w_ih_rest = None

    biases = []
    for l in raw["layers"]:
        bsum = (l["b_ih"] + l["b_hh"]).reshape(4, h)
        bsum = jnp.pad(bsum, ((0, 0), (0, h_pad - h))).reshape(1, h4)
        biases.append(bsum)
    b_all = jnp.stack(biases).astype(jnp.float32)        # (L, 1, 4*H_pad)

    return {"embedding": emb_p, "w_ih0": w_ih0, "w_ih_rest": w_ih_rest,
            "w_hh": w_hh, "b": b_all}


# ---------------------------------------------------------------------------
# Encoder forward: bf16 embedding gather (glue) + fused Pallas LSTM stack
# ---------------------------------------------------------------------------
@functools.partial(jax.jit, static_argnames=("hidden_dim",))
def encoder_forward(kparams, src, *, hidden_dim):
    """src: (B, T) int32 token ids. Returns (outputs, (h, c)) like nn.LSTM."""
    b, t = src.shape
    emb = kparams["embedding"]                           # (V, E_pad) bf16
    w_ih0, w_hh, b_all = kparams["w_ih0"], kparams["w_hh"], kparams["b"]
    w_ih_rest = kparams["w_ih_rest"]
    num_layers, h_pad, _ = w_hh.shape
    e_pad = emb.shape[1]

    kind = _device_kind()
    is_v7 = ("v7" in kind) or (not kind)
    single_buf = bool(_BUFFERED_SUPPORT)
    weight_copies = 1 if single_buf else 2

    # ---- tile sizes ----
    b8 = _round_up(b, 8)
    tb_cap = 256 if (b8 >= 256 and "v5" not in kind) else 128
    tb = min(b8, tb_cap)
    if "v7" in kind and tb == b8 and b8 >= 16:
        tb = max(8, _round_up(b8 // 2, 8))               # feed both TensorCores
    b_pad = _round_up(b, tb)

    t8 = _round_up(t, 8)
    budget = (28 << 20) if is_v7 else (64 << 20)
    tt = min(64 if t8 >= 128 else 32, t8)
    while tt > 8 and _vmem_bytes(tt, tb, e_pad, h_pad, num_layers, weight_copies) > budget:
        tt = max(8, tt // 2)
    while tb > 8 and _vmem_bytes(tt, tb, e_pad, h_pad, num_layers, weight_copies) > budget:
        tb = max(8, tb // 2)
        b_pad = _round_up(b, tb)
    t_pad = _round_up(t, tt)

    fp = _vmem_bytes(tt, tb, e_pad, h_pad, num_layers, weight_copies)
    vmem_cap = (48 << 20) if is_v7 else (100 << 20)
    vmem_limit = max(16 << 20, min(int(1.5 * fp) + (4 << 20), vmem_cap))

    # ---- embedding gather: time-major, bf16 (transpose the tiny index array) ----
    x = jnp.take(emb, jnp.transpose(src), axis=0)        # (T, B, E_pad) bf16
    x = jnp.pad(x, ((0, t_pad - t), (0, b_pad - b), (0, 0)))

    y, h_all, c_all = lstm_stack(
        x, w_ih0, w_ih_rest, w_hh, b_all,
        t_real=t, tt=tt, tb=tb,
        single_buffer_weights=single_buf, vmem_limit=vmem_limit)

    # Transpose in bf16, then cast to f32 (halves transpose HBM traffic).
    outputs = jnp.transpose(y[:t, :b, :hidden_dim], (1, 0, 2)).astype(jnp.float32)
    h = h_all[:, :b, :hidden_dim]
    c = c_all[:, :b, :hidden_dim]
    return outputs, (h, c)


# ---------------------------------------------------------------------------
# Pure-JAX f32 reference for correctness check (PyTorch semantics)
# ---------------------------------------------------------------------------
def encoder_forward_ref(raw, src):
    emb = raw["embedding"]
    x = jnp.take(emb, src, axis=0)          # (B, T, E)
    b, t, _ = x.shape
    h_list, c_list = [], []
    for layer in raw["layers"]:
        hd = layer["w_hh"].shape[1]
        wih_t = layer["w_ih"].T
        whh_t = layer["w_hh"].T
        bias = layer["b_ih"] + layer["b_hh"]
        h = jnp.zeros((b, hd), jnp.float32)
        c = jnp.zeros((b, hd), jnp.float32)
        ys = []
        for step in range(t):
            gates = x[:, step, :] @ wih_t + h @ whh_t + bias
            i_g = jax.nn.sigmoid(gates[:, 0 * hd:1 * hd])
            f_g = jax.nn.sigmoid(gates[:, 1 * hd:2 * hd])
            g_g = jnp.tanh(gates[:, 2 * hd:3 * hd])
            o_g = jax.nn.sigmoid(gates[:, 3 * hd:4 * hd])
            c = f_g * c + i_g * g_g
            h = o_g * jnp.tanh(c)
            ys.append(h)
        x = jnp.stack(ys, axis=1)
        h_list.append(h)
        c_list.append(c)
    return x, (jnp.stack(h_list, 0), jnp.stack(c_list, 0))


if __name__ == "__main__":
    # Small, module-consistent shapes.
    vocab_size, embed_dim, hidden_dim, num_layers, pad_idx = 16, 32, 32, 2, 0
    batch, seq = 2, 8

    key = jax.random.PRNGKey(0)
    pkey, skey = jax.random.split(key)
    raw_params = init_encoder_params(pkey, vocab_size, embed_dim, hidden_dim,
                                     num_layers, pad_idx)
    kparams = prepare_kernel_params(raw_params)

    src = jax.random.randint(skey, (batch, seq), 0, vocab_size, dtype=jnp.int32)
    src = src.at[:, -2:].set(pad_idx)   # make sure some padding tokens show up

    outputs, (h, c) = encoder_forward(kparams, src, hidden_dim=hidden_dim)
    jax.block_until_ready((outputs, h, c))

    # Correctness vs pure-JAX f32 reference (tolerance loosened for bf16 matmuls).
    ref_out, (ref_h, ref_c) = encoder_forward_ref(raw_params, src)
    assert outputs.shape == (batch, seq, hidden_dim)
    assert h.shape == (num_layers, batch, hidden_dim)
    assert c.shape == (num_layers, batch, hidden_dim)
    assert jnp.allclose(outputs, ref_out, atol=5e-2, rtol=5e-2), (
        float(jnp.max(jnp.abs(outputs - ref_out))))
    assert jnp.allclose(h, ref_h, atol=5e-2, rtol=5e-2)
    assert jnp.allclose(c, ref_c, atol=5e-2, rtol=5e-2)

    print("KERNEL_OK")
</pallas_src>

<mosaic_0001>
module attributes {stable_mosaic.version = 11 : i64} {
  func.func @k(%arg0: i32, %arg1: memref<8x128xf32, #tpu.memory_space<vmem>>, %arg2: memref<8x128xf32, #tpu.memory_space<vmem>>, %arg3: memref<8x128xf32, #tpu.memory_space<vmem>>) attributes {dimension_semantics = [#tpu.dimension_semantics<arbitrary>], iteration_bounds = array<i64: 2>, scalar_prefetch = 0 : i64, scratch_operands = 0 : i64, tpu.core_type = #tpu.core_type<tc>, window_params = [{transform_indices = @transform_0, window_bounds = array<i64: 8, 128>}, {pipeline_mode = #tpu.pipeline_mode<synchronous>, transform_indices = @transform_1, window_bounds = array<i64: 8, 128>}, {transform_indices = @transform_2, window_bounds = array<i64: 8, 128>}]} {
    %c0 = arith.constant 0 : index
    %c0_0 = arith.constant 0 : index
    %0 = vector.load %arg1[%c0, %c0_0] : memref<8x128xf32, #tpu.memory_space<vmem>>, vector<8x128xf32>
    %c0_1 = arith.constant 0 : index
    %c0_2 = arith.constant 0 : index
    %1 = vector.load %arg2[%c0_1, %c0_2] : memref<8x128xf32, #tpu.memory_space<vmem>>, vector<8x128xf32>
    %2 = arith.addf %0, %1 : vector<8x128xf32>
    %c0_3 = arith.constant 0 : index
    %c0_4 = arith.constant 0 : index
    %3 = vector.load %arg3[%c0_3, %c0_4] : memref<8x128xf32, #tpu.memory_space<vmem>>, vector<8x128xf32>
    tpu.vector_store %arg3[%c0_3, %c0_4], %2 {strides = array<i32>} : memref<8x128xf32, #tpu.memory_space<vmem>>, vector<8x128xf32>,
    return
  }
  func.func @transform_0(%arg0: i32) -> (i32, i32) {
    %c0_i32 = arith.constant 0 : i32
    %c0_i32_0 = arith.constant 0 : i32
    return %arg0, %c0_i32 : i32, i32
  }
  func.func @transform_1(%arg0: i32) -> (i32, i32) {
    %c0_i32 = arith.constant 0 : i32
    %c0_i32_0 = arith.constant 0 : i32
    %c0_i32_1 = arith.constant 0 : i32
    return %c0_i32, %c0_i32_0 : i32, i32
  }
  func.func @transform_2(%arg0: i32) -> (i32, i32) {
    %c0_i32 = arith.constant 0 : i32
    %c0_i32_0 = arith.constant 0 : i32
    return %arg0, %c0_i32 : i32, i32
  }
}

module attributes {stable_mosaic.version = 11 : i64} {
  func.func @kernel(%arg0: i32, %arg1: i32, %arg2: memref<8x8x128xbf16, #tpu.memory_space<vmem>>, %arg3: memref<128x512xbf16, #tpu.memory_space<vmem>>, %arg4: memref<2x128x512xbf16, #tpu.memory_space<vmem>>, %arg5: memref<2x1x512xf32, #tpu.memory_space<vmem>>, %arg6: memref<1x128x512xbf16, #tpu.memory_space<vmem>>, %arg7: memref<8x8x128xbf16, #tpu.memory_space<vmem>>, %arg8: memref<2x8x128xf32, #tpu.memory_space<vmem>>, %arg9: memref<2x8x128xf32, #tpu.memory_space<vmem>>, %arg10: memref<2x8x128xf32, #tpu.memory_space<vmem>>, %arg11: memref<2x8x128xf32, #tpu.memory_space<vmem>>, %arg12: memref<8x8x128xbf16, #tpu.memory_space<vmem>>, %arg13: memref<8x8x512xf32, #tpu.memory_space<vmem>>) attributes {dimension_semantics = [#tpu.dimension_semantics<parallel>, #tpu.dimension_semantics<arbitrary>], iteration_bounds = array<i64: 1, 1>, scalar_prefetch = 0 : i64, scratch_operands = 4 : i64, tpu.core_type = #tpu.core_type<tc>, window_params = [{transform_indices = @transform_0, window_bounds = array<i64: 8, 8, 128>}, {pipeline_mode = #tpu.pipeline_mode<synchronous>, transform_indices = @transform_1, window_bounds = array<i64: 128, 512>}, {pipeline_mode = #tpu.pipeline_mode<synchronous>, transform_indices = @transform_2, window_bounds = array<i64: 2, 128, 512>}, {pipeline_mode = #tpu.pipeline_mode<synchronous>, transform_indices = @transform_3, window_bounds = array<i64: 2, 1, 512>}, {pipeline_mode = #tpu.pipeline_mode<synchronous>, transform_indices = @transform_4, window_bounds = array<i64: 1, 128, 512>}, {transform_indices = @transform_5, window_bounds = array<i64: 8, 8, 128>}, {transform_indices = @transform_6, window_bounds = array<i64: 2, 8, 128>}, {transform_indices = @transform_7, window_bounds = array<i64: 2, 8, 128>}]} {
    %c0_i32 = arith.constant 0 : i32
    %0 = arith.cmpi eq, %arg1, %c0_i32 : i32
    %1 = arith.extui %0 : i1 to i32
    %c0_i32_0 = arith.constant 0 : i32
    %2 = arith.cmpi ne, %1, %c0_i32_0 : i32
    scf.if %2 {
      %cst_375 = arith.constant 0.000000e+00 : f32
      %872 = vector.broadcast %cst_375 : f32 to vector<2x8x128xf32>
      %c0_376 = arith.constant 0 : index
      %c0_377 = arith.constant 0 : index
      %c0_378 = arith.constant 0 : index
      %873 = vector.load %arg10[%c0_376, %c0_377, %c0_378] : memref<2x8x128xf32, #tpu.memory_space<vmem>>, vector<2x8x128xf32>
      tpu.vector_store %arg10[%c0_376, %c0_377, %c0_378], %872 {strides = array<i32>} : memref<2x8x128xf32, #tpu.memory_space<vmem>>, vector<2x8x128xf32>,
      %cst_379 = arith.constant 0.000000e+00 : f32
      %874 = vector.broadcast %cst_379 : f32 to vector<2x8x128xf32>
      %c0_380 = arith.constant 0 : index
      %c0_381 = arith.constant 0 : index
      %c0_382 = arith.constant 0 : index
      %875 = vector.load %arg11[%c0_380, %c0_381, %c0_382] : memref<2x8x128xf32, #tpu.memory_space<vmem>>, vector<2x8x128xf32>
      tpu.vector_store %arg11[%c0_380, %c0_381, %c0_382], %874 {strides = array<i32>} : memref<2x8x128xf32, #tpu.memory_space<vmem>>, vector<2x8x128xf32>,
    } else {
    }
    %c0 = arith.constant 0 : index
    %c0_1 = arith.constant 0 : index
    %3 = vector.load %arg3[%c0, %c0_1] : memref<128x512xbf16, #tpu.memory_space<vmem>>, vector<128x512xbf16>
    %c0_2 = arith.constant 0 : index
    %c0_3 = arith.constant 0 : index
    %c0_4 = arith.constant 0 : index
    %4 = vector.load %arg4[%c0_2, %c0_3, %c0_4] : memref<2x128x512xbf16, #tpu.memory_space<vmem>>, vector<1x128x512xbf16>
    %5 = vector.shape_cast %4 : vector<1x128x512xbf16> to vector<128x512xbf16>
    %c0_5 = arith.constant 0 : index
    %c0_6 = arith.constant 0 : index
    %c0_7 = arith.constant 0 : index
    %6 = vector.load %arg5[%c0_5, %c0_6, %c0_7] : memref<2x1x512xf32, #tpu.memory_space<vmem>>, vector<1x1x512xf32>
    %7 = vector.shape_cast %6 : vector<1x1x512xf32> to vector<1x512xf32>
    %c0_i32_8 = arith.constant 0 : i32
    %8 = arith.index_cast %c0_i32_8 : i32 to index
    %c0_9 = arith.constant 0 : index
    %c0_10 = arith.constant 0 : index
    %9 = vector.load %arg2[%8, %c0_9, %c0_10] : memref<8x8x128xbf16, #tpu.memory_space<vmem>>, vector<1x8x128xbf16>
    %10 = vector.shape_cast %9 : vector<1x8x128xbf16> to vector<8x128xbf16>
    %cst = arith.constant dense<0.000000e+00> : vector<8x512xf32>
    %11 = tpu.matmul %10, %3, %cst {dimension_numbers = #tpu.dot_dimension_numbers<[1], [0], [0], [1], [0, 0, 1, 1], [], []>} : vector<8x128xbf16>, vector<128x512xbf16>, vector<8x512xf32> -> vector<8x512xf32>
    %12 = vector.broadcast %7 : vector<1x512xf32> to vector<8x512xf32>
    %13 = arith.addf %11, %12 : vector<8x512xf32>
    %14 = arith.index_cast %c0_i32_8 : i32 to index
    %c0_11 = arith.constant 0 : index
    %c0_12 = arith.constant 0 : index
    %15 = vector.load %arg13[%14, %c0_11, %c0_12] : memref<8x8x512xf32, #tpu.memory_space<vmem>>, vector<1x8x512xf32>
    %16 = vector.shape_cast %15 : vector<1x8x512xf32> to vector<8x512xf32>
    %17 = vector.shape_cast %13 : vector<8x512xf32> to vector<1x8x512xf32>
    tpu.vector_store %arg13[%14, %c0_11, %c0_12], %17 {strides = array<i32>} : memref<8x8x512xf32, #tpu.memory_space<vmem>>, vector<1x8x512xf32>,
    %c1_i32 = arith.constant 1 : i32
    %18 = arith.index_cast %c1_i32 : i32 to index
    %c0_13 = arith.constant 0 : index
    %c0_14 = arith.constant 0 : index
    %19 = vector.load %arg2[%18, %c0_13, %c0_14] : memref<8x8x128xbf16, #tpu.memory_space<vmem>>, vector<1x8x128xbf16>
    %20 = vector.shape_cast %19 : vector<1x8x128xbf16> to vector<8x128xbf16>
    %cst_15 = arith.constant dense<0.000000e+00> : vector<8x512xf32>
    %21 = tpu.matmul %20, %3, %cst_15 {dimension_numbers = #tpu.dot_dimension_numbers<[1], [0], [0], [1], [0, 0, 1, 1], [], []>} : vector<8x128xbf16>, vector<128x512xbf16>, vector<8x512xf32> -> vector<8x512xf32>
    %22 = vector.broadcast %7 : vector<1x512xf32> to vector<8x512xf32>
    %23 = arith.addf %21, %22 : vector<8x512xf32>
    %24 = arith.index_cast %c1_i32 : i32 to index
    %c0_16 = arith.constant 0 : index
    %c0_17 = arith.constant 0 : index
    %25 = vector.load %arg13[%24, %c0_16, %c0_17] : memref<8x8x512xf32, #tpu.memory_space<vmem>>, vector<1x8x512xf32>
    %26 = vector.shape_cast %25 : vector<1x8x512xf32> to vector<8x512xf32>
    %27 = vector.shape_cast %23 : vector<8x512xf32> to vector<1x8x512xf32>
    tpu.vector_store %arg13[%24, %c0_16, %c0_17], %27 {strides = array<i32>} : memref<8x8x512xf32, #tpu.memory_space<vmem>>, vector<1x8x512xf32>,
    %c2_i32 = arith.constant 2 : i32
    %28 = arith.index_cast %c2_i32 : i32 to index
    %c0_18 = arith.constant 0 : index
    %c0_19 = arith.constant 0 : index
    %29 = vector.load %arg2[%28, %c0_18, %c0_19] : memref<8x8x128xbf16, #tpu.memory_space<vmem>>, vector<1x8x128xbf16>
    %30 = vector.shape_cast %29 : vector<1x8x128xbf16> to vector<8x128xbf16>
    %cst_20 = arith.constant dense<0.000000e+00> : vector<8x512xf32>
    %31 = tpu.matmul %30, %3, %cst_20 {dimension_numbers = #tpu.dot_dimension_numbers<[1], [0], [0], [1], [0, 0, 1, 1], [], []>} : vector<8x128xbf16>, vector<128x512xbf16>, vector<8x512xf32> -> vector<8x512xf32>
    %32 = vector.broadcast %7 : vector<1x512xf32> to vector<8x512xf32>
    %33 = arith.addf %31, %32 : vector<8x512xf32>
    %34 = arith.index_cast %c2_i32 : i32 to index
    %c0_21 = arith.constant 0 : index
    %c0_22 = arith.constant 0 : index
    %35 = vector.load %arg13[%34, %c0_21, %c0_22] : memref<8x8x512xf32, #tpu.memory_space<vmem>>, vector<1x8x512xf32>
    %36 = vector.shape_cast %35 : vector<1x8x512xf32> to vector<8x512xf32>
    %37 = vector.shape_cast %33 : vector<8x512xf32> to vector<1x8x512xf32>
    tpu.vector_store %arg13[%34, %c0_21, %c0_22], %37 {strides = array<i32>} : memref<8x8x512xf32, #tpu.memory_space<vmem>>, vector<1x8x512xf32>,
    %c3_i32 = arith.constant 3 : i32
    %38 = arith.index_cast %c3_i32 : i32 to index
    %c0_23 = arith.constant 0 : index
    %c0_24 = arith.constant 0 : index
    %39 = vector.load %arg2[%38, %c0_23, %c0_24] : memref<8x8x128xbf16, #tpu.memory_space<vmem>>, vector<1x8x128xbf16>
    %40 = vector.shape_cast %39 : vector<1x8x128xbf16> to vector<8x128xbf16>
    %cst_25 = arith.constant dense<0.000000e+00> : vector<8x512xf32>
    %41 = tpu.matmul %40, %3, %cst_25 {dimension_numbers = #tpu.dot_dimension_numbers<[1], [0], [0], [1], [0, 0, 1, 1], [], []>} : vector<8x128xbf16>, vector<128x512xbf16>, vector<8x512xf32> -> vector<8x512xf32>
    %42 = vector.broadcast %7 : vector<1x512xf32> to vector<8x512xf32>
    %43 = arith.addf %41, %42 : vector<8x512xf32>
    %44 = arith.index_cast %c3_i32 : i32 to index
    %c0_26 = arith.constant 0 : index
    %c0_27 = arith.constant 0 : index
    %45 = vector.load %arg13[%44, %c0_26, %c0_27] : memref<8x8x512xf32, #tpu.memory_space<vmem>>, vector<1x8x512xf32>
    %46 = vector.shape_cast %45 : vector<1x8x512xf32> to vector<8x512xf32>
    %47 = vector.shape_cast %43 : vector<8x512xf32> to vector<1x8x512xf32>
    tpu.vector_store %arg13[%44, %c0_26, %c0_27], %47 {strides = array<i32>} : memref<8x8x512xf32, #tpu.memory_space<vmem>>, vector<1x8x512xf32>,
    %c4_i32 = arith.constant 4 : i32
    %48 = arith.index_cast %c4_i32 : i32 to index
    %c0_28 = arith.constant 0 : index
    %c0_29 = arith.constant 0 : index
    %49 = vector.load %arg2[%48, %c0_28, %c0_29] : memref<8x8x128xbf16, #tpu.memory_space<vmem>>, vector<1x8x128xbf16>
    %50 = vector.shape_cast %49 : vector<1x8x128xbf16> to vector<8x128xbf16>
    %cst_30 = arith.constant dense<0.000000e+00> : vector<8x512xf32>
    %51 = tpu.matmul %50, %3, %cst_30 {dimension_numbers = #tpu.dot_dimension_numbers<[1], [0], [0], [1], [0, 0, 1, 1], [], []>} : vector<8x128xbf16>, vector<128x512xbf16>, vector<8x512xf32> -> vector<8x512xf32>
    %52 = vector.broadcast %7 : vector<1x512xf32> to vector<8x512xf32>
    %53 = arith.addf %51, %52 : vector<8x512xf32>
    %54 = arith.index_cast %c4_i32 : i32 to index
    %c0_31 = arith.constant 0 : index
    %c0_32 = arith.constant 0 : index
    %55 = vector.load %arg13[%54, %c0_31, %c0_32] : memref<8x8x512xf32, #tpu.memory_space<vmem>>, vector<1x8x512xf32>
    %56 = vector.shape_cast %55 : vector<1x8x512xf32> to vector<8x512xf32>
    %57 = vector.shape_cast %53 : vector<8x512xf32> to vector<1x8x512xf32>
    tpu.vector_store %arg13[%54, %c0_31, %c0_32], %57 {strides = array<i32>} : memref<8x8x512xf32, #tpu.memory_space<vmem>>, vector<1x8x512xf32>,
    %c5_i32 = arith.constant 5 : i32
    %58 = arith.index_cast %c5_i32 : i32 to index
    %c0_33 = arith.constant 0 : index
    %c0_34 = arith.constant 0 : index
    %59 = vector.load %arg2[%58, %c0_33, %c0_34] : memref<8x8x128xbf16, #tpu.memory_space<vmem>>, vector<1x8x128xbf16>
    %60 = vector.shape_cast %59 : vector<1x8x128xbf16> to vector<8x128xbf16>
    %cst_35 = arith.constant dense<0.000000e+00> : vector<8x512xf32>
    %61 = tpu.matmul %60, %3, %cst_35 {dimension_numbers = #tpu.dot_dimension_numbers<[1], [0], [0], [1], [0, 0, 1, 1], [], []>} : vector<8x128xbf16>, vector<128x512xbf16>, vector<8x512xf32> -> vector<8x512xf32>
    %62 = vector.broadcast %7 : vector<1x512xf32> to vector<8x512xf32>
    %63 = arith.addf %61, %62 : vector<8x512xf32>
    %64 = arith.index_cast %c5_i32 : i32 to index
    %c0_36 = arith.constant 0 : index
    %c0_37 = arith.constant 0 : index
    %65 = vector.load %arg13[%64, %c0_36, %c0_37] : memref<8x8x512xf32, #tpu.memory_space<vmem>>, vector<1x8x512xf32>
    %66 = vector.shape_cast %65 : vector<1x8x512xf32> to vector<8x512xf32>
    %67 = vector.shape_cast %63 : vector<8x512xf32> to vector<1x8x512xf32>
    tpu.vector_store %arg13[%64, %c0_36, %c0_37], %67 {strides = array<i32>} : memref<8x8x512xf32, #tpu.memory_space<vmem>>, vector<1x8x512xf32>,
    %c6_i32 = arith.constant 6 : i32
    %68 = arith.index_cast %c6_i32 : i32 to index
    %c0_38 = arith.constant 0 : index
    %c0_39 = arith.constant 0 : index
    %69 = vector.load %arg2[%68, %c0_38, %c0_39] : memref<8x8x128xbf16, #tpu.memory_space<vmem>>, vector<1x8x128xbf16>
    %70 = vector.shape_cast %69 : vector<1x8x128xbf16> to vector<8x128xbf16>
    %cst_40 = arith.constant dense<0.000000e+00> : vector<8x512xf32>
    %71 = tpu.matmul %70, %3, %cst_40 {dimension_numbers = #tpu.dot_dimension_numbers<[1], [0], [0], [1], [0, 0, 1, 1], [], []>} : vector<8x128xbf16>, vector<128x512xbf16>, vector<8x512xf32> -> vector<8x512xf32>
    %72 = vector.broadcast %7 : vector<1x512xf32> to vector<8x512xf32>
    %73 = arith.addf %71, %72 : vector<8x512xf32>
    %74 = arith.index_cast %c6_i32 : i32 to index
    %c0_41 = arith.constant 0 : index
    %c0_42 = arith.constant 0 : index
    %75 = vector.load %arg13[%74, %c0_41, %c0_42] : memref<8x8x512xf32, #tpu.memory_space<vmem>>, vector<1x8x512xf32>
    %76 = vector.shape_cast %75 : vector<1x8x512xf32> to vector<8x512xf32>
    %77 = vector.shape_cast %73 : vector<8x512xf32> to vector<1x8x512xf32>
    tpu.vector_store %arg13[%74, %c0_41, %c0_42], %77 {strides = array<i32>} : memref<8x8x512xf32, #tpu.memory_space<vmem>>, vector<1x8x512xf32>,
    %c7_i32 = arith.constant 7 : i32
    %78 = arith.index_cast %c7_i32 : i32 to index
    %c0_43 = arith.constant 0 : index
    %c0_44 = arith.constant 0 : index
    %79 = vector.load %arg2[%78, %c0_43, %c0_44] : memref<8x8x128xbf16, #tpu.memory_space<vmem>>, vector<1x8x128xbf16>
    %80 = vector.shape_cast %79 : vector<1x8x128xbf16> to vector<8x128xbf16>
    %cst_45 = arith.constant dense<0.000000e+00> : vector<8x512xf32>
    %81 = tpu.matmul %80, %3, %cst_45 {dimension_numbers = #tpu.dot_dimension_numbers<[1], [0], [0], [1], [0, 0, 1, 1], [], []>} : vector<8x128xbf16>, vector<128x512xbf16>, vector<8x512xf32> -> vector<8x512xf32>
    %82 = vector.broadcast %7 : vector<1x512xf32> to vector<8x512xf32>
    %83 = arith.addf %81, %82 : vector<8x512xf32>
    %84 = arith.index_cast %c7_i32 : i32 to index
    %c0_46 = arith.constant 0 : index
    %c0_47 = arith.constant 0 : index
    %85 = vector.load %arg13[%84, %c0_46, %c0_47] : memref<8x8x512xf32, #tpu.memory_space<vmem>>, vector<1x8x512xf32>
    %86 = vector.shape_cast %85 : vector<1x8x512xf32> to vector<8x512xf32>
    %87 = vector.shape_cast %83 : vector<8x512xf32> to vector<1x8x512xf32>
    tpu.vector_store %arg13[%84, %c0_46, %c0_47], %87 {strides = array<i32>} : memref<8x8x512xf32, #tpu.memory_space<vmem>>, vector<1x8x512xf32>,
    %c8_i32 = arith.constant 8 : i32
    %c0_48 = arith.constant 0 : index
    %c0_49 = arith.constant 0 : index
    %c0_50 = arith.constant 0 : index
    %88 = vector.load %arg10[%c0_48, %c0_49, %c0_50] : memref<2x8x128xf32, #tpu.memory_space<vmem>>, vector<1x8x128xf32>
    %89 = vector.shape_cast %88 : vector<1x8x128xf32> to vector<8x128xf32>
    %c0_51 = arith.constant 0 : index
    %c0_52 = arith.constant 0 : index
    %c0_53 = arith.constant 0 : index
    %90 = vector.load %arg11[%c0_51, %c0_52, %c0_53] : memref<2x8x128xf32, #tpu.memory_space<vmem>>, vector<1x8x128xf32>
    %91 = vector.shape_cast %90 : vector<1x8x128xf32> to vector<8x128xf32>
    %c0_i32_54 = arith.constant 0 : i32
    %92 = arith.index_cast %c0_i32_54 : i32 to index
    %c0_55 = arith.constant 0 : index
    %c0_56 = arith.constant 0 : index
    %93 = vector.load %arg13[%92, %c0_55, %c0_56] : memref<8x8x512xf32, #tpu.memory_space<vmem>>, vector<1x8x512xf32>
    %94 = vector.shape_cast %93 : vector<1x8x512xf32> to vector<8x512xf32>
    %95 = arith.truncf %89 : vector<8x128xf32> to vector<8x128xbf16>
    %cst_57 = arith.constant dense<0.000000e+00> : vector<8x512xf32>
    %96 = tpu.matmul %95, %5, %cst_57 {dimension_numbers = #tpu.dot_dimension_numbers<[1], [0], [0], [1], [0, 0, 1, 1], [], []>} : vector<8x128xbf16>, vector<128x512xbf16>, vector<8x512xf32> -> vector<8x512xf32>
    %97 = arith.addf %94, %96 : vector<8x512xf32>
    %98 = vector.extract_strided_slice %97 {offsets = [0, 0], sizes = [8, 128], strides = [1, 1]} : vector<8x512xf32> to vector<8x128xf32>
    %cst_58 = arith.constant 5.000000e-01 : f32
    %99 = vector.broadcast %cst_58 : f32 to vector<8x128xf32>
    %100 = arith.mulf %99, %98 : vector<8x128xf32>
    %101 = math.tanh %100 : vector<8x128xf32>
    %cst_59 = arith.constant 5.000000e-01 : f32
    %102 = vector.broadcast %cst_59 : f32 to vector<8x128xf32>
    %103 = arith.mulf %102, %101 : vector<8x128xf32>
    %cst_60 = arith.constant 5.000000e-01 : f32
    %104 = vector.broadcast %cst_60 : f32 to vector<8x128xf32>
    %105 = arith.addf %103, %104 : vector<8x128xf32>
    %106 = vector.extract_strided_slice %97 {offsets = [0, 128], sizes = [8, 128], strides = [1, 1]} : vector<8x512xf32> to vector<8x128xf32>
    %cst_61 = arith.constant 5.000000e-01 : f32
    %107 = vector.broadcast %cst_61 : f32 to vector<8x128xf32>
    %108 = arith.mulf %107, %106 : vector<8x128xf32>
    %109 = math.tanh %108 : vector<8x128xf32>
    %cst_62 = arith.constant 5.000000e-01 : f32
    %110 = vector.broadcast %cst_62 : f32 to vector<8x128xf32>
    %111 = arith.mulf %110, %109 : vector<8x128xf32>
    %cst_63 = arith.constant 5.000000e-01 : f32
    %112 = vector.broadcast %cst_63 : f32 to vector<8x128xf32>
    %113 = arith.addf %111, %112 : vector<8x128xf32>
    %114 = vector.extract_strided_slice %97 {offsets = [0, 256], sizes = [8, 128], strides = [1, 1]} : vector<8x512xf32> to vector<8x128xf32>
    %115 = math.tanh %114 : vector<8x128xf32>
    %116 = vector.extract_strided_slice %97 {offsets = [0, 384], sizes = [8, 128], strides = [1, 1]} : vector<8x512xf32> to vector<8x128xf32>
    %cst_64 = arith.constant 5.000000e-01 : f32
    %117 = vector.broadcast %cst_64 : f32 to vector<8x128xf32>
    %118 = arith.mulf %117, %116 : vector<8x128xf32>
    %119 = math.tanh %118 : vector<8x128xf32>
    %cst_65 = arith.constant 5.000000e-01 : f32
    %120 = vector.broadcast %cst_65 : f32 to vector<8x128xf32>
    %121 = arith.mulf %120, %119 : vector<8x128xf32>
    %cst_66 = arith.constant 5.000000e-01 : f32
    %122 = vector.broadcast %cst_66 : f32 to vector<8x128xf32>
    %123 = arith.addf %121, %122 : vector<8x128xf32>
    %124 = arith.mulf %113, %91 : vector<8x128xf32>
    %125 = arith.mulf %105, %115 : vector<8x128xf32>
    %126 = arith.addf %124, %125 : vector<8x128xf32>
    %127 = math.tanh %126 : vector<8x128xf32>
    %128 = arith.mulf %123, %127 : vector<8x128xf32>
    %129 = arith.truncf %128 : vector<8x128xf32> to vector<8x128xbf16>
    %130 = arith.index_cast %c0_i32_54 : i32 to index
    %c0_67 = arith.constant 0 : index
    %c0_68 = arith.constant 0 : index
    %131 = vector.load %arg12[%130, %c0_67, %c0_68] : memref<8x8x128xbf16, #tpu.memory_space<vmem>>, vector<1x8x128xbf16>
    %132 = vector.shape_cast %131 : vector<1x8x128xbf16> to vector<8x128xbf16>
    %133 = vector.shape_cast %129 : vector<8x128xbf16> to vector<1x8x128xbf16>
    tpu.vector_store %arg12[%130, %c0_67, %c0_68], %133 {strides = array<i32>} : memref<8x8x128xbf16, #tpu.memory_space<vmem>>, vector<1x8x128xbf16>,
    %c1_i32_69 = arith.constant 1 : i32
    %134 = arith.index_cast %c1_i32_69 : i32 to index
    %c0_70 = arith.constant 0 : index
    %c0_71 = arith.constant 0 : index
    %135 = vector.load %arg13[%134, %c0_70, %c0_71] : memref<8x8x512xf32, #tpu.memory_space<vmem>>, vector<1x8x512xf32>
    %136 = vector.shape_cast %135 : vector<1x8x512xf32> to vector<8x512xf32>
    %137 = arith.truncf %128 : vector<8x128xf32> to vector<8x128xbf16>
    %cst_72 = arith.constant dense<0.000000e+00> : vector<8x512xf32>
    %138 = tpu.matmul %137, %5, %cst_72 {dimension_numbers = #tpu.dot_dimension_numbers<[1], [0], [0], [1], [0, 0, 1, 1], [], []>} : vector<8x128xbf16>, vector<128x512xbf16>, vector<8x512xf32> -> vector<8x512xf32>
    %139 = arith.addf %136, %138 : vector<8x512xf32>
    %140 = vector.extract_strided_slice %139 {offsets = [0, 0], sizes = [8, 128], strides = [1, 1]} : vector<8x512xf32> to vector<8x128xf32>
    %cst_73 = arith.constant 5.000000e-01 : f32
    %141 = vector.broadcast %cst_73 : f32 to vector<8x128xf32>
    %142 = arith.mulf %141, %140 : vector<8x128xf32>
    %143 = math.tanh %142 : vector<8x128xf32>
    %cst_74 = arith.constant 5.000000e-01 : f32
    %144 = vector.broadcast %cst_74 : f32 to vector<8x128xf32>
    %145 = arith.mulf %144, %143 : vector<8x128xf32>
    %cst_75 = arith.constant 5.000000e-01 : f32
    %146 = vector.broadcast %cst_75 : f32 to vector<8x128xf32>
    %147 = arith.addf %145, %146 : vector<8x128xf32>
    %148 = vector.extract_strided_slice %139 {offsets = [0, 128], sizes = [8, 128], strides = [1, 1]} : vector<8x512xf32> to vector<8x128xf32>
    %cst_76 = arith.constant 5.000000e-01 : f32
    %149 = vector.broadcast %cst_76 : f32 to vector<8x128xf32>
    %150 = arith.mulf %149, %148 : vector<8x128xf32>
    %151 = math.tanh %150 : vector<8x128xf32>
    %cst_77 = arith.constant 5.000000e-01 : f32
    %152 = vector.broadcast %cst_77 : f32 to vector<8x128xf32>
    %153 = arith.mulf %152, %151 : vector<8x128xf32>
    %cst_78 = arith.constant 5.000000e-01 : f32
    %154 = vector.broadcast %cst_78 : f32 to vector<8x128xf32>
    %155 = arith.addf %153, %154 : vector<8x128xf32>
    %156 = vector.extract_strided_slice %139 {offsets = [0, 256], sizes = [8, 128], strides = [1, 1]} : vector<8x512xf32> to vector<8x128xf32>
    %157 = math.tanh %156 : vector<8x128xf32>
    %158 = vector.extract_strided_slice %139 {offsets = [0, 384], sizes = [8, 128], strides = [1, 1]} : vector<8x512xf32> to vector<8x128xf32>
    %cst_79 = arith.constant 5.000000e-01 : f32
    %159 = vector.broadcast %cst_79 : f32 to vector<8x128xf32>
    %160 = arith.mulf %159, %158 : vector<8x128xf32>
    %161 = math.tanh %160 : vector<8x128xf32>
    %cst_80 = arith.constant 5.000000e-01 : f32
    %162 = vector.broadcast %cst_80 : f32 to vector<8x128xf32>
    %163 = arith.mulf %162, %161 : vector<8x128xf32>
    %cst_81 = arith.constant 5.000000e-01 : f32
    %164 = vector.broadcast %cst_81 : f32 to vector<8x128xf32>
    %165 = arith.addf %163, %164 : vector<8x128xf32>
    %166 = arith.mulf %155, %126 : vector<8x128xf32>
    %167 = arith.mulf %147, %157 : vector<8x128xf32>
    %168 = arith.addf %166, %167 : vector<8x128xf32>
    %169 = math.tanh %168 : vector<8x128xf32>
    %170 = arith.mulf %165, %169 : vector<8x128xf32>
    %171 = arith.truncf %170 : vector<8x128xf32> to vector<8x128xbf16>
    %172 = arith.index_cast %c1_i32_69 : i32 to index
    %c0_82 = arith.constant 0 : index
    %c0_83 = arith.constant 0 : index
    %173 = vector.load %arg12[%172, %c0_82, %c0_83] : memref<8x8x128xbf16, #tpu.memory_space<vmem>>, vector<1x8x128xbf16>
    %174 = vector.shape_cast %173 : vector<1x8x128xbf16> to vector<8x128xbf16>
    %175 = vector.shape_cast %171 : vector<8x128xbf16> to vector<1x8x128xbf16>
    tpu.vector_store %arg12[%172, %c0_82, %c0_83], %175 {strides = array<i32>} : memref<8x8x128xbf16, #tpu.memory_space<vmem>>, vector<1x8x128xbf16>,
    %c2_i32_84 = arith.constant 2 : i32
    %176 = arith.index_cast %c2_i32_84 : i32 to index
    %c0_85 = arith.constant 0 : index
    %c0_86 = arith.constant 0 : index
    %177 = vector.load %arg13[%176, %c0_85, %c0_86] : memref<8x8x512xf32, #tpu.memory_space<vmem>>, vector<1x8x512xf32>
    %178 = vector.shape_cast %177 : vector<1x8x512xf32> to vector<8x512xf32>
    %179 = arith.truncf %170 : vector<8x128xf32> to vector<8x128xbf16>
    %cst_87 = arith.constant dense<0.000000e+00> : vector<8x512xf32>
    %180 = tpu.matmul %179, %5, %cst_87 {dimension_numbers = #tpu.dot_dimension_numbers<[1], [0], [0], [1], [0, 0, 1, 1], [], []>} : vector<8x128xbf16>, vector<128x512xbf16>, vector<8x512xf32> -> vector<8x512xf32>
    %181 = arith.addf %178, %180 : vector<8x512xf32>
    %182 = vector.extract_strided_slice %181 {offsets = [0, 0], sizes = [8, 128], strides = [1, 1]} : vector<8x512xf32> to vector<8x128xf32>
    %cst_88 = arith.constant 5.000000e-01 : f32
    %183 = vector.broadcast %cst_88 : f32 to vector<8x128xf32>
    %184 = arith.mulf %183, %182 : vector<8x128xf32>
    %185 = math.tanh %184 : vector<8x128xf32>
    %cst_89 = arith.constant 5.000000e-01 : f32
    %186 = vector.broadcast %cst_89 : f32 to vector<8x128xf32>
    %187 = arith.mulf %186, %185 : vector<8x128xf32>
    %cst_90 = arith.constant 5.000000e-01 : f32
    %188 = vector.broadcast %cst_90 : f32 to vector<8x128xf32>
    %189 = arith.addf %187, %188 : vector<8x128xf32>
    %190 = vector.extract_strided_slice %181 {offsets = [0, 128], sizes = [8, 128], strides = [1, 1]} : vector<8x512xf32> to vector<8x128xf32>
    %cst_91 = arith.constant 5.000000e-01 : f32
    %191 = vector.broadcast %cst_91 : f32 to vector<8x128xf32>
    %192 = arith.mulf %191, %190 : vector<8x128xf32>
    %193 = math.tanh %192 : vector<8x128xf32>
    %cst_92 = arith.constant 5.000000e-01 : f32
    %194 = vector.broadcast %cst_92 : f32 to vector<8x128xf32>
    %195 = arith.mulf %194, %193 : vector<8x128xf32>
    %cst_93 = arith.constant 5.000000e-01 : f32
    %196 = vector.broadcast %cst_93 : f32 to vector<8x128xf32>
    %197 = arith.addf %195, %196 : vector<8x128xf32>
    %198 = vector.extract_strided_slice %181 {offsets = [0, 256], sizes = [8, 128], strides = [1, 1]} : vector<8x512xf32> to vector<8x128xf32>
    %199 = math.tanh %198 : vector<8x128xf32>
    %200 = vector.extract_strided_slice %181 {offsets = [0, 384], sizes = [8, 128], strides = [1, 1]} : vector<8x512xf32> to vector<8x128xf32>
    %cst_94 = arith.constant 5.000000e-01 : f32
    %201 = vector.broadcast %cst_94 : f32 to vector<8x128xf32>
    %202 = arith.mulf %201, %200 : vector<8x128xf32>
    %203 = math.tanh %202 : vector<8x128xf32>
    %cst_95 = arith.constant 5.000000e-01 : f32
    %204 = vector.broadcast %cst_95 : f32 to vector<8x128xf32>
    %205 = arith.mulf %204, %203 : vector<8x128xf32>
    %cst_96 = arith.constant 5.000000e-01 : f32
    %206 = vector.broadcast %cst_96 : f32 to vector<8x128xf32>
    %207 = arith.addf %205, %206 : vector<8x128xf32>
    %208 = arith.mulf %197, %168 : vector<8x128xf32>
    %209 = arith.mulf %189, %199 : vector<8x128xf32>
    %210 = arith.addf %208, %209 : vector<8x128xf32>
    %211 = math.tanh %210 : vector<8x128xf32>
    %212 = arith.mulf %207, %211 : vector<8x128xf32>
    %213 = arith.truncf %212 : vector<8x128xf32> to vector<8x128xbf16>
    %214 = arith.index_cast %c2_i32_84 : i32 to index
    %c0_97 = arith.constant 0 : index
    %c0_98 = arith.constant 0 : index
    %215 = vector.load %arg12[%214, %c0_97, %c0_98] : memref<8x8x128xbf16, #tpu.memory_space<vmem>>, vector<1x8x128xbf16>
    %216 = vector.shape_cast %215 : vector<1x8x128xbf16> to vector<8x128xbf16>
    %217 = vector.shape_cast %213 : vector<8x128xbf16> to vector<1x8x128xbf16>
    tpu.vector_store %arg12[%214, %c0_97, %c0_98], %217 {strides = array<i32>} : memref<8x8x128xbf16, #tpu.memory_space<vmem>>, vector<1x8x128xbf16>,
    %c3_i32_99 = arith.constant 3 : i32
    %218 = arith.index_cast %c3_i32_99 : i32 to index
    %c0_100 = arith.constant 0 : index
    %c0_101 = arith.constant 0 : index
    %219 = vector.load %arg13[%218, %c0_100, %c0_101] : memref<8x8x512xf32, #tpu.memory_space<vmem>>, vector<1x8x512xf32>
    %220 = vector.shape_cast %219 : vector<1x8x512xf32> to vector<8x512xf32>
    %221 = arith.truncf %212 : vector<8x128xf32> to vector<8x128xbf16>
    %cst_102 = arith.constant dense<0.000000e+00> : vector<8x512xf32>
    %222 = tpu.matmul %221, %5, %cst_102 {dimension_numbers = #tpu.dot_dimension_numbers<[1], [0], [0], [1], [0, 0, 1, 1], [], []>} : vector<8x128xbf16>, vector<128x512xbf16>, vector<8x512xf32> -> vector<8x512xf32>
    %223 = arith.addf %220, %222 : vector<8x512xf32>
    %224 = vector.extract_strided_slice %223 {offsets = [0, 0], sizes = [8, 128], strides = [1, 1]} : vector<8x512xf32> to vector<8x128xf32>
    %cst_103 = arith.constant 5.000000e-01 : f32
    %225 = vector.broadcast %cst_103 : f32 to vector<8x128xf32>
    %226 = arith.mulf %225, %224 : vector<8x128xf32>
    %227 = math.tanh %226 : vector<8x128xf32>
    %cst_104 = arith.constant 5.000000e-01 : f32
    %228 = vector.broadcast %cst_104 : f32 to vector<8x128xf32>
    %229 = arith.mulf %228, %227 : vector<8x128xf32>
    %cst_105 = arith.constant 5.000000e-01 : f32
    %230 = vector.broadcast %cst_105 : f32 to vector<8x128xf32>
    %231 = arith.addf %229, %230 : vector<8x128xf32>
    %232 = vector.extract_strided_slice %223 {offsets = [0, 128], sizes = [8, 128], strides = [1, 1]} : vector<8x512xf32> to vector<8x128xf32>
    %cst_106 = arith.constant 5.000000e-01 : f32
    %233 = vector.broadcast %cst_106 : f32 to vector<8x128xf32>
    %234 = arith.mulf %233, %232 : vector<8x128xf32>
    %235 = math.tanh %234 : vector<8x128xf32>
    %cst_107 = arith.constant 5.000000e-01 : f32
    %236 = vector.broadcast %cst_107 : f32 to vector<8x128xf32>
    %237 = arith.mulf %236, %235 : vector<8x128xf32>
    %cst_108 = arith.constant 5.000000e-01 : f32
    %238 = vector.broadcast %cst_108 : f32 to vector<8x128xf32>
    %239 = arith.addf %237, %238 : vector<8x128xf32>
    %240 = vector.extract_strided_slice %223 {offsets = [0, 256], sizes = [8, 128], strides = [1, 1]} : vector<8x512xf32> to vector<8x128xf32>
    %241 = math.tanh %240 : vector<8x128xf32>
    %242 = vector.extract_strided_slice %223 {offsets = [0, 384], sizes = [8, 128], strides = [1, 1]} : vector<8x512xf32> to vector<8x128xf32>
    %cst_109 = arith.constant 5.000000e-01 : f32
    %243 = vector.broadcast %cst_109 : f32 to vector<8x128xf32>
    %244 = arith.mulf %243, %242 : vector<8x128xf32>
    %245 = math.tanh %244 : vector<8x128xf32>
    %cst_110 = arith.constant 5.000000e-01 : f32
    %246 = vector.broadcast %cst_110 : f32 to vector<8x128xf32>
    %247 = arith.mulf %246, %245 : vector<8x128xf32>
    %cst_111 = arith.constant 5.000000e-01 : f32
    %248 = vector.broadcast %cst_111 : f32 to vector<8x128xf32>
    %249 = arith.addf %247, %248 : vector<8x128xf32>
    %250 = arith.mulf %239, %210 : vector<8x128xf32>
    %251 = arith.mulf %231, %241 : vector<8x128xf32>
    %252 = arith.addf %250, %251 : vector<8x128xf32>
    %253 = math.tanh %252 : vector<8x128xf32>
    %254 = arith.mulf %249, %253 : vector<8x128xf32>
    %255 = arith.truncf %254 : vector<8x128xf32> to vector<8x128xbf16>
    %256 = arith.index_cast %c3_i32_99 : i32 to index
    %c0_112 = arith.constant 0 : index
    %c0_113 = arith.constant 0 : index
    %257 = vector.load %arg12[%256, %c0_112, %c0_113] : memref<8x8x128xbf16, #tpu.memory_space<vmem>>, vector<1x8x128xbf16>
    %258 = vector.shape_cast %257 : vector<1x8x128xbf16> to vector<8x128xbf16>
    %259 = vector.shape_cast %255 : vector<8x128xbf16> to vector<1x8x128xbf16>
    tpu.vector_store %arg12[%256, %c0_112, %c0_113], %259 {strides = array<i32>} : memref<8x8x128xbf16, #tpu.memory_space<vmem>>, vector<1x8x128xbf16>,
    %c4_i32_114 = arith.constant 4 : i32
    %260 = arith.index_cast %c4_i32_114 : i32 to index
    %c0_115 = arith.constant 0 : index
    %c0_116 = arith.constant 0 : index
    %261 = vector.load %arg13[%260, %c0_115, %c0_116] : memref<8x8x512xf32, #tpu.memory_space<vmem>>, vector<1x8x512xf32>
    %262 = vector.shape_cast %261 : vector<1x8x512xf32> to vector<8x512xf32>
    %263 = arith.truncf %254 : vector<8x128xf32> to vector<8x128xbf16>
    %cst_117 = arith.constant dense<0.000000e+00> : vector<8x512xf32>
    %264 = tpu.matmul %263, %5, %cst_117 {dimension_numbers = #tpu.dot_dimension_numbers<[1], [0], [0], [1], [0, 0, 1, 1], [], []>} : vector<8x128xbf16>, vector<128x512xbf16>, vector<8x512xf32> -> vector<8x512xf32>
    %265 = arith.addf %262, %264 : vector<8x512xf32>
    %266 = vector.extract_strided_slice %265 {offsets = [0, 0], sizes = [8, 128], strides = [1, 1]} : vector<8x512xf32> to vector<8x128xf32>
    %cst_118 = arith.constant 5.000000e-01 : f32
    %267 = vector.broadcast %cst_118 : f32 to vector<8x128xf32>
    %268 = arith.mulf %267, %266 : vector<8x128xf32>
    %269 = math.tanh %268 : vector<8x128xf32>
    %cst_119 = arith.constant 5.000000e-01 : f32
    %270 = vector.broadcast %cst_119 : f32 to vector<8x128xf32>
    %271 = arith.mulf %270, %269 : vector<8x128xf32>
    %cst_120 = arith.constant 5.000000e-01 : f32
    %272 = vector.broadcast %cst_120 : f32 to vector<8x128xf32>
    %273 = arith.addf %271, %272 : vector<8x128xf32>
    %274 = vector.extract_strided_slice %265 {offsets = [0, 128], sizes = [8, 128], strides = [1, 1]} : vector<8x512xf32> to vector<8x128xf32>
    %cst_121 = arith.constant 5.000000e-01 : f32
    %275 = vector.broadcast %cst_121 : f32 to vector<8x128xf32>
    %276 = arith.mulf %275, %274 : vector<8x128xf32>
    %277 = math.tanh %276 : vector<8x128xf32>
    %cst_122 = arith.constant 5.000000e-01 : f32
    %278 = vector.broadcast %cst_122 : f32 to vector<8x128xf32>
    %279 = arith.mulf %278, %277 : vector<8x128xf32>
    %cst_123 = arith.constant 5.000000e-01 : f32
    %280 = vector.broadcast %cst_123 : f32 to vector<8x128xf32>
    %281 = arith.addf %279, %280 : vector<8x128xf32>
    %282 = vector.extract_strided_slice %265 {offsets = [0, 256], sizes = [8, 128], strides = [1, 1]} : vector<8x512xf32> to vector<8x128xf32>
    %283 = math.tanh %282 : vector<8x128xf32>
    %284 = vector.extract_strided_slice %265 {offsets = [0, 384], sizes = [8, 128], strides = [1, 1]} : vector<8x512xf32> to vector<8x128xf32>
    %cst_124 = arith.constant 5.000000e-01 : f32
    %285 = vector.broadcast %cst_124 : f32 to vector<8x128xf32>
    %286 = arith.mulf %285, %284 : vector<8x128xf32>
    %287 = math.tanh %286 : vector<8x128xf32>
    %cst_125 = arith.constant 5.000000e-01 : f32
    %288 = vector.broadcast %cst_125 : f32 to vector<8x128xf32>
    %289 = arith.mulf %288, %287 : vector<8x128xf32>
    %cst_126 = arith.constant 5.000000e-01 : f32
    %290 = vector.broadcast %cst_126 : f32 to vector<8x128xf32>
    %291 = arith.addf %289, %290 : vector<8x128xf32>
    %292 = arith.mulf %281, %252 : vector<8x128xf32>
    %293 = arith.mulf %273, %283 : vector<8x128xf32>
    %294 = arith.addf %292, %293 : vector<8x128xf32>
    %295 = math.tanh %294 : vector<8x128xf32>
    %296 = arith.mulf %291, %295 : vector<8x128xf32>
    %297 = arith.truncf %296 : vector<8x128xf32> to vector<8x128xbf16>
    %298 = arith.index_cast %c4_i32_114 : i32 to index
    %c0_127 = arith.constant 0 : index
    %c0_128 = arith.constant 0 : index
    %299 = vector.load %arg12[%298, %c0_127, %c0_128] : memref<8x8x128xbf16, #tpu.memory_space<vmem>>, vector<1x8x128xbf16>
    %300 = vector.shape_cast %299 : vector<1x8x128xbf16> to vector<8x128xbf16>
    %301 = vector.shape_cast %297 : vector<8x128xbf16> to vector<1x8x128xbf16>
    tpu.vector_store %arg12[%298, %c0_127, %c0_128], %301 {strides = array<i32>} : memref<8x8x128xbf16, #tpu.memory_space<vmem>>, vector<1x8x128xbf16>,
    %c5_i32_129 = arith.constant 5 : i32
    %302 = arith.index_cast %c5_i32_129 : i32 to index
    %c0_130 = arith.constant 0 : index
    %c0_131 = arith.constant 0 : index
    %303 = vector.load %arg13[%302, %c0_130, %c0_131] : memref<8x8x512xf32, #tpu.memory_space<vmem>>, vector<1x8x512xf32>
    %304 = vector.shape_cast %303 : vector<1x8x512xf32> to vector<8x512xf32>
    %305 = arith.truncf %296 : vector<8x128xf32> to vector<8x128xbf16>
    %cst_132 = arith.constant dense<0.000000e+00> : vector<8x512xf32>
    %306 = tpu.matmul %305, %5, %cst_132 {dimension_numbers = #tpu.dot_dimension_numbers<[1], [0], [0], [1], [0, 0, 1, 1], [], []>} : vector<8x128xbf16>, vector<128x512xbf16>, vector<8x512xf32> -> vector<8x512xf32>
    %307 = arith.addf %304, %306 : vector<8x512xf32>
    %308 = vector.extract_strided_slice %307 {offsets = [0, 0], sizes = [8, 128], strides = [1, 1]} : vector<8x512xf32> to vector<8x128xf32>
    %cst_133 = arith.constant 5.000000e-01 : f32
    %309 = vector.broadcast %cst_133 : f32 to vector<8x128xf32>
    %310 = arith.mulf %309, %308 : vector<8x128xf32>
    %311 = math.tanh %310 : vector<8x128xf32>
    %cst_134 = arith.constant 5.000000e-01 : f32
    %312 = vector.broadcast %cst_134 : f32 to vector<8x128xf32>
    %313 = arith.mulf %312, %311 : vector<8x128xf32>
    %cst_135 = arith.constant 5.000000e-01 : f32
    %314 = vector.broadcast %cst_135 : f32 to vector<8x128xf32>
    %315 = arith.addf %313, %314 : vector<8x128xf32>
    %316 = vector.extract_strided_slice %307 {offsets = [0, 128], sizes = [8, 128], strides = [1, 1]} : vector<8x512xf32> to vector<8x128xf32>
    %cst_136 = arith.constant 5.000000e-01 : f32
    %317 = vector.broadcast %cst_136 : f32 to vector<8x128xf32>
    %318 = arith.mulf %317, %316 : vector<8x128xf32>
    %319 = math.tanh %318 : vector<8x128xf32>
    %cst_137 = arith.constant 5.000000e-01 : f32
    %320 = vector.broadcast %cst_137 : f32 to vector<8x128xf32>
    %321 = arith.mulf %320, %319 : vector<8x128xf32>
    %cst_138 = arith.constant 5.000000e-01 : f32
    %322 = vector.broadcast %cst_138 : f32 to vector<8x128xf32>
    %323 = arith.addf %321, %322 : vector<8x128xf32>
    %324 = vector.extract_strided_slice %307 {offsets = [0, 256], sizes = [8, 128], strides = [1, 1]} : vector<8x512xf32> to vector<8x128xf32>
    %325 = math.tanh %324 : vector<8x128xf32>
    %326 = vector.extract_strided_slice %307 {offsets = [0, 384], sizes = [8, 128], strides = [1, 1]} : vector<8x512xf32> to vector<8x128xf32>
    %cst_139 = arith.constant 5.000000e-01 : f32
    %327 = vector.broadcast %cst_139 : f32 to vector<8x128xf32>
    %328 = arith.mulf %327, %326 : vector<8x128xf32>
    %329 = math.tanh %328 : vector<8x128xf32>
    %cst_140 = arith.constant 5.000000e-01 : f32
    %330 = vector.broadcast %cst_140 : f32 to vector<8x128xf32>
    %331 = arith.mulf %330, %329 : vector<8x128xf32>
    %cst_141 = arith.constant 5.000000e-01 : f32
    %332 = vector.broadcast %cst_141 : f32 to vector<8x128xf32>
    %333 = arith.addf %331, %332 : vector<8x128xf32>
    %334 = arith.mulf %323, %294 : vector<8x128xf32>
    %335 = arith.mulf %315, %325 : vector<8x128xf32>
    %336 = arith.addf %334, %335 : vector<8x128xf32>
    %337 = math.tanh %336 : vector<8x128xf32>
    %338 = arith.mulf %333, %337 : vector<8x128xf32>
    %339 = arith.truncf %338 : vector<8x128xf32> to vector<8x128xbf16>
    %340 = arith.index_cast %c5_i32_129 : i32 to index
    %c0_142 = arith.constant 0 : index
    %c0_143 = arith.constant 0 : index
    %341 = vector.load %arg12[%340, %c0_142, %c0_143] : memref<8x8x128xbf16, #tpu.memory_space<vmem>>, vector<1x8x128xbf16>
    %342 = vector.shape_cast %341 : vector<1x8x128xbf16> to vector<8x128xbf16>
    %343 = vector.shape_cast %339 : vector<8x128xbf16> to vector<1x8x128xbf16>
    tpu.vector_store %arg12[%340, %c0_142, %c0_143], %343 {strides = array<i32>} : memref<8x8x128xbf16, #tpu.memory_space<vmem>>, vector<1x8x128xbf16>,
    %c6_i32_144 = arith.constant 6 : i32
    %344 = arith.index_cast %c6_i32_144 : i32 to index
    %c0_145 = arith.constant 0 : index
    %c0_146 = arith.constant 0 : index
    %345 = vector.load %arg13[%344, %c0_145, %c0_146] : memref<8x8x512xf32, #tpu.memory_space<vmem>>, vector<1x8x512xf32>
    %346 = vector.shape_cast %345 : vector<1x8x512xf32> to vector<8x512xf32>
    %347 = arith.truncf %338 : vector<8x128xf32> to vector<8x128xbf16>
    %cst_147 = arith.constant dense<0.000000e+00> : vector<8x512xf32>
    %348 = tpu.matmul %347, %5, %cst_147 {dimension_numbers = #tpu.dot_dimension_numbers<[1], [0], [0], [1], [0, 0, 1, 1], [], []>} : vector<8x128xbf16>, vector<128x512xbf16>, vector<8x512xf32> -> vector<8x512xf32>
    %349 = arith.addf %346, %348 : vector<8x512xf32>
    %350 = vector.extract_strided_slice %349 {offsets = [0, 0], sizes = [8, 128], strides = [1, 1]} : vector<8x512xf32> to vector<8x128xf32>
    %cst_148 = arith.constant 5.000000e-01 : f32
    %351 = vector.broadcast %cst_148 : f32 to vector<8x128xf32>
    %352 = arith.mulf %351, %350 : vector<8x128xf32>
    %353 = math.tanh %352 : vector<8x128xf32>
    %cst_149 = arith.constant 5.000000e-01 : f32
    %354 = vector.broadcast %cst_149 : f32 to vector<8x128xf32>
    %355 = arith.mulf %354, %353 : vector<8x128xf32>
    %cst_150 = arith.constant 5.000000e-01 : f32
    %356 = vector.broadcast %cst_150 : f32 to vector<8x128xf32>
    %357 = arith.addf %355, %356 : vector<8x128xf32>
    %358 = vector.extract_strided_slice %349 {offsets = [0, 128], sizes = [8, 128], strides = [1, 1]} : vector<8x512xf32> to vector<8x128xf32>
    %cst_151 = arith.constant 5.000000e-01 : f32
    %359 = vector.broadcast %cst_151 : f32 to vector<8x128xf32>
    %360 = arith.mulf %359, %358 : vector<8x128xf32>
    %361 = math.tanh %360 : vector<8x128xf32>
    %cst_152 = arith.constant 5.000000e-01 : f32
    %362 = vector.broadcast %cst_152 : f32 to vector<8x128xf32>
    %363 = arith.mulf %362, %361 : vector<8x128xf32>
    %cst_153 = arith.constant 5.000000e-01 : f32
    %364 = vector.broadcast %cst_153 : f32 to vector<8x128xf32>
    %365 = arith.addf %363, %364 : vector<8x128xf32>
    %366 = vector.extract_strided_slice %349 {offsets = [0, 256], sizes = [8, 128], strides = [1, 1]} : vector<8x512xf32> to vector<8x128xf32>
    %367 = math.tanh %366 : vector<8x128xf32>
    %368 = vector.extract_strided_slice %349 {offsets = [0, 384], sizes = [8, 128], strides = [1, 1]} : vector<8x512xf32> to vector<8x128xf32>
    %cst_154 = arith.constant 5.000000e-01 : f32
    %369 = vector.broadcast %cst_154 : f32 to vector<8x128xf32>
    %370 = arith.mulf %369, %368 : vector<8x128xf32>
    %371 = math.tanh %370 : vector<8x128xf32>
    %cst_155 = arith.constant 5.000000e-01 : f32
    %372 = vector.broadcast %cst_155 : f32 to vector<8x128xf32>
    %373 = arith.mulf %372, %371 : vector<8x128xf32>
    %cst_156 = arith.constant 5.000000e-01 : f32
    %374 = vector.broadcast %cst_156 : f32 to vector<8x128xf32>
    %375 = arith.addf %373, %374 : vector<8x128xf32>
    %376 = arith.mulf %365, %336 : vector<8x128xf32>
    %377 = arith.mulf %357, %367 : vector<8x128xf32>
    %378 = arith.addf %376, %377 : vector<8x128xf32>
    %379 = math.tanh %378 : vector<8x128xf32>
    %380 = arith.mulf %375, %379 : vector<8x128xf32>
    %381 = arith.truncf %380 : vector<8x128xf32> to vector<8x128xbf16>
    %382 = arith.index_cast %c6_i32_144 : i32 to index
    %c0_157 = arith.constant 0 : index
    %c0_158 = arith.constant 0 : index
    %383 = vector.load %arg12[%382, %c0_157, %c0_158] : memref<8x8x128xbf16, #tpu.memory_space<vmem>>, vector<1x8x128xbf16>
    %384 = vector.shape_cast %383 : vector<1x8x128xbf16> to vector<8x128xbf16>
    %385 = vector.shape_cast %381 : vector<8x128xbf16> to vector<1x8x128xbf16>
    tpu.vector_store %arg12[%382, %c0_157, %c0_158], %385 {strides = array<i32>} : memref<8x8x128xbf16, #tpu.memory_space<vmem>>, vector<1x8x128xbf16>,
    %c7_i32_159 = arith.constant 7 : i32
    %386 = arith.index_cast %c7_i32_159 : i32 to index
    %c0_160 = arith.constant 0 : index
    %c0_161 = arith.constant 0 : index
    %387 = vector.load %arg13[%386, %c0_160, %c0_161] : memref<8x8x512xf32, #tpu.memory_space<vmem>>, vector<1x8x512xf32>
    %388 = vector.shape_cast %387 : vector<1x8x512xf32> to vector<8x512xf32>
    %389 = arith.truncf %380 : vector<8x128xf32> to vector<8x128xbf16>
    %cst_162 = arith.constant dense<0.000000e+00> : vector<8x512xf32>
    %390 = tpu.matmul %389, %5, %cst_162 {dimension_numbers = #tpu.dot_dimension_numbers<[1], [0], [0], [1], [0, 0, 1, 1], [], []>} : vector<8x128xbf16>, vector<128x512xbf16>, vector<8x512xf32> -> vector<8x512xf32>
    %391 = arith.addf %388, %390 : vector<8x512xf32>
    %392 = vector.extract_strided_slice %391 {offsets = [0, 0], sizes = [8, 128], strides = [1, 1]} : vector<8x512xf32> to vector<8x128xf32>
    %cst_163 = arith.constant 5.000000e-01 : f32
    %393 = vector.broadcast %cst_163 : f32 to vector<8x128xf32>
    %394 = arith.mulf %393, %392 : vector<8x128xf32>
    %395 = math.tanh %394 : vector<8x128xf32>
    %cst_164 = arith.constant 5.000000e-01 : f32
    %396 = vector.broadcast %cst_164 : f32 to vector<8x128xf32>
    %397 = arith.mulf %396, %395 : vector<8x128xf32>
    %cst_165 = arith.constant 5.000000e-01 : f32
    %398 = vector.broadcast %cst_165 : f32 to vector<8x128xf32>
    %399 = arith.addf %397, %398 : vector<8x128xf32>
    %400 = vector.extract_strided_slice %391 {offsets = [0, 128], sizes = [8, 128], strides = [1, 1]} : vector<8x512xf32> to vector<8x128xf32>
    %cst_166 = arith.constant 5.000000e-01 : f32
    %401 = vector.broadcast %cst_166 : f32 to vector<8x128xf32>
    %402 = arith.mulf %401, %400 : vector<8x128xf32>
    %403 = math.tanh %402 : vector<8x128xf32>
    %cst_167 = arith.constant 5.000000e-01 : f32
    %404 = vector.broadcast %cst_167 : f32 to vector<8x128xf32>
    %405 = arith.mulf %404, %403 : vector<8x128xf32>
    %cst_168 = arith.constant 5.000000e-01 : f32
    %406 = vector.broadcast %cst_168 : f32 to vector<8x128xf32>
    %407 = arith.addf %405, %406 : vector<8x128xf32>
    %408 = vector.extract_strided_slice %391 {offsets = [0, 256], sizes = [8, 128], strides = [1, 1]} : vector<8x512xf32> to vector<8x128xf32>
    %409 = math.tanh %408 : vector<8x128xf32>
    %410 = vector.extract_strided_slice %391 {offsets = [0, 384], sizes = [8, 128], strides = [1, 1]} : vector<8x512xf32> to vector<8x128xf32>
    %cst_169 = arith.constant 5.000000e-01 : f32
    %411 = vector.broadcast %cst_169 : f32 to vector<8x128xf32>
    %412 = arith.mulf %411, %410 : vector<8x128xf32>
    %413 = math.tanh %412 : vector<8x128xf32>
    %cst_170 = arith.constant 5.000000e-01 : f32
    %414 = vector.broadcast %cst_170 : f32 to vector<8x128xf32>
    %415 = arith.mulf %414, %413 : vector<8x128xf32>
    %cst_171 = arith.constant 5.000000e-01 : f32
    %416 = vector.broadcast %cst_171 : f32 to vector<8x128xf32>
    %417 = arith.addf %415, %416 : vector<8x128xf32>
    %418 = arith.mulf %407, %378 : vector<8x128xf32>
    %419 = arith.mulf %399, %409 : vector<8x128xf32>
    %420 = arith.addf %418, %419 : vector<8x128xf32>
    %421 = math.tanh %420 : vector<8x128xf32>
    %422 = arith.mulf %417, %421 : vector<8x128xf32>
    %423 = arith.truncf %422 : vector<8x128xf32> to vector<8x128xbf16>
    %424 = arith.index_cast %c7_i32_159 : i32 to index
    %c0_172 = arith.constant 0 : index
    %c0_173 = arith.constant 0 : index
    %425 = vector.load %arg12[%424, %c0_172, %c0_173] : memref<8x8x128xbf16, #tpu.memory_space<vmem>>, vector<1x8x128xbf16>
    %426 = vector.shape_cast %425 : vector<1x8x128xbf16> to vector<8x128xbf16>
    %427 = vector.shape_cast %423 : vector<8x128xbf16> to vector<1x8x128xbf16>
    tpu.vector_store %arg12[%424, %c0_172, %c0_173], %427 {strides = array<i32>} : memref<8x8x128xbf16, #tpu.memory_space<vmem>>, vector<1x8x128xbf16>,
    %c8_i32_174 = arith.constant 8 : i32
    %c0_i32_175 = arith.constant 0 : i32
    %428 = arith.cmpi eq, %arg1, %c0_i32_175 : i32
    %429 = arith.extui %428 : i1 to i32
    %c0_i32_176 = arith.constant 0 : i32
    %430 = arith.cmpi ne, %429, %c0_i32_176 : i32
    scf.if %430 {
      %c0_375 = arith.constant 0 : index
      %c0_376 = arith.constant 0 : index
      %c0_377 = arith.constant 0 : index
      %872 = vector.load %arg8[%c0_375, %c0_376, %c0_377] : memref<2x8x128xf32, #tpu.memory_space<vmem>>, vector<1x8x128xf32>
      %873 = vector.shape_cast %872 : vector<1x8x128xf32> to vector<8x128xf32>
      %874 = vector.shape_cast %422 : vector<8x128xf32> to vector<1x8x128xf32>
      tpu.vector_store %arg8[%c0_375, %c0_376, %c0_377], %874 {strides = array<i32>} : memref<2x8x128xf32, #tpu.memory_space<vmem>>, vector<1x8x128xf32>,
      %c0_378 = arith.constant 0 : index
      %c0_379 = arith.constant 0 : index
      %c0_380 = arith.constant 0 : index
      %875 = vector.load %arg9[%c0_378, %c0_379, %c0_380] : memref<2x8x128xf32, #tpu.memory_space<vmem>>, vector<1x8x128xf32>
      %876 = vector.shape_cast %875 : vector<1x8x128xf32> to vector<8x128xf32>
      %877 = vector.shape_cast %420 : vector<8x128xf32> to vector<1x8x128xf32>
      tpu.vector_store %arg9[%c0_378, %c0_379, %c0_380], %877 {strides = array<i32>} : memref<2x8x128xf32, #tpu.memory_space<vmem>>, vector<1x8x128xf32>,
    } else {
    }
    %c0_177 = arith.constant 0 : index
    %c0_178 = arith.constant 0 : index
    %c0_179 = arith.constant 0 : index
    %431 = vector.load %arg10[%c0_177, %c0_178, %c0_179] : memref<2x8x128xf32, #tpu.memory_space<vmem>>, vector<1x8x128xf32>
    %432 = vector.shape_cast %431 : vector<1x8x128xf32> to vector<8x128xf32>
    %433 = vector.shape_cast %422 : vector<8x128xf32> to vector<1x8x128xf32>
    tpu.vector_store %arg10[%c0_177, %c0_178, %c0_179], %433 {strides = array<i32>} : memref<2x8x128xf32, #tpu.memory_space<vmem>>, vector<1x8x128xf32>,
    %c0_180 = arith.constant 0 : index
    %c0_181 = arith.constant 0 : index
    %c0_182 = arith.constant 0 : index
    %434 = vector.load %arg11[%c0_180, %c0_181, %c0_182] : memref<2x8x128xf32, #tpu.memory_space<vmem>>, vector<1x8x128xf32>
    %435 = vector.shape_cast %434 : vector<1x8x128xf32> to vector<8x128xf32>
    %436 = vector.shape_cast %420 : vector<8x128xf32> to vector<1x8x128xf32>
    tpu.vector_store %arg11[%c0_180, %c0_181, %c0_182], %436 {strides = array<i32>} : memref<2x8x128xf32, #tpu.memory_space<vmem>>, vector<1x8x128xf32>,
    %c0_183 = arith.constant 0 : index
    %c0_184 = arith.constant 0 : index
    %c0_185 = arith.constant 0 : index
    %437 = vector.load %arg6[%c0_183, %c0_184, %c0_185] : memref<1x128x512xbf16, #tpu.memory_space<vmem>>, vector<1x128x512xbf16>
    %438 = vector.shape_cast %437 : vector<1x128x512xbf16> to vector<128x512xbf16>
    %c1 = arith.constant 1 : index
    %c0_186 = arith.constant 0 : index
    %c0_187 = arith.constant 0 : index
    %439 = vector.load %arg4[%c1, %c0_186, %c0_187] : memref<2x128x512xbf16, #tpu.memory_space<vmem>>, vector<1x128x512xbf16>
    %440 = vector.shape_cast %439 : vector<1x128x512xbf16> to vector<128x512xbf16>
    %c1_188 = arith.constant 1 : index
    %c0_189 = arith.constant 0 : index
    %c0_190 = arith.constant 0 : index
    %441 = vector.load %arg5[%c1_188, %c0_189, %c0_190] : memref<2x1x512xf32, #tpu.memory_space<vmem>>, vector<1x1x512xf32>
    %442 = vector.shape_cast %441 : vector<1x1x512xf32> to vector<1x512xf32>
    %c0_i32_191 = arith.constant 0 : i32
    %443 = arith.index_cast %c0_i32_191 : i32 to index
    %c0_192 = arith.constant 0 : index
    %c0_193 = arith.constant 0 : index
    %444 = vector.load %arg12[%443, %c0_192, %c0_193] : memref<8x8x128xbf16, #tpu.memory_space<vmem>>, vector<1x8x128xbf16>
    %445 = vector.shape_cast %444 : vector<1x8x128xbf16> to vector<8x128xbf16>
    %cst_194 = arith.constant dense<0.000000e+00> : vector<8x512xf32>
    %446 = tpu.matmul %445, %438, %cst_194 {dimension_numbers = #tpu.dot_dimension_numbers<[1], [0], [0], [1], [0, 0, 1, 1], [], []>} : vector<8x128xbf16>, vector<128x512xbf16>, vector<8x512xf32> -> vector<8x512xf32>
    %447 = vector.broadcast %442 : vector<1x512xf32> to vector<8x512xf32>
    %448 = arith.addf %446, %447 : vector<8x512xf32>
    %449 = arith.index_cast %c0_i32_191 : i32 to index
    %c0_195 = arith.constant 0 : index
    %c0_196 = arith.constant 0 : index
    %450 = vector.load %arg13[%449, %c0_195, %c0_196] : memref<8x8x512xf32, #tpu.memory_space<vmem>>, vector<1x8x512xf32>
    %451 = vector.shape_cast %450 : vector<1x8x512xf32> to vector<8x512xf32>
    %452 = vector.shape_cast %448 : vector<8x512xf32> to vector<1x8x512xf32>
    tpu.vector_store %arg13[%449, %c0_195, %c0_196], %452 {strides = array<i32>} : memref<8x8x512xf32, #tpu.memory_space<vmem>>, vector<1x8x512xf32>,
    %c1_i32_197 = arith.constant 1 : i32
    %453 = arith.index_cast %c1_i32_197 : i32 to index
    %c0_198 = arith.constant 0 : index
    %c0_199 = arith.constant 0 : index
    %454 = vector.load %arg12[%453, %c0_198, %c0_199] : memref<8x8x128xbf16, #tpu.memory_space<vmem>>, vector<1x8x128xbf16>
    %455 = vector.shape_cast %454 : vector<1x8x128xbf16> to vector<8x128xbf16>
    %cst_200 = arith.constant dense<0.000000e+00> : vector<8x512xf32>
    %456 = tpu.matmul %455, %438, %cst_200 {dimension_numbers = #tpu.dot_dimension_numbers<[1], [0], [0], [1], [0, 0, 1, 1], [], []>} : vector<8x128xbf16>, vector<128x512xbf16>, vector<8x512xf32> -> vector<8x512xf32>
    %457 = vector.broadcast %442 : vector<1x512xf32> to vector<8x512xf32>
    %458 = arith.addf %456, %457 : vector<8x512xf32>
    %459 = arith.index_cast %c1_i32_197 : i32 to index
    %c0_201 = arith.constant 0 : index
    %c0_202 = arith.constant 0 : index
    %460 = vector.load %arg13[%459, %c0_201, %c0_202] : memref<8x8x512xf32, #tpu.memory_space<vmem>>, vector<1x8x512xf32>
    %461 = vector.shape_cast %460 : vector<1x8x512xf32> to vector<8x512xf32>
    %462 = vector.shape_cast %458 : vector<8x512xf32> to vector<1x8x512xf32>
    tpu.vector_store %arg13[%459, %c0_201, %c0_202], %462 {strides = array<i32>} : memref<8x8x512xf32, #tpu.memory_space<vmem>>, vector<1x8x512xf32>,
    %c2_i32_203 = arith.constant 2 : i32
    %463 = arith.index_cast %c2_i32_203 : i32 to index
    %c0_204 = arith.constant 0 : index
    %c0_205 = arith.constant 0 : index
    %464 = vector.load %arg12[%463, %c0_204, %c0_205] : memref<8x8x128xbf16, #tpu.memory_space<vmem>>, vector<1x8x128xbf16>
    %465 = vector.shape_cast %464 : vector<1x8x128xbf16> to vector<8x128xbf16>
    %cst_206 = arith.constant dense<0.000000e+00> : vector<8x512xf32>
    %466 = tpu.matmul %465, %438, %cst_206 {dimension_numbers = #tpu.dot_dimension_numbers<[1], [0], [0], [1], [0, 0, 1, 1], [], []>} : vector<8x128xbf16>, vector<128x512xbf16>, vector<8x512xf32> -> vector<8x512xf32>
    %467 = vector.broadcast %442 : vector<1x512xf32> to vector<8x512xf32>
    %468 = arith.addf %466, %467 : vector<8x512xf32>
    %469 = arith.index_cast %c2_i32_203 : i32 to index
    %c0_207 = arith.constant 0 : index
    %c0_208 = arith.constant 0 : index
    %470 = vector.load %arg13[%469, %c0_207, %c0_208] : memref<8x8x512xf32, #tpu.memory_space<vmem>>, vector<1x8x512xf32>
    %471 = vector.shape_cast %470 : vector<1x8x512xf32> to vector<8x512xf32>
    %472 = vector.shape_cast %468 : vector<8x512xf32> to vector<1x8x512xf32>
    tpu.vector_store %arg13[%469, %c0_207, %c0_208], %472 {strides = array<i32>} : memref<8x8x512xf32, #tpu.memory_space<vmem>>, vector<1x8x512xf32>,
    %c3_i32_209 = arith.constant 3 : i32
    %473 = arith.index_cast %c3_i32_209 : i32 to index
    %c0_210 = arith.constant 0 : index
    %c0_211 = arith.constant 0 : index
    %474 = vector.load %arg12[%473, %c0_210, %c0_211] : memref<8x8x128xbf16, #tpu.memory_space<vmem>>, vector<1x8x128xbf16>
    %475 = vector.shape_cast %474 : vector<1x8x128xbf16> to vector<8x128xbf16>
    %cst_212 = arith.constant dense<0.000000e+00> : vector<8x512xf32>
    %476 = tpu.matmul %475, %438, %cst_212 {dimension_numbers = #tpu.dot_dimension_numbers<[1], [0], [0], [1], [0, 0, 1, 1], [], []>} : vector<8x128xbf16>, vector<128x512xbf16>, vector<8x512xf32> -> vector<8x512xf32>
    %477 = vector.broadcast %442 : vector<1x512xf32> to vector<8x512xf32>
    %478 = arith.addf %476, %477 : vector<8x512xf32>
    %479 = arith.index_cast %c3_i32_209 : i32 to index
    %c0_213 = arith.constant 0 : index
    %c0_214 = arith.constant 0 : index
    %480 = vector.load %arg13[%479, %c0_213, %c0_214] : memref<8x8x512xf32, #tpu.memory_space<vmem>>, vector<1x8x512xf32>
    %481 = vector.shape_cast %480 : vector<1x8x512xf32> to vector<8x512xf32>
    %482 = vector.shape_cast %478 : vector<8x512xf32> to vector<1x8x512xf32>
    tpu.vector_store %arg13[%479, %c0_213, %c0_214], %482 {strides = array<i32>} : memref<8x8x512xf32, #tpu.memory_space<vmem>>, vector<1x8x512xf32>,
    %c4_i32_215 = arith.constant 4 : i32
    %483 = arith.index_cast %c4_i32_215 : i32 to index
    %c0_216 = arith.constant 0 : index
    %c0_217 = arith.constant 0 : index
    %484 = vector.load %arg12[%483, %c0_216, %c0_217] : memref<8x8x128xbf16, #tpu.memory_space<vmem>>, vector<1x8x128xbf16>
    %485 = vector.shape_cast %484 : vector<1x8x128xbf16> to vector<8x128xbf16>
    %cst_218 = arith.constant dense<0.000000e+00> : vector<8x512xf32>
    %486 = tpu.matmul %485, %438, %cst_218 {dimension_numbers = #tpu.dot_dimension_numbers<[1], [0], [0], [1], [0, 0, 1, 1], [], []>} : vector<8x128xbf16>, vector<128x512xbf16>, vector<8x512xf32> -> vector<8x512xf32>
    %487 = vector.broadcast %442 : vector<1x512xf32> to vector<8x512xf32>
    %488 = arith.addf %486, %487 : vector<8x512xf32>
    %489 = arith.index_cast %c4_i32_215 : i32 to index
    %c0_219 = arith.constant 0 : index
    %c0_220 = arith.constant 0 : index
    %490 = vector.load %arg13[%489, %c0_219, %c0_220] : memref<8x8x512xf32, #tpu.memory_space<vmem>>, vector<1x8x512xf32>
    %491 = vector.shape_cast %490 : vector<1x8x512xf32> to vector<8x512xf32>
    %492 = vector.shape_cast %488 : vector<8x512xf32> to vector<1x8x512xf32>
    tpu.vector_store %arg13[%489, %c0_219, %c0_220], %492 {strides = array<i32>} : memref<8x8x512xf32, #tpu.memory_space<vmem>>, vector<1x8x512xf32>,
    %c5_i32_221 = arith.constant 5 : i32
    %493 = arith.index_cast %c5_i32_221 : i32 to index
    %c0_222 = arith.constant 0 : index
    %c0_223 = arith.constant 0 : index
    %494 = vector.load %arg12[%493, %c0_222, %c0_223] : memref<8x8x128xbf16, #tpu.memory_space<vmem>>, vector<1x8x128xbf16>
    %495 = vector.shape_cast %494 : vector<1x8x128xbf16> to vector<8x128xbf16>
    %cst_224 = arith.constant dense<0.000000e+00> : vector<8x512xf32>
    %496 = tpu.matmul %495, %438, %cst_224 {dimension_numbers = #tpu.dot_dimension_numbers<[1], [0], [0], [1], [0, 0, 1, 1], [], []>} : vector<8x128xbf16>, vector<128x512xbf16>, vector<8x512xf32> -> vector<8x512xf32>
    %497 = vector.broadcast %442 : vector<1x512xf32> to vector<8x512xf32>
    %498 = arith.addf %496, %497 : vector<8x512xf32>
    %499 = arith.index_cast %c5_i32_221 : i32 to index
    %c0_225 = arith.constant 0 : index
    %c0_226 = arith.constant 0 : index
    %500 = vector.load %arg13[%499, %c0_225, %c0_226] : memref<8x8x512xf32, #tpu.memory_space<vmem>>, vector<1x8x512xf32>
    %501 = vector.shape_cast %500 : vector<1x8x512xf32> to vector<8x512xf32>
    %502 = vector.shape_cast %498 : vector<8x512xf32> to vector<1x8x512xf32>
    tpu.vector_store %arg13[%499, %c0_225, %c0_226], %502 {strides = array<i32>} : memref<8x8x512xf32, #tpu.memory_space<vmem>>, vector<1x8x512xf32>,
    %c6_i32_227 = arith.constant 6 : i32
    %503 = arith.index_cast %c6_i32_227 : i32 to index
    %c0_228 = arith.constant 0 : index
    %c0_229 = arith.constant 0 : index
    %504 = vector.load %arg12[%503, %c0_228, %c0_229] : memref<8x8x128xbf16, #tpu.memory_space<vmem>>, vector<1x8x128xbf16>
    %505 = vector.shape_cast %504 : vector<1x8x128xbf16> to vector<8x128xbf16>
    %cst_230 = arith.constant dense<0.000000e+00> : vector<8x512xf32>
    %506 = tpu.matmul %505, %438, %cst_230 {dimension_numbers = #tpu.dot_dimension_numbers<[1], [0], [0], [1], [0, 0, 1, 1], [], []>} : vector<8x128xbf16>, vector<128x512xbf16>, vector<8x512xf32> -> vector<8x512xf32>
    %507 = vector.broadcast %442 : vector<1x512xf32> to vector<8x512xf32>
    %508 = arith.addf %506, %507 : vector<8x512xf32>
    %509 = arith.index_cast %c6_i32_227 : i32 to index
    %c0_231 = arith.constant 0 : index
    %c0_232 = arith.constant 0 : index
    %510 = vector.load %arg13[%509, %c0_231, %c0_232] : memref<8x8x512xf32, #tpu.memory_space<vmem>>, vector<1x8x512xf32>
    %511 = vector.shape_cast %510 : vector<1x8x512xf32> to vector<8x512xf32>
    %512 = vector.shape_cast %508 : vector<8x512xf32> to vector<1x8x512xf32>
    tpu.vector_store %arg13[%509, %c0_231, %c0_232], %512 {strides = array<i32>} : memref<8x8x512xf32, #tpu.memory_space<vmem>>, vector<1x8x512xf32>,
    %c7_i32_233 = arith.constant 7 : i32
    %513 = arith.index_cast %c7_i32_233 : i32 to index
    %c0_234 = arith.constant 0 : index
    %c0_235 = arith.constant 0 : index
    %514 = vector.load %arg12[%513, %c0_234, %c0_235] : memref<8x8x128xbf16, #tpu.memory_space<vmem>>, vector<1x8x128xbf16>
    %515 = vector.shape_cast %514 : vector<1x8x128xbf16> to vector<8x128xbf16>
    %cst_236 = arith.constant dense<0.000000e+00> : vector<8x512xf32>
    %516 = tpu.matmul %515, %438, %cst_236 {dimension_numbers = #tpu.dot_dimension_numbers<[1], [0], [0], [1], [0, 0, 1, 1], [], []>} : vector<8x128xbf16>, vector<128x512xbf16>, vector<8x512xf32> -> vector<8x512xf32>
    %517 = vector.broadcast %442 : vector<1x512xf32> to vector<8x512xf32>
    %518 = arith.addf %516, %517 : vector<8x512xf32>
    %519 = arith.index_cast %c7_i32_233 : i32 to index
    %c0_237 = arith.constant 0 : index
    %c0_238 = arith.constant 0 : index
    %520 = vector.load %arg13[%519, %c0_237, %c0_238] : memref<8x8x512xf32, #tpu.memory_space<vmem>>, vector<1x8x512xf32>
    %521 = vector.shape_cast %520 : vector<1x8x512xf32> to vector<8x512xf32>
    %522 = vector.shape_cast %518 : vector<8x512xf32> to vector<1x8x512xf32>
    tpu.vector_store %arg13[%519, %c0_237, %c0_238], %522 {strides = array<i32>} : memref<8x8x512xf32, #tpu.memory_space<vmem>>, vector<1x8x512xf32>,
    %c8_i32_239 = arith.constant 8 : i32
    %c1_240 = arith.constant 1 : index
    %c0_241 = arith.constant 0 : index
    %c0_242 = arith.constant 0 : index
    %523 = vector.load %arg10[%c1_240, %c0_241, %c0_242] : memref<2x8x128xf32, #tpu.memory_space<vmem>>, vector<1x8x128xf32>
    %524 = vector.shape_cast %523 : vector<1x8x128xf32> to vector<8x128xf32>
    %c1_243 = arith.constant 1 : index
    %c0_244 = arith.constant 0 : index
    %c0_245 = arith.constant 0 : index
    %525 = vector.load %arg11[%c1_243, %c0_244, %c0_245] : memref<2x8x128xf32, #tpu.memory_space<vmem>>, vector<1x8x128xf32>
    %526 = vector.shape_cast %525 : vector<1x8x128xf32> to vector<8x128xf32>
    %c0_i32_246 = arith.constant 0 : i32
    %527 = arith.index_cast %c0_i32_246 : i32 to index
    %c0_247 = arith.constant 0 : index
    %c0_248 = arith.constant 0 : index
    %528 = vector.load %arg13[%527, %c0_247, %c0_248] : memref<8x8x512xf32, #tpu.memory_space<vmem>>, vector<1x8x512xf32>
    %529 = vector.shape_cast %528 : vector<1x8x512xf32> to vector<8x512xf32>
    %530 = arith.truncf %524 : vector<8x128xf32> to vector<8x128xbf16>
    %cst_249 = arith.constant dense<0.000000e+00> : vector<8x512xf32>
    %531 = tpu.matmul %530, %440, %cst_249 {dimension_numbers = #tpu.dot_dimension_numbers<[1], [0], [0], [1], [0, 0, 1, 1], [], []>} : vector<8x128xbf16>, vector<128x512xbf16>, vector<8x512xf32> -> vector<8x512xf32>
    %532 = arith.addf %529, %531 : vector<8x512xf32>
    %533 = vector.extract_strided_slice %532 {offsets = [0, 0], sizes = [8, 128], strides = [1, 1]} : vector<8x512xf32> to vector<8x128xf32>
    %cst_250 = arith.constant 5.000000e-01 : f32
    %534 = vector.broadcast %cst_250 : f32 to vector<8x128xf32>
    %535 = arith.mulf %534, %533 : vector<8x128xf32>
    %536 = math.tanh %535 : vector<8x128xf32>
    %cst_251 = arith.constant 5.000000e-01 : f32
    %537 = vector.broadcast %cst_251 : f32 to vector<8x128xf32>
    %538 = arith.mulf %537, %536 : vector<8x128xf32>
    %cst_252 = arith.constant 5.000000e-01 : f32
    %539 = vector.broadcast %cst_252 : f32 to vector<8x128xf32>
    %540 = arith.addf %538, %539 : vector<8x128xf32>
    %541 = vector.extract_strided_slice %532 {offsets = [0, 128], sizes = [8, 128], strides = [1, 1]} : vector<8x512xf32> to vector<8x128xf32>
    %cst_253 = arith.constant 5.000000e-01 : f32
    %542 = vector.broadcast %cst_253 : f32 to vector<8x128xf32>
    %543 = arith.mulf %542, %541 : vector<8x128xf32>
    %544 = math.tanh %543 : vector<8x128xf32>
    %cst_254 = arith.constant 5.000000e-01 : f32
    %545 = vector.broadcast %cst_254 : f32 to vector<8x128xf32>
    %546 = arith.mulf %545, %544 : vector<8x128xf32>
    %cst_255 = arith.constant 5.000000e-01 : f32
    %547 = vector.broadcast %cst_255 : f32 to vector<8x128xf32>
    %548 = arith.addf %546, %547 : vector<8x128xf32>
    %549 = vector.extract_strided_slice %532 {offsets = [0, 256], sizes = [8, 128], strides = [1, 1]} : vector<8x512xf32> to vector<8x128xf32>
    %550 = math.tanh %549 : vector<8x128xf32>
    %551 = vector.extract_strided_slice %532 {offsets = [0, 384], sizes = [8, 128], strides = [1, 1]} : vector<8x512xf32> to vector<8x128xf32>
    %cst_256 = arith.constant 5.000000e-01 : f32
    %552 = vector.broadcast %cst_256 : f32 to vector<8x128xf32>
    %553 = arith.mulf %552, %551 : vector<8x128xf32>
    %554 = math.tanh %553 : vector<8x128xf32>
    %cst_257 = arith.constant 5.000000e-01 : f32
    %555 = vector.broadcast %cst_257 : f32 to vector<8x128xf32>
    %556 = arith.mulf %555, %554 : vector<8x128xf32>
    %cst_258 = arith.constant 5.000000e-01 : f32
    %557 = vector.broadcast %cst_258 : f32 to vector<8x128xf32>
    %558 = arith.addf %556, %557 : vector<8x128xf32>
    %559 = arith.mulf %548, %526 : vector<8x128xf32>
    %560 = arith.mulf %540, %550 : vector<8x128xf32>
    %561 = arith.addf %559, %560 : vector<8x128xf32>
    %562 = math.tanh %561 : vector<8x128xf32>
    %563 = arith.mulf %558, %562 : vector<8x128xf32>
    %564 = arith.truncf %563 : vector<8x128xf32> to vector<8x128xbf16>
    %565 = arith.index_cast %c0_i32_246 : i32 to index
    %c0_259 = arith.constant 0 : index
    %c0_260 = arith.constant 0 : index
    %566 = vector.load %arg7[%565, %c0_259, %c0_260] : memref<8x8x128xbf16, #tpu.memory_space<vmem>>, vector<1x8x128xbf16>
    %567 = vector.shape_cast %566 : vector<1x8x128xbf16> to vector<8x128xbf16>
    %568 = vector.shape_cast %564 : vector<8x128xbf16> to vector<1x8x128xbf16>
    tpu.vector_store %arg7[%565, %c0_259, %c0_260], %568 {strides = array<i32>} : memref<8x8x128xbf16, #tpu.memory_space<vmem>>, vector<1x8x128xbf16>,
    %c1_i32_261 = arith.constant 1 : i32
    %569 = arith.index_cast %c1_i32_261 : i32 to index
    %c0_262 = arith.constant 0 : index
    %c0_263 = arith.constant 0 : index
    %570 = vector.load %arg13[%569, %c0_262, %c0_263] : memref<8x8x512xf32, #tpu.memory_space<vmem>>, vector<1x8x512xf32>
    %571 = vector.shape_cast %570 : vector<1x8x512xf32> to vector<8x512xf32>
    %572 = arith.truncf %563 : vector<8x128xf32> to vector<8x128xbf16>
    %cst_264 = arith.constant dense<0.000000e+00> : vector<8x512xf32>
    %573 = tpu.matmul %572, %440, %cst_264 {dimension_numbers = #tpu.dot_dimension_numbers<[1], [0], [0], [1], [0, 0, 1, 1], [], []>} : vector<8x128xbf16>, vector<128x512xbf16>, vector<8x512xf32> -> vector<8x512xf32>
    %574 = arith.addf %571, %573 : vector<8x512xf32>
    %575 = vector.extract_strided_slice %574 {offsets = [0, 0], sizes = [8, 128], strides = [1, 1]} : vector<8x512xf32> to vector<8x128xf32>
    %cst_265 = arith.constant 5.000000e-01 : f32
    %576 = vector.broadcast %cst_265 : f32 to vector<8x128xf32>
    %577 = arith.mulf %576, %575 : vector<8x128xf32>
    %578 = math.tanh %577 : vector<8x128xf32>
    %cst_266 = arith.constant 5.000000e-01 : f32
    %579 = vector.broadcast %cst_266 : f32 to vector<8x128xf32>
    %580 = arith.mulf %579, %578 : vector<8x128xf32>
    %cst_267 = arith.constant 5.000000e-01 : f32
    %581 = vector.broadcast %cst_267 : f32 to vector<8x128xf32>
    %582 = arith.addf %580, %581 : vector<8x128xf32>
    %583 = vector.extract_strided_slice %574 {offsets = [0, 128], sizes = [8, 128], strides = [1, 1]} : vector<8x512xf32> to vector<8x128xf32>
    %cst_268 = arith.constant 5.000000e-01 : f32
    %584 = vector.broadcast %cst_268 : f32 to vector<8x128xf32>
    %585 = arith.mulf %584, %583 : vector<8x128xf32>
    %586 = math.tanh %585 : vector<8x128xf32>
    %cst_269 = arith.constant 5.000000e-01 : f32
    %587 = vector.broadcast %cst_269 : f32 to vector<8x128xf32>
    %588 = arith.mulf %587, %586 : vector<8x128xf32>
    %cst_270 = arith.constant 5.000000e-01 : f32
    %589 = vector.broadcast %cst_270 : f32 to vector<8x128xf32>
    %590 = arith.addf %588, %589 : vector<8x128xf32>
    %591 = vector.extract_strided_slice %574 {offsets = [0, 256], sizes = [8, 128], strides = [1, 1]} : vector<8x512xf32> to vector<8x128xf32>
    %592 = math.tanh %591 : vector<8x128xf32>
    %593 = vector.extract_strided_slice %574 {offsets = [0, 384], sizes = [8, 128], strides = [1, 1]} : vector<8x512xf32> to vector<8x128xf32>
    %cst_271 = arith.constant 5.000000e-01 : f32
    %594 = vector.broadcast %cst_271 : f32 to vector<8x128xf32>
    %595 = arith.mulf %594, %593 : vector<8x128xf32>
    %596 = math.tanh %595 : vector<8x128xf32>
    %cst_272 = arith.constant 5.000000e-01 : f32
    %597 = vector.broadcast %cst_272 : f32 to vector<8x128xf32>
    %598 = arith.mulf %597, %596 : vector<8x128xf32>
    %cst_273 = arith.constant 5.000000e-01 : f32
    %599 = vector.broadcast %cst_273 : f32 to vector<8x128xf32>
    %600 = arith.addf %598, %599 : vector<8x128xf32>
    %601 = arith.mulf %590, %561 : vector<8x128xf32>
    %602 = arith.mulf %582, %592 : vector<8x128xf32>
    %603 = arith.addf %601, %602 : vector<8x128xf32>
    %604 = math.tanh %603 : vector<8x128xf32>
    %605 = arith.mulf %600, %604 : vector<8x128xf32>
    %606 = arith.truncf %605 : vector<8x128xf32> to vector<8x128xbf16>
    %607 = arith.index_cast %c1_i32_261 : i32 to index
    %c0_274 = arith.constant 0 : index
    %c0_275 = arith.constant 0 : index
    %608 = vector.load %arg7[%607, %c0_274, %c0_275] : memref<8x8x128xbf16, #tpu.memory_space<vmem>>, vector<1x8x128xbf16>
    %609 = vector.shape_cast %608 : vector<1x8x128xbf16> to vector<8x128xbf16>
    %610 = vector.shape_cast %606 : vector<8x128xbf16> to vector<1x8x128xbf16>
    tpu.vector_store %arg7[%607, %c0_274, %c0_275], %610 {strides = array<i32>} : memref<8x8x128xbf16, #tpu.memory_space<vmem>>, vector<1x8x128xbf16>,
    %c2_i32_276 = arith.constant 2 : i32
    %611 = arith.index_cast %c2_i32_276 : i32 to index
    %c0_277 = arith.constant 0 : index
    %c0_278 = arith.constant 0 : index
    %612 = vector.load %arg13[%611, %c0_277, %c0_278] : memref<8x8x512xf32, #tpu.memory_space<vmem>>, vector<1x8x512xf32>
    %613 = vector.shape_cast %612 : vector<1x8x512xf32> to vector<8x512xf32>
    %614 = arith.truncf %605 : vector<8x128xf32> to vector<8x128xbf16>
    %cst_279 = arith.constant dense<0.000000e+00> : vector<8x512xf32>
    %615 = tpu.matmul %614, %440, %cst_279 {dimension_numbers = #tpu.dot_dimension_numbers<[1], [0], [0], [1], [0, 0, 1, 1], [], []>} : vector<8x128xbf16>, vector<128x512xbf16>, vector<8x512xf32> -> vector<8x512xf32>
    %616 = arith.addf %613, %615 : vector<8x512xf32>
    %617 = vector.extract_strided_slice %616 {offsets = [0, 0], sizes = [8, 128], strides = [1, 1]} : vector<8x512xf32> to vector<8x128xf32>
    %cst_280 = arith.constant 5.000000e-01 : f32
    %618 = vector.broadcast %cst_280 : f32 to vector<8x128xf32>
    %619 = arith.mulf %618, %617 : vector<8x128xf32>
    %620 = math.tanh %619 : vector<8x128xf32>
    %cst_281 = arith.constant 5.000000e-01 : f32
    %621 = vector.broadcast %cst_281 : f32 to vector<8x128xf32>
    %622 = arith.mulf %621, %620 : vector<8x128xf32>
    %cst_282 = arith.constant 5.000000e-01 : f32
    %623 = vector.broadcast %cst_282 : f32 to vector<8x128xf32>
    %624 = arith.addf %622, %623 : vector<8x128xf32>
    %625 = vector.extract_strided_slice %616 {offsets = [0, 128], sizes = [8, 128], strides = [1, 1]} : vector<8x512xf32> to vector<8x128xf32>
    %cst_283 = arith.constant 5.000000e-01 : f32
    %626 = vector.broadcast %cst_283 : f32 to vector<8x128xf32>
    %627 = arith.mulf %626, %625 : vector<8x128xf32>
    %628 = math.tanh %627 : vector<8x128xf32>
    %cst_284 = arith.constant 5.000000e-01 : f32
    %629 = vector.broadcast %cst_284 : f32 to vector<8x128xf32>
    %630 = arith.mulf %629, %628 : vector<8x128xf32>
    %cst_285 = arith.constant 5.000000e-01 : f32
    %631 = vector.broadcast %cst_285 : f32 to vector<8x128xf32>
    %632 = arith.addf %630, %631 : vector<8x128xf32>
    %633 = vector.extract_strided_slice %616 {offsets = [0, 256], sizes = [8, 128], strides = [1, 1]} : vector<8x512xf32> to vector<8x128xf32>
    %634 = math.tanh %633 : vector<8x128xf32>
    %635 = vector.extract_strided_slice %616 {offsets = [0, 384], sizes = [8, 128], strides = [1, 1]} : vector<8x512xf32> to vector<8x128xf32>
    %cst_286 = arith.constant 5.000000e-01 : f32
    %636 = vector.broadcast %cst_286 : f32 to vector<8x128xf32>
    %637 = arith.mulf %636, %635 : vector<8x128xf32>
    %638 = math.tanh %637 : vector<8x128xf32>
    %cst_287 = arith.constant 5.000000e-01 : f32
    %639 = vector.broadcast %cst_287 : f32 to vector<8x128xf32>
    %640 = arith.mulf %639, %638 : vector<8x128xf32>
    %cst_288 = arith.constant 5.000000e-01 : f32
    %641 = vector.broadcast %cst_288 : f32 to vector<8x128xf32>
    %642 = arith.addf %640, %641 : vector<8x128xf32>
    %643 = arith.mulf %632, %603 : vector<8x128xf32>
    %644 = arith.mulf %624, %634 : vector<8x128xf32>
    %645 = arith.addf %643, %644 : vector<8x128xf32>
    %646 = math.tanh %645 : vector<8x128xf32>
    %647 = arith.mulf %642, %646 : vector<8x128xf32>
    %648 = arith.truncf %647 : vector<8x128xf32> to vector<8x128xbf16>
    %649 = arith.index_cast %c2_i32_276 : i32 to index
    %c0_289 = arith.constant 0 : index
    %c0_290 = arith.constant 0 : index
    %650 = vector.load %arg7[%649, %c0_289, %c0_290] : memref<8x8x128xbf16, #tpu.memory_space<vmem>>, vector<1x8x128xbf16>
    %651 = vector.shape_cast %650 : vector<1x8x128xbf16> to vector<8x128xbf16>
    %652 = vector.shape_cast %648 : vector<8x128xbf16> to vector<1x8x128xbf16>
    tpu.vector_store %arg7[%649, %c0_289, %c0_290], %652 {strides = array<i32>} : memref<8x8x128xbf16, #tpu.memory_space<vmem>>, vector<1x8x128xbf16>,
    %c3_i32_291 = arith.constant 3 : i32
    %653 = arith.index_cast %c3_i32_291 : i32 to index
    %c0_292 = arith.constant 0 : index
    %c0_293 = arith.constant 0 : index
    %654 = vector.load %arg13[%653, %c0_292, %c0_293] : memref<8x8x512xf32, #tpu.memory_space<vmem>>, vector<1x8x512xf32>
    %655 = vector.shape_cast %654 : vector<1x8x512xf32> to vector<8x512xf32>
    %656 = arith.truncf %647 : vector<8x128xf32> to vector<8x128xbf16>
    %cst_294 = arith.constant dense<0.000000e+00> : vector<8x512xf32>
    %657 = tpu.matmul %656, %440, %cst_294 {dimension_numbers = #tpu.dot_dimension_numbers<[1], [0], [0], [1], [0, 0, 1, 1], [], []>} : vector<8x128xbf16>, vector<128x512xbf16>, vector<8x512xf32> -> vector<8x512xf32>
    %658 = arith.addf %655, %657 : vector<8x512xf32>
    %659 = vector.extract_strided_slice %658 {offsets = [0, 0], sizes = [8, 128], strides = [1, 1]} : vector<8x512xf32> to vector<8x128xf32>
    %cst_295 = arith.constant 5.000000e-01 : f32
    %660 = vector.broadcast %cst_295 : f32 to vector<8x128xf32>
    %661 = arith.mulf %660, %659 : vector<8x128xf32>
    %662 = math.tanh %661 : vector<8x128xf32>
    %cst_296 = arith.constant 5.000000e-01 : f32
    %663 = vector.broadcast %cst_296 : f32 to vector<8x128xf32>
    %664 = arith.mulf %663, %662 : vector<8x128xf32>
    %cst_297 = arith.constant 5.000000e-01 : f32
    %665 = vector.broadcast %cst_297 : f32 to vector<8x128xf32>
    %666 = arith.addf %664, %665 : vector<8x128xf32>
    %667 = vector.extract_strided_slice %658 {offsets = [0, 128], sizes = [8, 128], strides = [1, 1]} : vector<8x512xf32> to vector<8x128xf32>
    %cst_298 = arith.constant 5.000000e-01 : f32
    %668 = vector.broadcast %cst_298 : f32 to vector<8x128xf32>
    %669 = arith.mulf %668, %667 : vector<8x128xf32>
    %670 = math.tanh %669 : vector<8x128xf32>
    %cst_299 = arith.constant 5.000000e-01 : f32
    %671 = vector.broadcast %cst_299 : f32 to vector<8x128xf32>
    %672 = arith.mulf %671, %670 : vector<8x128xf32>
    %cst_300 = arith.constant 5.000000e-01 : f32
    %673 = vector.broadcast %cst_300 : f32 to vector<8x128xf32>
    %674 = arith.addf %672, %673 : vector<8x128xf32>
    %675 = vector.extract_strided_slice %658 {offsets = [0, 256], sizes = [8, 128], strides = [1, 1]} : vector<8x512xf32> to vector<8x128xf32>
    %676 = math.tanh %675 : vector<8x128xf32>
    %677 = vector.extract_strided_slice %658 {offsets = [0, 384], sizes = [8, 128], strides = [1, 1]} : vector<8x512xf32> to vector<8x128xf32>
    %cst_301 = arith.constant 5.000000e-01 : f32
    %678 = vector.broadcast %cst_301 : f32 to vector<8x128xf32>
    %679 = arith.mulf %678, %677 : vector<8x128xf32>
    %680 = math.tanh %679 : vector<8x128xf32>
    %cst_302 = arith.constant 5.000000e-01 : f32
    %681 = vector.broadcast %cst_302 : f32 to vector<8x128xf32>
    %682 = arith.mulf %681, %680 : vector<8x128xf32>
    %cst_303 = arith.constant 5.000000e-01 : f32
    %683 = vector.broadcast %cst_303 : f32 to vector<8x128xf32>
    %684 = arith.addf %682, %683 : vector<8x128xf32>
    %685 = arith.mulf %674, %645 : vector<8x128xf32>
    %686 = arith.mulf %666, %676 : vector<8x128xf32>
    %687 = arith.addf %685, %686 : vector<8x128xf32>
    %688 = math.tanh %687 : vector<8x128xf32>
    %689 = arith.mulf %684, %688 : vector<8x128xf32>
    %690 = arith.truncf %689 : vector<8x128xf32> to vector<8x128xbf16>
    %691 = arith.index_cast %c3_i32_291 : i32 to index
    %c0_304 = arith.constant 0 : index
    %c0_305 = arith.constant 0 : index
    %692 = vector.load %arg7[%691, %c0_304, %c0_305] : memref<8x8x128xbf16, #tpu.memory_space<vmem>>, vector<1x8x128xbf16>
    %693 = vector.shape_cast %692 : vector<1x8x128xbf16> to vector<8x128xbf16>
    %694 = vector.shape_cast %690 : vector<8x128xbf16> to vector<1x8x128xbf16>
    tpu.vector_store %arg7[%691, %c0_304, %c0_305], %694 {strides = array<i32>} : memref<8x8x128xbf16, #tpu.memory_space<vmem>>, vector<1x8x128xbf16>,
    %c4_i32_306 = arith.constant 4 : i32
    %695 = arith.index_cast %c4_i32_306 : i32 to index
    %c0_307 = arith.constant 0 : index
    %c0_308 = arith.constant 0 : index
    %696 = vector.load %arg13[%695, %c0_307, %c0_308] : memref<8x8x512xf32, #tpu.memory_space<vmem>>, vector<1x8x512xf32>
    %697 = vector.shape_cast %696 : vector<1x8x512xf32> to vector<8x512xf32>
    %698 = arith.truncf %689 : vector<8x128xf32> to vector<8x128xbf16>
    %cst_309 = arith.constant dense<0.000000e+00> : vector<8x512xf32>
    %699 = tpu.matmul %698, %440, %cst_309 {dimension_numbers = #tpu.dot_dimension_numbers<[1], [0], [0], [1], [0, 0, 1, 1], [], []>} : vector<8x128xbf16>, vector<128x512xbf16>, vector<8x512xf32> -> vector<8x512xf32>
    %700 = arith.addf %697, %699 : vector<8x512xf32>
    %701 = vector.extract_strided_slice %700 {offsets = [0, 0], sizes = [8, 128], strides = [1, 1]} : vector<8x512xf32> to vector<8x128xf32>
    %cst_310 = arith.constant 5.000000e-01 : f32
    %702 = vector.broadcast %cst_310 : f32 to vector<8x128xf32>
    %703 = arith.mulf %702, %701 : vector<8x128xf32>
    %704 = math.tanh %703 : vector<8x128xf32>
    %cst_311 = arith.constant 5.000000e-01 : f32
    %705 = vector.broadcast %cst_311 : f32 to vector<8x128xf32>
    %706 = arith.mulf %705, %704 : vector<8x128xf32>
    %cst_312 = arith.constant 5.000000e-01 : f32
    %707 = vector.broadcast %cst_312 : f32 to vector<8x128xf32>
    %708 = arith.addf %706, %707 : vector<8x128xf32>
    %709 = vector.extract_strided_slice %700 {offsets = [0, 128], sizes = [8, 128], strides = [1, 1]} : vector<8x512xf32> to vector<8x128xf32>
    %cst_313 = arith.constant 5.000000e-01 : f32
    %710 = vector.broadcast %cst_313 : f32 to vector<8x128xf32>
    %711 = arith.mulf %710, %709 : vector<8x128xf32>
    %712 = math.tanh %711 : vector<8x128xf32>
    %cst_314 = arith.constant 5.000000e-01 : f32
    %713 = vector.broadcast %cst_314 : f32 to vector<8x128xf32>
    %714 = arith.mulf %713, %712 : vector<8x128xf32>
    %cst_315 = arith.constant 5.000000e-01 : f32
    %715 = vector.broadcast %cst_315 : f32 to vector<8x128xf32>
    %716 = arith.addf %714, %715 : vector<8x128xf32>
    %717 = vector.extract_strided_slice %700 {offsets = [0, 256], sizes = [8, 128], strides = [1, 1]} : vector<8x512xf32> to vector<8x128xf32>
    %718 = math.tanh %717 : vector<8x128xf32>
    %719 = vector.extract_strided_slice %700 {offsets = [0, 384], sizes = [8, 128], strides = [1, 1]} : vector<8x512xf32> to vector<8x128xf32>
    %cst_316 = arith.constant 5.000000e-01 : f32
    %720 = vector.broadcast %cst_316 : f32 to vector<8x128xf32>
    %721 = arith.mulf %720, %719 : vector<8x128xf32>
    %722 = math.tanh %721 : vector<8x128xf32>
    %cst_317 = arith.constant 5.000000e-01 : f32
    %723 = vector.broadcast %cst_317 : f32 to vector<8x128xf32>
    %724 = arith.mulf %723, %722 : vector<8x128xf32>
    %cst_318 = arith.constant 5.000000e-01 : f32
    %725 = vector.broadcast %cst_318 : f32 to vector<8x128xf32>
    %726 = arith.addf %724, %725 : vector<8x128xf32>
    %727 = arith.mulf %716, %687 : vector<8x128xf32>
    %728 = arith.mulf %708, %718 : vector<8x128xf32>
    %729 = arith.addf %727, %728 : vector<8x128xf32>
    %730 = math.tanh %729 : vector<8x128xf32>
    %731 = arith.mulf %726, %730 : vector<8x128xf32>
    %732 = arith.truncf %731 : vector<8x128xf32> to vector<8x128xbf16>
    %733 = arith.index_cast %c4_i32_306 : i32 to index
    %c0_319 = arith.constant 0 : index
    %c0_320 = arith.constant 0 : index
    %734 = vector.load %arg7[%733, %c0_319, %c0_320] : memref<8x8x128xbf16, #tpu.memory_space<vmem>>, vector<1x8x128xbf16>
    %735 = vector.shape_cast %734 : vector<1x8x128xbf16> to vector<8x128xbf16>
    %736 = vector.shape_cast %732 : vector<8x128xbf16> to vector<1x8x128xbf16>
    tpu.vector_store %arg7[%733, %c0_319, %c0_320], %736 {strides = array<i32>} : memref<8x8x128xbf16, #tpu.memory_space<vmem>>, vector<1x8x128xbf16>,
    %c5_i32_321 = arith.constant 5 : i32
    %737 = arith.index_cast %c5_i32_321 : i32 to index
    %c0_322 = arith.constant 0 : index
    %c0_323 = arith.constant 0 : index
    %738 = vector.load %arg13[%737, %c0_322, %c0_323] : memref<8x8x512xf32, #tpu.memory_space<vmem>>, vector<1x8x512xf32>
    %739 = vector.shape_cast %738 : vector<1x8x512xf32> to vector<8x512xf32>
    %740 = arith.truncf %731 : vector<8x128xf32> to vector<8x128xbf16>
    %cst_324 = arith.constant dense<0.000000e+00> : vector<8x512xf32>
    %741 = tpu.matmul %740, %440, %cst_324 {dimension_numbers = #tpu.dot_dimension_numbers<[1], [0], [0], [1], [0, 0, 1, 1], [], []>} : vector<8x128xbf16>, vector<128x512xbf16>, vector<8x512xf32> -> vector<8x512xf32>
    %742 = arith.addf %739, %741 : vector<8x512xf32>
    %743 = vector.extract_strided_slice %742 {offsets = [0, 0], sizes = [8, 128], strides = [1, 1]} : vector<8x512xf32> to vector<8x128xf32>
    %cst_325 = arith.constant 5.000000e-01 : f32
    %744 = vector.broadcast %cst_325 : f32 to vector<8x128xf32>
    %745 = arith.mulf %744, %743 : vector<8x128xf32>
    %746 = math.tanh %745 : vector<8x128xf32>
    %cst_326 = arith.constant 5.000000e-01 : f32
    %747 = vector.broadcast %cst_326 : f32 to vector<8x128xf32>
    %748 = arith.mulf %747, %746 : vector<8x128xf32>
    %cst_327 = arith.constant 5.000000e-01 : f32
    %749 = vector.broadcast %cst_327 : f32 to vector<8x128xf32>
    %750 = arith.addf %748, %749 : vector<8x128xf32>
    %751 = vector.extract_strided_slice %742 {offsets = [0, 128], sizes = [8, 128], strides = [1, 1]} : vector<8x512xf32> to vector<8x128xf32>
    %cst_328 = arith.constant 5.000000e-01 : f32
    %752 = vector.broadcast %cst_328 : f32 to vector<8x128xf32>
    %753 = arith.mulf %752, %751 : vector<8x128xf32>
    %754 = math.tanh %753 : vector<8x128xf32>
    %cst_329 = arith.constant 5.000000e-01 : f32
    %755 = vector.broadcast %cst_329 : f32 to vector<8x128xf32>
    %756 = arith.mulf %755, %754 : vector<8x128xf32>
    %cst_330 = arith.constant 5.000000e-01 : f32
    %757 = vector.broadcast %cst_330 : f32 to vector<8x128xf32>
    %758 = arith.addf %756, %757 : vector<8x128xf32>
    %759 = vector.extract_strided_slice %742 {offsets = [0, 256], sizes = [8, 128], strides = [1, 1]} : vector<8x512xf32> to vector<8x128xf32>
    %760 = math.tanh %759 : vector<8x128xf32>
    %761 = vector.extract_strided_slice %742 {offsets = [0, 384], sizes = [8, 128], strides = [1, 1]} : vector<8x512xf32> to vector<8x128xf32>
    %cst_331 = arith.constant 5.000000e-01 : f32
    %762 = vector.broadcast %cst_331 : f32 to vector<8x128xf32>
    %763 = arith.mulf %762, %761 : vector<8x128xf32>
    %764 = math.tanh %763 : vector<8x128xf32>
    %cst_332 = arith.constant 5.000000e-01 : f32
    %765 = vector.broadcast %cst_332 : f32 to vector<8x128xf32>
    %766 = arith.mulf %765, %764 : vector<8x128xf32>
    %cst_333 = arith.constant 5.000000e-01 : f32
    %767 = vector.broadcast %cst_333 : f32 to vector<8x128xf32>
    %768 = arith.addf %766, %767 : vector<8x128xf32>
    %769 = arith.mulf %758, %729 : vector<8x128xf32>
    %770 = arith.mulf %750, %760 : vector<8x128xf32>
    %771 = arith.addf %769, %770 : vector<8x128xf32>
    %772 = math.tanh %771 : vector<8x128xf32>
    %773 = arith.mulf %768, %772 : vector<8x128xf32>
    %774 = arith.truncf %773 : vector<8x128xf32> to vector<8x128xbf16>
    %775 = arith.index_cast %c5_i32_321 : i32 to index
    %c0_334 = arith.constant 0 : index
    %c0_335 = arith.constant 0 : index
    %776 = vector.load %arg7[%775, %c0_334, %c0_335] : memref<8x8x128xbf16, #tpu.memory_space<vmem>>, vector<1x8x128xbf16>
    %777 = vector.shape_cast %776 : vector<1x8x128xbf16> to vector<8x128xbf16>
    %778 = vector.shape_cast %774 : vector<8x128xbf16> to vector<1x8x128xbf16>
    tpu.vector_store %arg7[%775, %c0_334, %c0_335], %778 {strides = array<i32>} : memref<8x8x128xbf16, #tpu.memory_space<vmem>>, vector<1x8x128xbf16>,
    %c6_i32_336 = arith.constant 6 : i32
    %779 = arith.index_cast %c6_i32_336 : i32 to index
    %c0_337 = arith.constant 0 : index
    %c0_338 = arith.constant 0 : index
    %780 = vector.load %arg13[%779, %c0_337, %c0_338] : memref<8x8x512xf32, #tpu.memory_space<vmem>>, vector<1x8x512xf32>
    %781 = vector.shape_cast %780 : vector<1x8x512xf32> to vector<8x512xf32>
    %782 = arith.truncf %773 : vector<8x128xf32> to vector<8x128xbf16>
    %cst_339 = arith.constant dense<0.000000e+00> : vector<8x512xf32>
    %783 = tpu.matmul %782, %440, %cst_339 {dimension_numbers = #tpu.dot_dimension_numbers<[1], [0], [0], [1], [0, 0, 1, 1], [], []>} : vector<8x128xbf16>, vector<128x512xbf16>, vector<8x512xf32> -> vector<8x512xf32>
    %784 = arith.addf %781, %783 : vector<8x512xf32>
    %785 = vector.extract_strided_slice %784 {offsets = [0, 0], sizes = [8, 128], strides = [1, 1]} : vector<8x512xf32> to vector<8x128xf32>
    %cst_340 = arith.constant 5.000000e-01 : f32
    %786 = vector.broadcast %cst_340 : f32 to vector<8x128xf32>
    %787 = arith.mulf %786, %785 : vector<8x128xf32>
    %788 = math.tanh %787 : vector<8x128xf32>
    %cst_341 = arith.constant 5.000000e-01 : f32
    %789 = vector.broadcast %cst_341 : f32 to vector<8x128xf32>
    %790 = arith.mulf %789, %788 : vector<8x128xf32>
    %cst_342 = arith.constant 5.000000e-01 : f32
    %791 = vector.broadcast %cst_342 : f32 to vector<8x128xf32>
    %792 = arith.addf %790, %791 : vector<8x128xf32>
    %793 = vector.extract_strided_slice %784 {offsets = [0, 128], sizes = [8, 128], strides = [1, 1]} : vector<8x512xf32> to vector<8x128xf32>
    %cst_343 = arith.constant 5.000000e-01 : f32
    %794 = vector.broadcast %cst_343 : f32 to vector<8x128xf32>
    %795 = arith.mulf %794, %793 : vector<8x128xf32>
    %796 = math.tanh %795 : vector<8x128xf32>
    %cst_344 = arith.constant 5.000000e-01 : f32
    %797 = vector.broadcast %cst_344 : f32 to vector<8x128xf32>
    %798 = arith.mulf %797, %796 : vector<8x128xf32>
    %cst_345 = arith.constant 5.000000e-01 : f32
    %799 = vector.broadcast %cst_345 : f32 to vector<8x128xf32>
    %800 = arith.addf %798, %799 : vector<8x128xf32>
    %801 = vector.extract_strided_slice %784 {offsets = [0, 256], sizes = [8, 128], strides = [1, 1]} : vector<8x512xf32> to vector<8x128xf32>
    %802 = math.tanh %801 : vector<8x128xf32>
    %803 = vector.extract_strided_slice %784 {offsets = [0, 384], sizes = [8, 128], strides = [1, 1]} : vector<8x512xf32> to vector<8x128xf32>
    %cst_346 = arith.constant 5.000000e-01 : f32
    %804 = vector.broadcast %cst_346 : f32 to vector<8x128xf32>
    %805 = arith.mulf %804, %803 : vector<8x128xf32>
    %806 = math.tanh %805 : vector<8x128xf32>
    %cst_347 = arith.constant 5.000000e-01 : f32
    %807 = vector.broadcast %cst_347 : f32 to vector<8x128xf32>
    %808 = arith.mulf %807, %806 : vector<8x128xf32>
    %cst_348 = arith.constant 5.000000e-01 : f32
    %809 = vector.broadcast %cst_348 : f32 to vector<8x128xf32>
    %810 = arith.addf %808, %809 : vector<8x128xf32>
    %811 = arith.mulf %800, %771 : vector<8x128xf32>
    %812 = arith.mulf %792, %802 : vector<8x128xf32>
    %813 = arith.addf %811, %812 : vector<8x128xf32>
    %814 = math.tanh %813 : vector<8x128xf32>
    %815 = arith.mulf %810, %814 : vector<8x128xf32>
    %816 = arith.truncf %815 : vector<8x128xf32> to vector<8x128xbf16>
    %817 = arith.index_cast %c6_i32_336 : i32 to index
    %c0_349 = arith.constant 0 : index
    %c0_350 = arith.constant 0 : index
    %818 = vector.load %arg7[%817, %c0_349, %c0_350] : memref<8x8x128xbf16, #tpu.memory_space<vmem>>, vector<1x8x128xbf16>
    %819 = vector.shape_cast %818 : vector<1x8x128xbf16> to vector<8x128xbf16>
    %820 = vector.shape_cast %816 : vector<8x128xbf16> to vector<1x8x128xbf16>
    tpu.vector_store %arg7[%817, %c0_349, %c0_350], %820 {strides = array<i32>} : memref<8x8x128xbf16, #tpu.memory_space<vmem>>, vector<1x8x128xbf16>,
    %c7_i32_351 = arith.constant 7 : i32
    %821 = arith.index_cast %c7_i32_351 : i32 to index
    %c0_352 = arith.constant 0 : index
    %c0_353 = arith.constant 0 : index
    %822 = vector.load %arg13[%821, %c0_352, %c0_353] : memref<8x8x512xf32, #tpu.memory_space<vmem>>, vector<1x8x512xf32>
    %823 = vector.shape_cast %822 : vector<1x8x512xf32> to vector<8x512xf32>
    %824 = arith.truncf %815 : vector<8x128xf32> to vector<8x128xbf16>
    %cst_354 = arith.constant dense<0.000000e+00> : vector<8x512xf32>
    %825 = tpu.matmul %824, %440, %cst_354 {dimension_numbers = #tpu.dot_dimension_numbers<[1], [0], [0], [1], [0, 0, 1, 1], [], []>} : vector<8x128xbf16>, vector<128x512xbf16>, vector<8x512xf32> -> vector<8x512xf32>
    %826 = arith.addf %823, %825 : vector<8x512xf32>
    %827 = vector.extract_strided_slice %826 {offsets = [0, 0], sizes = [8, 128], strides = [1, 1]} : vector<8x512xf32> to vector<8x128xf32>
    %cst_355 = arith.constant 5.000000e-01 : f32
    %828 = vector.broadcast %cst_355 : f32 to vector<8x128xf32>
    %829 = arith.mulf %828, %827 : vector<8x128xf32>
    %830 = math.tanh %829 : vector<8x128xf32>
    %cst_356 = arith.constant 5.000000e-01 : f32
    %831 = vector.broadcast %cst_356 : f32 to vector<8x128xf32>
    %832 = arith.mulf %831, %830 : vector<8x128xf32>
    %cst_357 = arith.constant 5.000000e-01 : f32
    %833 = vector.broadcast %cst_357 : f32 to vector<8x128xf32>
    %834 = arith.addf %832, %833 : vector<8x128xf32>
    %835 = vector.extract_strided_slice %826 {offsets = [0, 128], sizes = [8, 128], strides = [1, 1]} : vector<8x512xf32> to vector<8x128xf32>
    %cst_358 = arith.constant 5.000000e-01 : f32
    %836 = vector.broadcast %cst_358 : f32 to vector<8x128xf32>
    %837 = arith.mulf %836, %835 : vector<8x128xf32>
    %838 = math.tanh %837 : vector<8x128xf32>
    %cst_359 = arith.constant 5.000000e-01 : f32
    %839 = vector.broadcast %cst_359 : f32 to vector<8x128xf32>
    %840 = arith.mulf %839, %838 : vector<8x128xf32>
    %cst_360 = arith.constant 5.000000e-01 : f32
    %841 = vector.broadcast %cst_360 : f32 to vector<8x128xf32>
    %842 = arith.addf %840, %841 : vector<8x128xf32>
    %843 = vector.extract_strided_slice %826 {offsets = [0, 256], sizes = [8, 128], strides = [1, 1]} : vector<8x512xf32> to vector<8x128xf32>
    %844 = math.tanh %843 : vector<8x128xf32>
    %845 = vector.extract_strided_slice %826 {offsets = [0, 384], sizes = [8, 128], strides = [1, 1]} : vector<8x512xf32> to vector<8x128xf32>
    %cst_361 = arith.constant 5.000000e-01 : f32
    %846 = vector.broadcast %cst_361 : f32 to vector<8x128xf32>
    %847 = arith.mulf %846, %845 : vector<8x128xf32>
    %848 = math.tanh %847 : vector<8x128xf32>
    %cst_362 = arith.constant 5.000000e-01 : f32
    %849 = vector.broadcast %cst_362 : f32 to vector<8x128xf32>
    %850 = arith.mulf %849, %848 : vector<8x128xf32>
    %cst_363 = arith.constant 5.000000e-01 : f32
    %851 = vector.broadcast %cst_363 : f32 to vector<8x128xf32>
    %852 = arith.addf %850, %851 : vector<8x128xf32>
    %853 = arith.mulf %842, %813 : vector<8x128xf32>
    %854 = arith.mulf %834, %844 : vector<8x128xf32>
    %855 = arith.addf %853, %854 : vector<8x128xf32>
    %856 = math.tanh %855 : vector<8x128xf32>
    %857 = arith.mulf %852, %856 : vector<8x128xf32>
    %858 = arith.truncf %857 : vector<8x128xf32> to vector<8x128xbf16>
    %859 = arith.index_cast %c7_i32_351 : i32 to index
    %c0_364 = arith.constant 0 : index
    %c0_365 = arith.constant 0 : index
    %860 = vector.load %arg7[%859, %c0_364, %c0_365] : memref<8x8x128xbf16, #tpu.memory_space<vmem>>, vector<1x8x128xbf16>
    %861 = vector.shape_cast %860 : vector<1x8x128xbf16> to vector<8x128xbf16>
    %862 = vector.shape_cast %858 : vector<8x128xbf16> to vector<1x8x128xbf16>
    tpu.vector_store %arg7[%859, %c0_364, %c0_365], %862 {strides = array<i32>} : memref<8x8x128xbf16, #tpu.memory_space<vmem>>, vector<1x8x128xbf16>,
    %c8_i32_366 = arith.constant 8 : i32
    %c0_i32_367 = arith.constant 0 : i32
    %863 = arith.cmpi eq, %arg1, %c0_i32_367 : i32
    %864 = arith.extui %863 : i1 to i32
    %c0_i32_368 = arith.constant 0 : i32
    %865 = arith.cmpi ne, %864, %c0_i32_368 : i32
    scf.if %865 {
      %c1_375 = arith.constant 1 : index
      %c0_376 = arith.constant 0 : index
      %c0_377 = arith.constant 0 : index
      %872 = vector.load %arg8[%c1_375, %c0_376, %c0_377] : memref<2x8x128xf32, #tpu.memory_space<vmem>>, vector<1x8x128xf32>
      %873 = vector.shape_cast %872 : vector<1x8x128xf32> to vector<8x128xf32>
      %874 = vector.shape_cast %857 : vector<8x128xf32> to vector<1x8x128xf32>
      tpu.vector_store %arg8[%c1_375, %c0_376, %c0_377], %874 {strides = array<i32>} : memref<2x8x128xf32, #tpu.memory_space<vmem>>, vector<1x8x128xf32>,
      %c1_378 = arith.constant 1 : index
      %c0_379 = arith.constant 0 : index
      %c0_380 = arith.constant 0 : index
      %875 = vector.load %arg9[%c1_378, %c0_379, %c0_380] : memref<2x8x128xf32, #tpu.memory_space<vmem>>, vector<1x8x128xf32>
      %876 = vector.shape_cast %875 : vector<1x8x128xf32> to vector<8x128xf32>
      %877 = vector.shape_cast %855 : vector<8x128xf32> to vector<1x8x128xf32>
      tpu.vector_store %arg9[%c1_378, %c0_379, %c0_380], %877 {strides = array<i32>} : memref<2x8x128xf32, #tpu.memory_space<vmem>>, vector<1x8x128xf32>,
    } else {
    }
    %c1_369 = arith.constant 1 : index
    %c0_370 = arith.constant 0 : index
    %c0_371 = arith.constant 0 : index
    %866 = vector.load %arg10[%c1_369, %c0_370, %c0_371] : memref<2x8x128xf32, #tpu.memory_space<vmem>>, vector<1x8x128xf32>
    %867 = vector.shape_cast %866 : vector<1x8x128xf32> to vector<8x128xf32>
    %868 = vector.shape_cast %857 : vector<8x128xf32> to vector<1x8x128xf32>
    tpu.vector_store %arg10[%c1_369, %c0_370, %c0_371], %868 {strides = array<i32>} : memref<2x8x128xf32, #tpu.memory_space<vmem>>, vector<1x8x128xf32>,
    %c1_372 = arith.constant 1 : index
    %c0_373 = arith.constant 0 : index
    %c0_374 = arith.constant 0 : index
    %869 = vector.load %arg11[%c1_372, %c0_373, %c0_374] : memref<2x8x128xf32, #tpu.memory_space<vmem>>, vector<1x8x128xf32>
    %870 = vector.shape_cast %869 : vector<1x8x128xf32> to vector<8x128xf32>
    %871 = vector.shape_cast %855 : vector<8x128xf32> to vector<1x8x128xf32>
    tpu.vector_store %arg11[%c1_372, %c0_373, %c0_374], %871 {strides = array<i32>} : memref<2x8x128xf32, #tpu.memory_space<vmem>>, vector<1x8x128xf32>,
    return
  }
  func.func @transform_0(%arg0: i32, %arg1: i32) -> (i32, i32, i32) {
    %c0_i32 = arith.constant 0 : i32
    %c0_i32_0 = arith.constant 0 : i32
    return %arg1, %arg0, %c0_i32 : i32, i32, i32
  }
  func.func @transform_1(%arg0: i32, %arg1: i32) -> (i32, i32) {
    %c0_i32 = arith.constant 0 : i32
    %c0_i32_0 = arith.constant 0 : i32
    %c0_i32_1 = arith.constant 0 : i32
    return %c0_i32, %c0_i32_0 : i32, i32
  }
  func.func @transform_2(%arg0: i32, %arg1: i32) -> (i32, i32, i32) {
    %c0_i32 = arith.constant 0 : i32
    %c0_i32_0 = arith.constant 0 : i32
    %c0_i32_1 = arith.constant 0 : i32
    %c0_i32_2 = arith.constant 0 : i32
    return %c0_i32, %c0_i32_0, %c0_i32_1 : i32, i32, i32
  }
  func.func @transform_3(%arg0: i32, %arg1: i32) -> (i32, i32, i32) {
    %c0_i32 = arith.constant 0 : i32
    %c0_i32_0 = arith.constant 0 : i32
    %c0_i32_1 = arith.constant 0 : i32
    %c0_i32_2 = arith.constant 0 : i32
    return %c0_i32, %c0_i32_0, %c0_i32_1 : i32, i32, i32
  }
  func.func @transform_4(%arg0: i32, %arg1: i32) -> (i32, i32, i32) {
    %c0_i32 = arith.constant 0 : i32
    %c0_i32_0 = arith.constant 0 : i32
    %c0_i32_1 = arith.constant 0 : i32
    %c0_i32_2 = arith.constant 0 : i32
    return %c0_i32, %c0_i32_0, %c0_i32_1 : i32, i32, i32
  }
  func.func @transform_5(%arg0: i32, %arg1: i32) -> (i32, i32, i32) {
    %c0_i32 = arith.constant 0 : i32
    %c0_i32_0 = arith.constant 0 : i32
    return %arg1, %arg0, %c0_i32 : i32, i32, i32
  }
  func.func @transform_6(%arg0: i32, %arg1: i32) -> (i32, i32, i32) {
    %c0_i32 = arith.constant 0 : i32
    %c0_i32_0 = arith.constant 0 : i32
    %c0_i32_1 = arith.constant 0 : i32
    return %c0_i32, %arg0, %c0_i32_0 : i32, i32, i32
  }
  func.func @transform_7(%arg0: i32, %arg1: i32) -> (i32, i32, i32) {
    %c0_i32 = arith.constant 0 : i32
    %c0_i32_0 = arith.constant 0 : i32
    %c0_i32_1 = arith.constant 0 : i32
    return %c0_i32, %arg0, %c0_i32_0 : i32, i32, i32
  }
}

</mosaic_0001>

<bundles_post_ra>
// kernel: tpu_custom_call.1
= control target key start
LH: loop header
LB: loop body
LE: loop exit
PB: predicated region body
PF: predicated region fallthrough
CT: control target
= control target key end

     0   :  { %7 = vsyncpa [#allocation3], 0  ;;  %s649_s0 = inlined_call_operand.hbm [shape: f32[16,128], index: 0, kind: input, shape index: {}]   ;;  %s650_s1 = inlined_call_operand.hbm [shape: f32[8,128], index: 1, kind: input, shape index: {}]   ;;  %s651_s2 = inlined_call_operand.hbm [shape: f32[16,128], index: 2, kind: output, shape index: {}]  }
   0x1   :  { %9 = vsyncpa [#allocation3 + $0x1], 0 }
   0x2   :  { %10 = vsyncpa [#allocation6], 0 }
   0x3   :  { %11 = vsyncpa [#allocation4], 0 }
   0x4   :  { %13 = vsyncpa [#allocation4 + $0x1], 0  ;;  %s483_s9 = smov 0   ;;  %s485_s10 = smov 0  }
   0x5   :  { %s487_s11 = smov 0   ;;  %s489_s12 = smov 0  }
   0x6 LB: > { %s504_s13 = sadd.s32 4294967295, %s463_s12   ;;  %s270_s14 = sadd.s32 4294967294, %s463_s12   ;;  %s463_s12 = sphi %s489_s12, %s674_s12   ;;  %s459_s11 = sphi %s487_s11, %s673_s11   ;;  %s455_s10 = sphi %s485_s10, %s672_s10   ;;  %s451_s9 = sphi %s483_s9, %s671_s9  }
   0x7   : > { %p39_p0 = scmp.ne.s32.totalorder %s455_s10, %s451_s9  ;;  %p652_p1 = scmp.eq.s32.totalorder %s504_s13, 0 }
   0x8   : > { %p90_p3 = scmp.eq.s32.totalorder %s270_s14, 1  ;;  %p271_p5 = scmp.ge.s32.totalorder %s463_s12, 1 }
   0x9   : > { %p513_p4 = por %p652_p1, %p39_p0  ;;  %p97_p7 = scmp.lt.s32.totalorder %s463_s12, 3 }
   0xa   : > { %p518_p6 = por %p90_p3, %p39_p0  ;;  %s465_s18 = smov [#allocation5]  }
   0xb   : > { %s656_s15 = scalar_select %p513_p4, 1, 0 }
   0xc   : > { %s657_s16 = scalar_select %p518_p6, 1, 0 }
   0xd   : > { %p523_p8 = pnand %p271_p5, %p97_p7  ;;  %s110_s19 = sshll.u32 %s465_s18, 4  ;;  %s111_s19 = int_to_ptr.vmem [resolvable:$true] %s110_s19 }
   0xe   : > { %s531_s20 = sadd.s32 1, %s463_s12   ;;  %s26_s24 = sadd.s32 1, %s459_s11 }
   0xf   : > { %s658_s17 = scalar_select %p523_p8, 1, 0 }
  0x10   : > { %p292_p10 = pneg %p523_p8  ;;  %s23_s22 = ssub.s32 %s463_s12, %s531_s20 }
  0x11   : > { %p541_p12 = scmp.eq.s32.totalorder %s23_s22, 0  ;;  %p33_p13 = scmp.ne.s32.totalorder %s459_s11, %s455_s10 }
  0x12   : > { %p535_p11 = pnand %p292_p10, %p652_p1  ;;  %s352_s25 = scalar_lea.vmem %s111_s19, 128 }
  0x13   : > { %p353_p3 = scmp.ne.s32.totalorder %s111_s19, %s352_s25  ;;  %p360_p9 = scmp.lt.s32.totalorder %s111_s19, %s111_s19 }
  0x14   : > { %p343_p0 = pneg %p535_p11  ;;  %p361_p2 = scmp.lt.s32.totalorder %s352_s25, %s352_s25 }
  0x16   : > { %p355_p5 = pnand %p353_p3, %p343_p0  ;;  %p362_p10 = por %p361_p2, %p360_p9 }
  0x18   : > { %p356_p7 = pneg %p355_p5 }
  0x1a   : > { %p363_p1 = pnand %p362_p10, %p356_p7 }
  0x1c   : > { %366 = shalt.err (!%p363_p1)
}
  0x1d   : > { %295 = dma.hbm_to_vmem [thread:$0]  (!%p535_p11), %s650_s1, 128, %s111_s19, [#allocation6]  }
  0x1e   : > { %s558_s28 = scalar_select %p541_p12, %s459_s11, %s26_s24  }
  0x1f   : > { %p34_p1 = scmp.eq.s32.totalorder %s463_s12, 0  ;;  %p661_p2 = scmp.eq.s32.totalorder %s504_s13, 1 }
  0x20   : > { %p305_p0 = scmp.lt.s32.totalorder %s463_s12, 2  ;;  %s121_s30 = sand.u32 1, %s459_s11  }
  0x21   : > { %p566_p9 = por %p661_p2, %p33_p13  ;;  %p35_p3 = por %p34_p1, %p33_p13 }
  0x22   : > { %s274_s3 = sshll.u32 %s121_s30, 3  ;;  %s275_s4 = sshll.u32 %s463_s12, 7 }
  0x23   : > { %s662_s29 = scalar_select %p566_p9, 1, 0 }
  0x24   : > { %s579_s7 = scalar_lea.hbm %s649_s0, %s275_s4  ;;  %s125_s8 = scalar_lea.vmem [#allocation2], %s274_s3 }
  0x25   : > { %s132_s14 = sshll.u32 %s125_s8, 4  ;;  %p581_p11 = pnand %p305_p0, %p35_p3  ;;  %s133_s14 = int_to_ptr.vmem [resolvable:$true] %s132_s14 }
  0x26   : > { %s122_s19 = scalar_lea.sflag [#allocation3], %s121_s30  ;;  %s367_s21 = scalar_lea.hbm %s579_s7, 128 }
  0x27   : > { %p368_p12 = scmp.ne.s32.totalorder %s579_s7, %s367_s21  ;;  %p369_p13 = pneg %p581_p11 }
  0x28   : > { %s372_s24 = scalar_lea.hbm %s649_s0, 256  ;;  %p373_p10 = scmp.lt.s32.totalorder %s579_s7, %s649_s0 }
  0x29   : > { %p370_p5 = pnand %p369_p13, %p368_p12  ;;  %p374_p1 = scmp.lt.s32.totalorder %s372_s24, %s367_s21 }
  0x2b   : > { %p371_p7 = pneg %p370_p5  ;;  %p375_p2 = por %p374_p1, %p373_p10 }
  0x2d   : > { %p376_p0 = pnand %p375_p2, %p371_p7 }
  0x2f   : > { %379 = shalt.err (!%p376_p0)
}
  0x30   : > { %s380_s27 = scalar_lea.vmem %s133_s14, 128  ;;  %s466_s30 = smov [#allocation2]  }
  0x31   : > { %p381_p3 = scmp.ne.s32.totalorder %s133_s14, %s380_s27  ;;  %s385_s3 = sshll.u32 %s466_s30, 4  ;;  %s386_s3 = int_to_ptr.vmem [resolvable:$false] %s385_s3 }
  0x32   : > { %s387_s4 = scalar_lea.vmem %s386_s3, 256  ;;  %p388_p12 = scmp.lt.s32.totalorder %s133_s14, %s386_s3 }
  0x33   : > { %p383_p6 = pnand %p381_p3, %p369_p13  ;;  %p389_p5 = scmp.lt.s32.totalorder %s387_s4, %s380_s27 }
  0x35   : > { %p384_p9 = pneg %p383_p6  ;;  %p390_p4 = por %p389_p5, %p388_p12 }
  0x37   : > { %p391_p8 = pnand %p390_p4, %p384_p9 }
  0x39   : > { %394 = shalt.err (!%p391_p8)
}
  0x3a   : > { %299 = dma.hbm_to_vmem [thread:$0]  (!%p581_p11), %s579_s7, 128, %s133_s14, %s122_s19  }
  0x3b   : > { %p664_p7 = scmp.ne.s32.totalorder %s658_s17, 0 }
  0x3c   : > { %s602_s5 = sand.u32 (!%p664_p7), 1, %s455_s10   ;;  %p665_p6 = scmp.ne.s32.totalorder (!%p664_p7), %s656_s15, 0 }
  0x3d   : > { %141 = sbr.rel (%p664_p7) target bundleno = 95 (0x5f), region = 28  ;;  %s277_s6 = sshll.u32 (!%p664_p7), %s602_s5, 3 }
  0x3e   : > { %s144_s8 = scalar_lea.sflag (!%p664_p7), [#allocation3], %s602_s5  ;;  %s147_s21 = scalar_lea.vmem (!%p664_p7), [#allocation2], %s277_s6 }
  0x42   : > { %438 = dma.done.wait (%p665_p6), %s144_s8, 128  }
  0x43   : > { %440 = vsyncadd (%p665_p6), %s144_s8, 4294967168  ;;  %p666_p4 = scmp.eq.s32.totalorder %s504_s13, 0 }
  0x45   : > { %442 = dma.done.wait (%p666_p4), [#allocation6], 128   ;;  %p667_p8 = pmov %p666_p4 }
  0x46   : > { %s171_s17 = scalar_lea.vmem [#allocation7], %s277_s6  ;;  %s281_s14 = sshll.u32 %s504_s13, 7  ;;  %v172_v0 = vld [vmem:[%s147_s21] sm:$0xff]  ;;  %v173_v1 = vld [vmem:[#allocation5] sm:$0xff] }
  0x47   : > { %444 = vsyncadd (%p667_p8), [#allocation6], 4294967168  ;;  %s190_s7 = sshll.u32 %s171_s17, 4  ;;  %v174_v2 = vadd.f32 %v173_v1, %v172_v0  ;;  %s188_s15 = scalar_lea.hbm %s651_s2, %s281_s14  ;;  %s191_s7 = int_to_ptr.vmem [resolvable:$true] %s190_s7 }
  0x48   : > { %s177_s22 = scalar_lea.sflag [#allocation4], %s602_s5  ;;  %s395_s23 = scalar_lea.vmem %s191_s7, 128 }
  0x49   : > { %175 = vst [vmem:[%s171_s17] sm:$0xff] %v174_v2  ;;  %p396_p9 = scmp.ne.s32.totalorder %s191_s7, %s395_s23  ;;  %p668_p11 = scmp.ne.s32.totalorder %s662_s29, 0 }
  0x4a   : > { %s467_s24 = smov [#allocation7]  }
  0x4b   : > { %p397_p13 = pnand %p396_p9, %p668_p11  ;;  %s399_s25 = sshll.u32 %s467_s24, 4  ;;  %s400_s25 = int_to_ptr.vmem [resolvable:$false] %s399_s25 }
  0x4c   : > { %s401_s26 = scalar_lea.vmem %s400_s25, 256  ;;  %p402_p1 = scmp.lt.s32.totalorder %s191_s7, %s400_s25 }
  0x4d   : > { %p398_p10 = pneg %p397_p13  ;;  %p403_p2 = scmp.lt.s32.totalorder %s401_s26, %s395_s23 }
  0x4f   : > { %p404_p0 = por %p403_p2, %p402_p1 }
  0x51   : > { %p405_p3 = pnand %p404_p0, %p398_p10 }
  0x53   : > { %408 = shalt.err (!%p405_p3)
}
  0x54   : > { %s409_s13 = scalar_lea.hbm %s188_s15, 128  ;;  %s413_s3 = scalar_lea.hbm %s651_s2, 256 }
  0x55   : > { %p410_p12 = scmp.ne.s32.totalorder %s188_s15, %s409_s13  ;;  %p414_p6 = scmp.lt.s32.totalorder %s188_s15, %s651_s2 }
  0x56   : > { %p415_p4 = scmp.lt.s32.totalorder %s413_s3, %s409_s13 }
  0x57   : > { %p411_p5 = pnand %p410_p12, %p668_p11 }
  0x58   : > { %p416_p8 = por %p415_p4, %p414_p6 }
  0x59   : > { %p412_p7 = pneg %p411_p5 }
  0x5b   : > { %p417_p9 = pnand %p416_p8, %p412_p7 }
  0x5d   : > { %420 = shalt.err (!%p417_p9)
}
  0x5e   : > { %290 = dma.vmem_to_hbm [thread:$0]  (%p668_p11), %s191_s7, 128, %s188_s15, %s177_s22  }
  0x5f PF: > { %s202_s6 = sand.u32 1, %s451_s9   ;;  %p669_p13 = scmp.ne.s32.totalorder %s657_s16, 0 }
  0x60   : > { %p670_p10 = scmp.ge.s32.totalorder %s463_s12, 2  ;;  %s203_s8 = scalar_lea.sflag [#allocation4], %s202_s6 }
  0x62   : > { %p301_p1 = pnand %p670_p10, %p669_p13 }
  0x64   : > { %p302_p2 = pneg %p301_p1 }
  0x66   : > { %446 = dma.done.wait (%p302_p2), %s203_s8, 128  }
  0x67   : > { %448 = vsyncadd (%p302_p2), %s203_s8, 4294967168  ;;  %p16_p0 = scmp.ge.s32.totalorder %s531_s20, 4   ;;  %s671_s9 = smov %s455_s10 }
  0x68   : > { %s672_s10 = smov %s459_s11  ;;  %s673_s11 = smov %s558_s28 }
  0x69   : > { %s674_s12 = smov %s531_s20  ;;  %18 = sbr.rel (!%p16_p0) target bundleno = 6 (0x6), region = 77 }
  0x6e   :  { %208 = vsyncpa [#allocation3], 1 }
  0x6f   :  { %210 = vsyncpa [#allocation3 + $0x1], 1 }
  0x70   :  { %211 = vsyncpa [#allocation6], 1 }
  0x71   :  { %212 = vsyncpa [#allocation4], 1 }
  0x72   :  { %214 = vsyncpa [#allocation4 + $0x1], 1 }

// kernel: encoder_forward.1
= control target key start
LH: loop header
LB: loop body
LE: loop exit
PB: predicated region body
PF: predicated region fallthrough
CT: control target
= control target key end

     0   :  { %13 = vsyncpa [#allocation7], 0  ;;  %s6525_s0 = inlined_call_operand.vmem [shape: bf16[8,8,128], index: 0, kind: input, shape index: {}]   ;;  %s6526_s1 = inlined_call_operand.hbm [shape: bf16[128,512], index: 1, kind: input, shape index: {}]   ;;  %s6527_s2 = inlined_call_operand.hbm [shape: bf16[2,128,512], index: 2, kind: input, shape index: {}]   ;;  %s6528_s3 = inlined_call_operand.vmem [shape: f32[2,1,512], index: 3, kind: input, shape index: {}]   ;;  %s6529_s4 = inlined_call_operand.hbm [shape: bf16[1,128,512], index: 4, kind: input, shape index: {}]   ;;  %s6530_s5 = inlined_call_operand.vmem [shape: bf16[8,8,128], index: 5, kind: output, shape index: {0}]   ;;  %s6531_s6 = inlined_call_operand.vmem [shape: f32[2,8,128], index: 6, kind: output, shape index: {1}]   ;;  %s6532_s7 = inlined_call_operand.vmem [shape: f32[2,8,128], index: 7, kind: output, shape index: {2}]  }
   0x1   :  { %14 = vsyncpa [#allocation9], 0  ;;  %s4737_s24 = smov [#allocation8]   ;;  %s4738_s26 = smov [#allocation6]  }
   0x2   :  { %s34_s25 = sshll.u32 %s4737_s24, 4  ;;  %s22_s27 = sshll.u32 %s4738_s26, 4  ;;  %s35_s25 = int_to_ptr.vmem [resolvable:$true] %s34_s25  ;;  %s23_s27 = int_to_ptr.vmem [resolvable:$true] %s22_s27 }
   0x3   :  { %s4681_s28 = scalar_lea.vmem %s35_s25, 8192  ;;  %p4686_p1 = scmp.lt.s32.totalorder %s35_s25, %s35_s25 }
   0x4   :  { %p4682_p0 = scmp.ne.s32.totalorder %s35_s25, %s4681_s28  ;;  %p4687_p2 = scmp.lt.s32.totalorder %s4681_s28, %s4681_s28 }
   0x6   :  { %p4688_p3 = por %p4687_p2, %p4686_p1 }
   0x8   :  { %p4689_p4 = pnand %p4688_p3, %p4682_p0 }
   0xa   :  { %4692 = shalt.err (!%p4689_p4)
}
   0xb   :  { %s4739_s29 = smov 256   ;;  %s4740_s30 = smov 16  }
   0xc   :  { %40 = dma.hbm_to_vmem [thread:$0]  %s6527_s2, 8192, %s35_s25, [#allocation9], %s4739_s29, %s4739_s29, %s4740_s30  }
   0xd   :  { %s4701_s10 = scalar_lea.vmem %s23_s27, 4096  ;;  %p4706_p6 = scmp.lt.s32.totalorder %s23_s27, %s23_s27 }
   0xe   :  { %p4702_p5 = scmp.ne.s32.totalorder %s23_s27, %s4701_s10  ;;  %p4707_p7 = scmp.lt.s32.totalorder %s4701_s10, %s4701_s10 }
  0x10   :  { %p4708_p8 = por %p4707_p7, %p4706_p6 }
  0x12   :  { %p4709_p9 = pnand %p4708_p8, %p4702_p5 }
  0x14   :  { %4712 = shalt.err (!%p4709_p9)
}
  0x15   :  { %28 = dma.hbm_to_vmem [thread:$0]  %s6526_s1, 4096, %s23_s27, [#allocation7], %s4739_s29, %s4739_s29, %s4740_s30  }
  0x16   :  { %s4741_s13 = smov [#allocation10]  }
  0x17   :  { %s48_s14 = sshll.u32 %s4741_s13, 4  ;;  %s49_s14 = int_to_ptr.vmem [resolvable:$true] %s48_s14 }
  0x18   :  { %s4721_s15 = scalar_lea.vmem %s49_s14, 4096  ;;  %p4726_p11 = scmp.lt.s32.totalorder %s49_s14, %s49_s14 }
  0x19   :  { %p4722_p10 = scmp.ne.s32.totalorder %s49_s14, %s4721_s15  ;;  %p4727_p12 = scmp.lt.s32.totalorder %s4721_s15, %s4721_s15 }
  0x1b   :  { %p4728_p13 = por %p4727_p12, %p4726_p11 }
  0x1d   :  { %p4729_p0 = pnand %p4728_p13, %p4722_p10 }
  0x1f   :  { %4732 = shalt.err (!%p4729_p0)
}
  0x20   :  { %54 = dma.hbm_to_vmem [thread:$0]  %s6529_s4, 4096, %s49_s14, [#allocation9], %s4739_s29, %s4739_s29, %s4740_s30  }
  0x21   :  { %4733 = dma.done.wait [#allocation7], 4096  }
  0x22   :  { %4734 = vsyncadd [#allocation7], 4294963200 }
  0x23   :  { %4735 = dma.done.wait [#allocation9], 12288  }
  0x24   :  { %4736 = vsyncadd [#allocation9], 4294955008  ;;  %v6535_v0 = vmov 0   ;;  %v4795_v1 = vld [vmem:[#allocation6 + $0xe4] ss:$16 sps:$4 sm:$0xff]  }
  0x25   :  { %352 = vmatprep.mubr.bf16.mxu0 %v6535_v0  ;;  %393 = vmatprep.mubr.bf16.mxu1 %v6535_v0  ;;  %v4797_v2 = vld [vmem:[#allocation6 + $0xec] ss:$16 sps:$4 sm:$0xff]   ;;  %v4800_v3 = vld [vmem:[#allocation6 + $0xe0] ss:$16 sps:$4 sm:$0xff]   ;;  %v4802_v4 = vld [vmem:[#allocation6 + $0xe8] ss:$16 sps:$4 sm:$0xff]  }
  0x26   :  { %320 = vmatprep.subr.bf16.mxu0 %v4795_v1  ;;  %361 = vmatprep.subr.bf16.mxu1 %v4797_v2  ;;  %v4805_v5 = vld [vmem:[#allocation6 + $0xc4] ss:$16 sps:$4 sm:$0xff]   ;;  %v4809_v6 = vld [vmem:[#allocation6 + $0xcc] ss:$16 sps:$4 sm:$0xff]   ;;  %v4811_v7 = vld [vmem:[#allocation6 + $0xc0] ss:$16 sps:$4 sm:$0xff]  }
  0x27   :  { %321 = vmatpush1.bf16.msra.mxu0 %v4800_v3  ;;  %362 = vmatpush1.bf16.msra.mxu1 %v4802_v4  ;;  %v4814_v8 = vld [vmem:[#allocation6 + $0xc8] ss:$16 sps:$4 sm:$0xff]   ;;  %v4817_v9 = vld [vmem:[#allocation6 + $0xa4] ss:$16 sps:$4 sm:$0xff]   ;;  %v4819_v10 = vld [vmem:[#allocation6 + $0xac] ss:$16 sps:$4 sm:$0xff]  }
  0x28   :  { %322 = vmatprep.subr.bf16.mxu0 %v4805_v5  ;;  %363 = vmatprep.subr.bf16.mxu1 %v4809_v6  ;;  %v4821_v11 = vld [vmem:[#allocation6 + $0xa0] ss:$16 sps:$4 sm:$0xff]   ;;  %v4823_v12 = vld [vmem:[#allocation6 + $0xa8] ss:$16 sps:$4 sm:$0xff]   ;;  %v4827_v13 = vld [vmem:[#allocation6 + $0x84] ss:$16 sps:$4 sm:$0xff]  }
  0x29   :  { %v4831_v14 = vld [vmem:[#allocation6 + $0x8c] ss:$16 sps:$4 sm:$0xff]   ;;  %v4833_v15 = vld [vmem:[#allocation6 + $0x80] ss:$16 sps:$4 sm:$0xff]   ;;  %v4837_v16 = vld [vmem:[#allocation6 + $0x88] ss:$16 sps:$4 sm:$0xff]  }
  0x2a   :  { %v4839_v17 = vld [vmem:[#allocation6 + $0x64] ss:$16 sps:$4 sm:$0xff]   ;;  %v4843_v18 = vld [vmem:[#allocation6 + $0x6c] ss:$16 sps:$4 sm:$0xff]   ;;  %v4845_v19 = vld [vmem:[#allocation6 + $0x60] ss:$16 sps:$4 sm:$0xff]  }
  0x2b   :  { %323 = vmatpush1.bf16.msra.mxu0 %v4811_v7  ;;  %364 = vmatpush1.bf16.msra.mxu1 %v4814_v8  ;;  %v4847_v20 = vld [vmem:[#allocation6 + $0x68] ss:$16 sps:$4 sm:$0xff]   ;;  %v4851_v21 = vld [vmem:[#allocation6 + $0x44] ss:$16 sps:$4 sm:$0xff]   ;;  %v4855_v22 = vld [vmem:[#allocation6 + $0x4c] ss:$16 sps:$4 sm:$0xff]  }
  0x2c   :  { %324 = vmatprep.subr.bf16.mxu0 %v4817_v9  ;;  %365 = vmatprep.subr.bf16.mxu1 %v4819_v10  ;;  %v4859_v23 = vld [vmem:[#allocation6 + $0x40] ss:$16 sps:$4 sm:$0xff]   ;;  %v4861_v24 = vld [vmem:[#allocation6 + $0x48] ss:$16 sps:$4 sm:$0xff]   ;;  %v4865_v25 = vld [vmem:[#allocation6 + $0x24] ss:$16 sps:$4 sm:$0xff]  }
  0x2d   :  { %v4867_v26 = vld [vmem:[#allocation6 + $0x2c] ss:$16 sps:$4 sm:$0xff]   ;;  %v4869_v27 = vld [vmem:[#allocation6 + $0x20] ss:$16 sps:$4 sm:$0xff]   ;;  %v4871_v28 = vld [vmem:[#allocation6 + $0x28] ss:$16 sps:$4 sm:$0xff]  }
  0x2e   :  { %v4873_v29 = vld [vmem:[#allocation6 + $0x4] ss:$16 sps:$4 sm:$0xff]   ;;  %v4875_v30 = vld [vmem:[#allocation6 + $0xc] ss:$16 sps:$4 sm:$0xff]   ;;  %v4881_v31 = vld [vmem:[#allocation6] ss:$16 sps:$4 sm:$0xff]  }
  0x2f   :  { %325 = vmatpush1.bf16.msra.mxu0 %v4821_v11  ;;  %366 = vmatpush1.bf16.msra.mxu1 %v4823_v12  ;;  %v4883_v32 = vld [vmem:[#allocation6 + $0x8] ss:$16 sps:$4 sm:$0xff]   ;;  %v138_v33 = vld [vmem:[%s6525_s0] sm:$0xf]  ;;  %v4137_v34 = vld [vmem:[%s6525_s0 + $0x4] sm:$0xf] }
  0x30   :  { %326 = vmatprep.subr.bf16.mxu0 %v4827_v13  ;;  %367 = vmatprep.subr.bf16.mxu1 %v4831_v14  ;;  %v4138_v35 = vld [vmem:[%s6525_s0 + $0x8] sm:$0xf]  ;;  %v4139_v36 = vld [vmem:[%s6525_s0 + $0xc] sm:$0xf]  ;;  %v4140_v37 = vld [vmem:[%s6525_s0 + $0x10] sm:$0xf] }
  0x31   :  { %v4141_v38 = vld [vmem:[%s6525_s0 + $0x14] sm:$0xf]  ;;  %v4142_v39 = vld [vmem:[%s6525_s0 + $0x18] sm:$0xf]  ;;  %v5158_v49 = vld [vmem:[#allocation8 + $0xec] ss:$16 sps:$4 sm:$0xff]  }
  0x32   :  { %v5156_v48 = vld [vmem:[#allocation8 + $0xe4] ss:$16 sps:$4 sm:$0xff]   ;;  %v4143_v50 = vld [vmem:[%s6525_s0 + $0x1c] sm:$0xf]  ;;  %v5165_v51 = vld [vmem:[#allocation8 + $0xe0] ss:$16 sps:$4 sm:$0xff]  }
  0x33   :  { %327 = vmatpush1.bf16.msra.mxu0 %v4833_v15  ;;  %368 = vmatpush1.bf16.msra.mxu1 %v4837_v16  ;;  %v5167_v52 = vld [vmem:[#allocation8 + $0xe8] ss:$16 sps:$4 sm:$0xff]   ;;  %v5171_v53 = vld [vmem:[#allocation8 + $0xc4] ss:$16 sps:$4 sm:$0xff]   ;;  %v5173_v54 = vld [vmem:[#allocation8 + $0xcc] ss:$16 sps:$4 sm:$0xff]  }
  0x34   :  { %328 = vmatprep.subr.bf16.mxu0 %v4839_v17  ;;  %369 = vmatprep.subr.bf16.mxu1 %v4843_v18  ;;  %v5181_v57 = vld [vmem:[#allocation8 + $0xc0] ss:$16 sps:$4 sm:$0xff]   ;;  %v5183_v58 = vld [vmem:[#allocation8 + $0xc8] ss:$16 sps:$4 sm:$0xff]   ;;  %v5191_v61 = vld [vmem:[#allocation8 + $0xa4] ss:$16 sps:$4 sm:$0xff]  }
  0x35   :  { %v5193_v62 = vld [vmem:[#allocation8 + $0xac] ss:$16 sps:$4 sm:$0xff]  }
  0x37   :  { %329 = vmatpush1.bf16.msra.mxu0 %v4845_v19  ;;  %370 = vmatpush1.bf16.msra.mxu1 %v4847_v20 }
  0x38   :  { %330 = vmatprep.subr.bf16.mxu0 %v4851_v21  ;;  %371 = vmatprep.subr.bf16.mxu1 %v4855_v22 }
  0x3b   :  { %331 = vmatpush1.bf16.msra.mxu0 %v4859_v23  ;;  %372 = vmatpush1.bf16.msra.mxu1 %v4861_v24 }
  0x3c   :  { %332 = vmatprep.subr.bf16.mxu0 %v4865_v25  ;;  %373 = vmatprep.subr.bf16.mxu1 %v4867_v26 }
  0x3f   :  { %333 = vmatpush1.bf16.msra.mxu0 %v4869_v27  ;;  %374 = vmatpush1.bf16.msra.mxu1 %v4871_v28 }
  0x40   :  { %334 = vmatprep.subr.bf16.mxu0 %v4873_v29  ;;  %375 = vmatprep.subr.bf16.mxu1 %v4875_v30 }
  0x43   :  { %335 = vmatpush1.bf16.msra.mxu0 %v4881_v31  ;;  %376 = vmatpush1.bf16.msra.mxu1 %v4883_v32 }
  0x44   :  { %408 = vmatprep.subr.bf16.mxu0 %v4795_v1  ;;  %449 = vmatprep.subr.bf16.mxu1 %v4797_v2 }
  0x46   :  { %353 = vmatmul.mubr.bf16.vlgmr.msra.gmra.mxu0 %v138_v33  ;;  %394 = vmatmul.mubr.bf16.vlgmr.msra.gmra.mxu1 %v138_v33 }
  0x47   :  { %409 = vmatpush1.bf16.msra.mxu0 %v4800_v3  ;;  %450 = vmatpush1.bf16.msra.mxu1 %v4802_v4 }
  0x48   :  { %410 = vmatprep.subr.bf16.mxu0 %v4805_v5  ;;  %451 = vmatprep.subr.bf16.mxu1 %v4809_v6 }
  0x49   :  { %440 = vmatprep.mubr.bf16.mxu0 %v6535_v0  ;;  %481 = vmatprep.mubr.bf16.mxu1 %v6535_v0 }
  0x4b   :  { %411 = vmatpush1.bf16.msra.mxu0 %v4811_v7  ;;  %452 = vmatpush1.bf16.msra.mxu1 %v4814_v8 }
  0x4c   :  { %412 = vmatprep.subr.bf16.mxu0 %v4817_v9  ;;  %453 = vmatprep.subr.bf16.mxu1 %v4819_v10 }
  0x4f   :  { %413 = vmatpush1.bf16.msra.mxu0 %v4821_v11  ;;  %454 = vmatpush1.bf16.msra.mxu1 %v4823_v12 }
  0x50   :  { %414 = vmatprep.subr.bf16.mxu0 %v4827_v13  ;;  %455 = vmatprep.subr.bf16.mxu1 %v4831_v14 }
  0x53   :  { %415 = vmatpush1.bf16.msra.mxu0 %v4833_v15  ;;  %456 = vmatpush1.bf16.msra.mxu1 %v4837_v16 }
  0x54   :  { %416 = vmatprep.subr.bf16.mxu0 %v4839_v17  ;;  %457 = vmatprep.subr.bf16.mxu1 %v4843_v18 }
  0x57   :  { %417 = vmatpush1.bf16.msra.mxu0 %v4845_v19  ;;  %458 = vmatpush1.bf16.msra.mxu1 %v4847_v20 }
  0x58   :  { %418 = vmatprep.subr.bf16.mxu0 %v4851_v21  ;;  %459 = vmatprep.subr.bf16.mxu1 %v4855_v22 }
  0x5b   :  { %419 = vmatpush1.bf16.msra.mxu0 %v4859_v23  ;;  %460 = vmatpush1.bf16.msra.mxu1 %v4861_v24 }
  0x5c   :  { %420 = vmatprep.subr.bf16.mxu0 %v4865_v25  ;;  %461 = vmatprep.subr.bf16.mxu1 %v4867_v26 }
  0x5f   :  { %421 = vmatpush1.bf16.msra.mxu0 %v4869_v27  ;;  %462 = vmatpush1.bf16.msra.mxu1 %v4871_v28 }
  0x60   :  { %422 = vmatprep.subr.bf16.mxu0 %v4873_v29  ;;  %463 = vmatprep.subr.bf16.mxu1 %v4875_v30 }
  0x63   :  { %423 = vmatpush1.bf16.msra.mxu0 %v4881_v31  ;;  %464 = vmatpush1.bf16.msra.mxu1 %v4883_v32 }
  0x64   :  { %497 = vmatprep.subr.bf16.mxu0 %v4795_v1  ;;  %538 = vmatprep.subr.bf16.mxu1 %v4797_v2 }
  0x66   :  { %441 = vmatmul.mubr.bf16.vlgmr.msra.gmra.mxu0 %v4137_v34  ;;  %482 = vmatmul.mubr.bf16.vlgmr.msra.gmra.mxu1 %v4137_v34 }
  0x67   :  { %498 = vmatpush1.bf16.msra.mxu0 %v4800_v3  ;;  %539 = vmatpush1.bf16.msra.mxu1 %v4802_v4 }
  0x68   :  { %499 = vmatprep.subr.bf16.mxu0 %v4805_v5  ;;  %540 = vmatprep.subr.bf16.mxu1 %v4809_v6 }
  0x69   :  { %529 = vmatprep.mubr.bf16.mxu0 %v6535_v0  ;;  %570 = vmatprep.mubr.bf16.mxu1 %v6535_v0 }
  0x6b   :  { %500 = vmatpush1.bf16.msra.mxu0 %v4811_v7  ;;  %541 = vmatpush1.bf16.msra.mxu1 %v4814_v8 }
  0x6c   :  { %501 = vmatprep.subr.bf16.mxu0 %v4817_v9  ;;  %542 = vmatprep.subr.bf16.mxu1 %v4819_v10 }
  0x6f   :  { %502 = vmatpush1.bf16.msra.mxu0 %v4821_v11  ;;  %543 = vmatpush1.bf16.msra.mxu1 %v4823_v12 }
  0x70   :  { %503 = vmatprep.subr.bf16.mxu0 %v4827_v13  ;;  %544 = vmatprep.subr.bf16.mxu1 %v4831_v14 }
  0x73   :  { %504 = vmatpush1.bf16.msra.mxu0 %v4833_v15  ;;  %545 = vmatpush1.bf16.msra.mxu1 %v4837_v16 }
  0x74   :  { %505 = vmatprep.subr.bf16.mxu0 %v4839_v17  ;;  %546 = vmatprep.subr.bf16.mxu1 %v4843_v18 }
  0x77   :  { %506 = vmatpush1.bf16.msra.mxu0 %v4845_v19  ;;  %547 = vmatpush1.bf16.msra.mxu1 %v4847_v20 }
  0x78   :  { %507 = vmatprep.subr.bf16.mxu0 %v4851_v21  ;;  %548 = vmatprep.subr.bf16.mxu1 %v4855_v22 }
  0x7b   :  { %508 = vmatpush1.bf16.msra.mxu0 %v4859_v23  ;;  %549 = vmatpush1.bf16.msra.mxu1 %v4861_v24 }
  0x7c   :  { %509 = vmatprep.subr.bf16.mxu0 %v4865_v25  ;;  %550 = vmatprep.subr.bf16.mxu1 %v4867_v26 }
  0x7f   :  { %510 = vmatpush1.bf16.msra.mxu0 %v4869_v27  ;;  %551 = vmatpush1.bf16.msra.mxu1 %v4871_v28 }
  0x80   :  { %511 = vmatprep.subr.bf16.mxu0 %v4873_v29  ;;  %552 = vmatprep.subr.bf16.mxu1 %v4875_v30 }
  0x83   :  { %512 = vmatpush1.bf16.msra.mxu0 %v4881_v31  ;;  %553 = vmatpush1.bf16.msra.mxu1 %v4883_v32 }
  0x84   :  { %586 = vmatprep.subr.bf16.mxu0 %v4795_v1  ;;  %627 = vmatprep.subr.bf16.mxu1 %v4797_v2 }
  0x86   :  { %530 = vmatmul.mubr.bf16.vlgmr.msra.gmra.mxu0 %v4138_v35  ;;  %571 = vmatmul.mubr.bf16.vlgmr.msra.gmra.mxu1 %v4138_v35 }
  0x87   :  { %587 = vmatpush1.bf16.msra.mxu0 %v4800_v3  ;;  %628 = vmatpush1.bf16.msra.mxu1 %v4802_v4 }
  0x88   :  { %588 = vmatprep.subr.bf16.mxu0 %v4805_v5  ;;  %629 = vmatprep.subr.bf16.mxu1 %v4809_v6 }
  0x89   :  { %618 = vmatprep.mubr.bf16.mxu0 %v6535_v0  ;;  %659 = vmatprep.mubr.bf16.mxu1 %v6535_v0 }
  0x8b   :  { %589 = vmatpush1.bf16.msra.mxu0 %v4811_v7  ;;  %630 = vmatpush1.bf16.msra.mxu1 %v4814_v8 }
  0x8c   :  { %590 = vmatprep.subr.bf16.mxu0 %v4817_v9  ;;  %631 = vmatprep.subr.bf16.mxu1 %v4819_v10 }
  0x8f   :  { %591 = vmatpush1.bf16.msra.mxu0 %v4821_v11  ;;  %632 = vmatpush1.bf16.msra.mxu1 %v4823_v12 }
  0x90   :  { %592 = vmatprep.subr.bf16.mxu0 %v4827_v13  ;;  %633 = vmatprep.subr.bf16.mxu1 %v4831_v14 }
  0x93   :  { %593 = vmatpush1.bf16.msra.mxu0 %v4833_v15  ;;  %634 = vmatpush1.bf16.msra.mxu1 %v4837_v16 }
  0x94   :  { %594 = vmatprep.subr.bf16.mxu0 %v4839_v17  ;;  %635 = vmatprep.subr.bf16.mxu1 %v4843_v18 }
  0x97   :  { %595 = vmatpush1.bf16.msra.mxu0 %v4845_v19  ;;  %636 = vmatpush1.bf16.msra.mxu1 %v4847_v20 }
  0x98   :  { %596 = vmatprep.subr.bf16.mxu0 %v4851_v21  ;;  %637 = vmatprep.subr.bf16.mxu1 %v4855_v22 }
  0x9b   :  { %597 = vmatpush1.bf16.msra.mxu0 %v4859_v23  ;;  %638 = vmatpush1.bf16.msra.mxu1 %v4861_v24 }
  0x9c   :  { %598 = vmatprep.subr.bf16.mxu0 %v4865_v25  ;;  %639 = vmatprep.subr.bf16.mxu1 %v4867_v26 }
  0x9f   :  { %599 = vmatpush1.bf16.msra.mxu0 %v4869_v27  ;;  %640 = vmatpush1.bf16.msra.mxu1 %v4871_v28 }
  0xa0   :  { %600 = vmatprep.subr.bf16.mxu0 %v4873_v29  ;;  %641 = vmatprep.subr.bf16.mxu1 %v4875_v30 }
  0xa3   :  { %601 = vmatpush1.bf16.msra.mxu0 %v4881_v31  ;;  %642 = vmatpush1.bf16.msra.mxu1 %v4883_v32 }
  0xa4   :  { %675 = vmatprep.subr.bf16.mxu0 %v4795_v1  ;;  %716 = vmatprep.subr.bf16.mxu1 %v4797_v2 }
  0xa6   :  { %619 = vmatmul.mubr.bf16.vlgmr.msra.gmra.mxu0 %v4139_v36  ;;  %660 = vmatmul.mubr.bf16.vlgmr.msra.gmra.mxu1 %v4139_v36 }
  0xa7   :  { %676 = vmatpush1.bf16.msra.mxu0 %v4800_v3  ;;  %717 = vmatpush1.bf16.msra.mxu1 %v4802_v4 }
  0xa8   :  { %677 = vmatprep.subr.bf16.mxu0 %v4805_v5  ;;  %718 = vmatprep.subr.bf16.mxu1 %v4809_v6 }
  0xa9   :  { %707 = vmatprep.mubr.bf16.mxu0 %v6535_v0  ;;  %748 = vmatprep.mubr.bf16.mxu1 %v6535_v0 }
  0xab   :  { %678 = vmatpush1.bf16.msra.mxu0 %v4811_v7  ;;  %719 = vmatpush1.bf16.msra.mxu1 %v4814_v8 }
  0xac   :  { %679 = vmatprep.subr.bf16.mxu0 %v4817_v9  ;;  %720 = vmatprep.subr.bf16.mxu1 %v4819_v10 }
  0xaf   :  { %680 = vmatpush1.bf16.msra.mxu0 %v4821_v11  ;;  %721 = vmatpush1.bf16.msra.mxu1 %v4823_v12 }
  0xb0   :  { %681 = vmatprep.subr.bf16.mxu0 %v4827_v13  ;;  %722 = vmatprep.subr.bf16.mxu1 %v4831_v14 }
  0xb3   :  { %682 = vmatpush1.bf16.msra.mxu0 %v4833_v15  ;;  %723 = vmatpush1.bf16.msra.mxu1 %v4837_v16 }
  0xb4   :  { %683 = vmatprep.subr.bf16.mxu0 %v4839_v17  ;;  %724 = vmatprep.subr.bf16.mxu1 %v4843_v18 }
  0xb7   :  { %684 = vmatpush1.bf16.msra.mxu0 %v4845_v19  ;;  %725 = vmatpush1.bf16.msra.mxu1 %v4847_v20 }
  0xb8   :  { %685 = vmatprep.subr.bf16.mxu0 %v4851_v21  ;;  %726 = vmatprep.subr.bf16.mxu1 %v4855_v22 }
  0xbb   :  { %686 = vmatpush1.bf16.msra.mxu0 %v4859_v23  ;;  %727 = vmatpush1.bf16.msra.mxu1 %v4861_v24 }
  0xbc   :  { %687 = vmatprep.subr.bf16.mxu0 %v4865_v25  ;;  %728 = vmatprep.subr.bf16.mxu1 %v4867_v26 }
  0xbf   :  { %688 = vmatpush1.bf16.msra.mxu0 %v4869_v27  ;;  %729 = vmatpush1.bf16.msra.mxu1 %v4871_v28 }
  0xc0   :  { %689 = vmatprep.subr.bf16.mxu0 %v4873_v29  ;;  %730 = vmatprep.subr.bf16.mxu1 %v4875_v30 }
  0xc3   :  { %690 = vmatpush1.bf16.msra.mxu0 %v4881_v31  ;;  %731 = vmatpush1.bf16.msra.mxu1 %v4883_v32 }
  0xc4   :  { %764 = vmatprep.subr.bf16.mxu0 %v4795_v1  ;;  %805 = vmatprep.subr.bf16.mxu1 %v4797_v2 }
  0xc6   :  { %708 = vmatmul.mubr.bf16.vlgmr.msra.gmra.mxu0 %v4140_v37  ;;  %749 = vmatmul.mubr.bf16.vlgmr.msra.gmra.mxu1 %v4140_v37 }
  0xc7   :  { %765 = vmatpush1.bf16.msra.mxu0 %v4800_v3  ;;  %806 = vmatpush1.bf16.msra.mxu1 %v4802_v4 }
  0xc8   :  { %766 = vmatprep.subr.bf16.mxu0 %v4805_v5  ;;  %807 = vmatprep.subr.bf16.mxu1 %v4809_v6 }
  0xc9   :  { %796 = vmatprep.mubr.bf16.mxu0 %v6535_v0  ;;  %837 = vmatprep.mubr.bf16.mxu1 %v6535_v0 }
  0xcb   :  { %767 = vmatpush1.bf16.msra.mxu0 %v4811_v7  ;;  %808 = vmatpush1.bf16.msra.mxu1 %v4814_v8 }
  0xcc   :  { %768 = vmatprep.subr.bf16.mxu0 %v4817_v9  ;;  %809 = vmatprep.subr.bf16.mxu1 %v4819_v10 }
  0xcf   :  { %769 = vmatpush1.bf16.msra.mxu0 %v4821_v11  ;;  %810 = vmatpush1.bf16.msra.mxu1 %v4823_v12 }
  0xd0   :  { %770 = vmatprep.subr.bf16.mxu0 %v4827_v13  ;;  %811 = vmatprep.subr.bf16.mxu1 %v4831_v14 }
  0xd3   :  { %771 = vmatpush1.bf16.msra.mxu0 %v4833_v15  ;;  %812 = vmatpush1.bf16.msra.mxu1 %v4837_v16 }
  0xd4   :  { %772 = vmatprep.subr.bf16.mxu0 %v4839_v17  ;;  %813 = vmatprep.subr.bf16.mxu1 %v4843_v18 }
  0xd7   :  { %773 = vmatpush1.bf16.msra.mxu0 %v4845_v19  ;;  %814 = vmatpush1.bf16.msra.mxu1 %v4847_v20 }
  0xd8   :  { %774 = vmatprep.subr.bf16.mxu0 %v4851_v21  ;;  %815 = vmatprep.subr.bf16.mxu1 %v4855_v22 }
  0xdb   :  { %775 = vmatpush1.bf16.msra.mxu0 %v4859_v23  ;;  %816 = vmatpush1.bf16.msra.mxu1 %v4861_v24 }
  0xdc   :  { %776 = vmatprep.subr.bf16.mxu0 %v4865_v25  ;;  %817 = vmatprep.subr.bf16.mxu1 %v4867_v26 }
  0xdf   :  { %777 = vmatpush1.bf16.msra.mxu0 %v4869_v27  ;;  %818 = vmatpush1.bf16.msra.mxu1 %v4871_v28 }
  0xe0   :  { %778 = vmatprep.subr.bf16.mxu0 %v4873_v29  ;;  %819 = vmatprep.subr.bf16.mxu1 %v4875_v30 }
  0xe3   :  { %779 = vmatpush1.bf16.msra.mxu0 %v4881_v31  ;;  %820 = vmatpush1.bf16.msra.mxu1 %v4883_v32 }
  0xe4   :  { %853 = vmatprep.subr.bf16.mxu0 %v4795_v1  ;;  %894 = vmatprep.subr.bf16.mxu1 %v4797_v2 }
  0xe6   :  { %797 = vmatmul.mubr.bf16.vlgmr.msra.gmra.mxu0 %v4141_v38  ;;  %838 = vmatmul.mubr.bf16.vlgmr.msra.gmra.mxu1 %v4141_v38 }
  0xe7   :  { %854 = vmatpush1.bf16.msra.mxu0 %v4800_v3  ;;  %895 = vmatpush1.bf16.msra.mxu1 %v4802_v4 }
  0xe8   :  { %855 = vmatprep.subr.bf16.mxu0 %v4805_v5  ;;  %896 = vmatprep.subr.bf16.mxu1 %v4809_v6 }
  0xe9   :  { %885 = vmatprep.mubr.bf16.mxu0 %v6535_v0  ;;  %926 = vmatprep.mubr.bf16.mxu1 %v6535_v0 }
  0xeb   :  { %856 = vmatpush1.bf16.msra.mxu0 %v4811_v7  ;;  %897 = vmatpush1.bf16.msra.mxu1 %v4814_v8 }
  0xec   :  { %857 = vmatprep.subr.bf16.mxu0 %v4817_v9  ;;  %898 = vmatprep.subr.bf16.mxu1 %v4819_v10 }
  0xef   :  { %858 = vmatpush1.bf16.msra.mxu0 %v4821_v11  ;;  %899 = vmatpush1.bf16.msra.mxu1 %v4823_v12 }
  0xf0   :  { %859 = vmatprep.subr.bf16.mxu0 %v4827_v13  ;;  %900 = vmatprep.subr.bf16.mxu1 %v4831_v14 }
  0xf3   :  { %860 = vmatpush1.bf16.msra.mxu0 %v4833_v15  ;;  %901 = vmatpush1.bf16.msra.mxu1 %v4837_v16 }
  0xf4   :  { %861 = vmatprep.subr.bf16.mxu0 %v4839_v17  ;;  %902 = vmatprep.subr.bf16.mxu1 %v4843_v18 }
  0xf7   :  { %862 = vmatpush1.bf16.msra.mxu0 %v4845_v19  ;;  %903 = vmatpush1.bf16.msra.mxu1 %v4847_v20 }
  0xf8   :  { %863 = vmatprep.subr.bf16.mxu0 %v4851_v21  ;;  %904 = vmatprep.subr.bf16.mxu1 %v4855_v22 }
  0xfb   :  { %864 = vmatpush1.bf16.msra.mxu0 %v4859_v23  ;;  %905 = vmatpush1.bf16.msra.mxu1 %v4861_v24 }
  0xfc   :  { %865 = vmatprep.subr.bf16.mxu0 %v4865_v25  ;;  %906 = vmatprep.subr.bf16.mxu1 %v4867_v26 }
  0xff   :  { %866 = vmatpush1.bf16.msra.mxu0 %v4869_v27  ;;  %907 = vmatpush1.bf16.msra.mxu1 %v4871_v28 }
 0x100   :  { %867 = vmatprep.subr.bf16.mxu0 %v4873_v29  ;;  %908 = vmatprep.subr.bf16.mxu1 %v4875_v30 }
 0x103   :  { %868 = vmatpush1.bf16.msra.mxu0 %v4881_v31  ;;  %909 = vmatpush1.bf16.msra.mxu1 %v4883_v32 }
 0x104   :  { %942 = vmatprep.subr.bf16.mxu0 %v4795_v1  ;;  %983 = vmatprep.subr.bf16.mxu1 %v4797_v2  ;;  %v5199_v2 = vld [vmem:[#allocation8 + $0xa0] ss:$16 sps:$4 sm:$0xff]  }
 0x106   :  { %v5118_v40 = vpop.f32.mrf.mxu0  ;;  %886 = vmatmul.mubr.bf16.vlgmr.msra.gmra.mxu0 %v4142_v39  ;;  %927 = vmatmul.mubr.bf16.vlgmr.msra.gmra.mxu1 %v4142_v39  ;;  %v5120_v41 = vpop.f32.mrf.mxu1 }
 0x107   :  { %943 = vmatpush1.bf16.msra.mxu0 %v4800_v3  ;;  %984 = vmatpush1.bf16.msra.mxu1 %v4802_v4  ;;  %v5201_v3 = vld [vmem:[#allocation8 + $0xa8] ss:$16 sps:$4 sm:$0xff]  }
 0x108   :  { %v5124_v42 = vpop.f32.mrf.mxu0  ;;  %944 = vmatprep.subr.bf16.mxu0 %v4805_v5  ;;  %985 = vmatprep.subr.bf16.mxu1 %v4809_v6  ;;  %v5128_v43 = vpop.f32.mrf.mxu1  ;;  %v5205_v6 = vld [vmem:[#allocation8 + $0x84] ss:$16 sps:$4 sm:$0xff]  }
 0x109   :  { %974 = vmatprep.mubr.bf16.mxu0 %v6535_v0  ;;  %1015 = vmatprep.mubr.bf16.mxu1 %v6535_v0 }
 0x10a   :  { %v358_v44 = vpop.f32.mrf.mxu0  ;;  %v399_v45 = vpop.f32.mrf.mxu1 }
 0x10b   :  { %945 = vmatpush1.bf16.msra.mxu0 %v4811_v7  ;;  %986 = vmatpush1.bf16.msra.mxu1 %v4814_v8  ;;  %v5207_v7 = vld [vmem:[#allocation8 + $0x8c] ss:$16 sps:$4 sm:$0xff]   ;;  %v5211_v8 = vld [vmem:[#allocation8 + $0x80] ss:$16 sps:$4 sm:$0xff]  }
 0x10c   :  { %v359_v46 = vpop.f32.mrf.mxu0  ;;  %946 = vmatprep.subr.bf16.mxu0 %v4817_v9  ;;  %987 = vmatprep.subr.bf16.mxu1 %v4819_v10  ;;  %v400_v47 = vpop.f32.mrf.mxu1  ;;  %v5213_v9 = vld [vmem:[#allocation8 + $0x88] ss:$16 sps:$4 sm:$0xff]   ;;  %v5217_v10 = vld [vmem:[#allocation8 + $0x64] ss:$16 sps:$4 sm:$0xff]  }
 0x10f   :  { %947 = vmatpush1.bf16.msra.mxu0 %v4821_v11  ;;  %988 = vmatpush1.bf16.msra.mxu1 %v4823_v12  ;;  %v5219_v11 = vld [vmem:[#allocation8 + $0x6c] ss:$16 sps:$4 sm:$0xff]   ;;  %v5223_v12 = vld [vmem:[#allocation8 + $0x60] ss:$16 sps:$4 sm:$0xff]  }
 0x110   :  { %948 = vmatprep.subr.bf16.mxu0 %v4827_v13  ;;  %989 = vmatprep.subr.bf16.mxu1 %v4831_v14  ;;  %v5225_v13 = vld [vmem:[#allocation8 + $0x68] ss:$16 sps:$4 sm:$0xff]   ;;  %v5229_v14 = vld [vmem:[#allocation8 + $0x44] ss:$16 sps:$4 sm:$0xff]  }
 0x113   :  { %949 = vmatpush1.bf16.msra.mxu0 %v4833_v15  ;;  %990 = vmatpush1.bf16.msra.mxu1 %v4837_v16  ;;  %v5231_v15 = vld [vmem:[#allocation8 + $0x4c] ss:$16 sps:$4 sm:$0xff]   ;;  %v5235_v16 = vld [vmem:[#allocation8 + $0x40] ss:$16 sps:$4 sm:$0xff]  }
 0x114   :  { %950 = vmatprep.subr.bf16.mxu0 %v4839_v17  ;;  %991 = vmatprep.subr.bf16.mxu1 %v4843_v18  ;;  %v5237_v17 = vld [vmem:[#allocation8 + $0x48] ss:$16 sps:$4 sm:$0xff]   ;;  %v5241_v18 = vld [vmem:[#allocation8 + $0x24] ss:$16 sps:$4 sm:$0xff]  }
 0x117   :  { %951 = vmatpush1.bf16.msra.mxu0 %v4845_v19  ;;  %992 = vmatpush1.bf16.msra.mxu1 %v4847_v20  ;;  %v5243_v19 = vld [vmem:[#allocation8 + $0x2c] ss:$16 sps:$4 sm:$0xff]   ;;  %v5247_v20 = vld [vmem:[#allocation8 + $0x20] ss:$16 sps:$4 sm:$0xff]  }
 0x118   :  { %952 = vmatprep.subr.bf16.mxu0 %v4851_v21  ;;  %993 = vmatprep.subr.bf16.mxu1 %v4855_v22  ;;  %v5249_v21 = vld [vmem:[#allocation8 + $0x28] ss:$16 sps:$4 sm:$0xff]   ;;  %v5253_v22 = vld [vmem:[#allocation8 + $0x4] ss:$16 sps:$4 sm:$0xff]  }
 0x11b   :  { %953 = vmatpush1.bf16.msra.mxu0 %v4859_v23  ;;  %994 = vmatpush1.bf16.msra.mxu1 %v4861_v24  ;;  %v5255_v23 = vld [vmem:[#allocation8 + $0xc] ss:$16 sps:$4 sm:$0xff]   ;;  %v5259_v24 = vld [vmem:[#allocation8] ss:$16 sps:$4 sm:$0xff]  }
 0x11c   :  { %954 = vmatprep.subr.bf16.mxu0 %v4865_v25  ;;  %995 = vmatprep.subr.bf16.mxu1 %v4867_v26  ;;  %v5261_v25 = vld [vmem:[#allocation8 + $0x8] ss:$16 sps:$4 sm:$0xff]  }
 0x11f   :  { %955 = vmatpush1.bf16.msra.mxu0 %v4869_v27  ;;  %996 = vmatpush1.bf16.msra.mxu1 %v4871_v28  ;;  %v6533_v27 = vmov 0.0|0.0  }
 0x120   :  { %956 = vmatprep.subr.bf16.mxu0 %v4873_v29  ;;  %997 = vmatprep.subr.bf16.mxu1 %v4875_v30 }
 0x123   :  { %957 = vmatpush1.bf16.msra.mxu0 %v4881_v31  ;;  %998 = vmatpush1.bf16.msra.mxu1 %v4883_v32 }
 0x124   :  { %1196 = vmatprep.subr.bf16.mxu0 %v5156_v48  ;;  %1237 = vmatprep.subr.bf16.mxu1 %v5158_v49 }
 0x126   :  { %v5175_v55 = vpop.f32.mrf.mxu0  ;;  %975 = vmatmul.mubr.bf16.vlgmr.msra.gmra.mxu0 %v4143_v50  ;;  %1016 = vmatmul.mubr.bf16.vlgmr.msra.gmra.mxu1 %v4143_v50  ;;  %v5177_v56 = vpop.f32.mrf.mxu1 }
 0x127   :  { %1197 = vmatpush1.bf16.msra.mxu0 %v5165_v51  ;;  %1238 = vmatpush1.bf16.msra.mxu1 %v5167_v52 }
 0x128   :  { %v5185_v59 = vpop.f32.mrf.mxu0  ;;  %1198 = vmatprep.subr.bf16.mxu0 %v5171_v53  ;;  %1239 = vmatprep.subr.bf16.mxu1 %v5173_v54  ;;  %v5189_v60 = vpop.f32.mrf.mxu1 }
 0x129   :  { %1228 = vmatprep.mubr.bf16.mxu0 %v6535_v0  ;;  %1269 = vmatprep.mubr.bf16.mxu1 %v6535_v0 }
 0x12a   :  { %v446_v63 = vpop.f32.mrf.mxu0  ;;  %v487_v1 = vpop.f32.mrf.mxu1 }
 0x12b   :  { %1199 = vmatpush1.bf16.msra.mxu0 %v5181_v57  ;;  %1240 = vmatpush1.bf16.msra.mxu1 %v5183_v58 }
 0x12c   :  { %v447_v4 = vpop.f32.mrf.mxu0  ;;  %1200 = vmatprep.subr.bf16.mxu0 %v5191_v61  ;;  %1241 = vmatprep.subr.bf16.mxu1 %v5193_v62  ;;  %v488_v5 = vpop.f32.mrf.mxu1 }
 0x12f   :  { %1201 = vmatpush1.bf16.msra.mxu0 %v5199_v2  ;;  %1242 = vmatpush1.bf16.msra.mxu1 %v5201_v3 }
 0x130   :  { %1202 = vmatprep.subr.bf16.mxu0 %v5205_v6  ;;  %1243 = vmatprep.subr.bf16.mxu1 %v5207_v7 }
 0x133   :  { %1203 = vmatpush1.bf16.msra.mxu0 %v5211_v8  ;;  %1244 = vmatpush1.bf16.msra.mxu1 %v5213_v9 }
 0x134   :  { %1204 = vmatprep.subr.bf16.mxu0 %v5217_v10  ;;  %1245 = vmatprep.subr.bf16.mxu1 %v5219_v11 }
 0x137   :  { %1205 = vmatpush1.bf16.msra.mxu0 %v5223_v12  ;;  %1246 = vmatpush1.bf16.msra.mxu1 %v5225_v13 }
 0x138   :  { %1206 = vmatprep.subr.bf16.mxu0 %v5229_v14  ;;  %1247 = vmatprep.subr.bf16.mxu1 %v5231_v15 }
 0x13b   :  { %1207 = vmatpush1.bf16.msra.mxu0 %v5235_v16  ;;  %1248 = vmatpush1.bf16.msra.mxu1 %v5237_v17 }
 0x13c   :  { %1208 = vmatprep.subr.bf16.mxu0 %v5241_v18  ;;  %1249 = vmatprep.subr.bf16.mxu1 %v5243_v19 }
 0x13f   :  { %1209 = vmatpush1.bf16.msra.mxu0 %v5247_v20  ;;  %1250 = vmatpush1.bf16.msra.mxu1 %v5249_v21 }
 0x140   :  { %1210 = vmatprep.subr.bf16.mxu0 %v5253_v22  ;;  %1251 = vmatprep.subr.bf16.mxu1 %v5255_v23 }
 0x143   :  { %1211 = vmatpush1.bf16.msra.mxu0 %v5259_v24  ;;  %1252 = vmatpush1.bf16.msra.mxu1 %v5261_v25 }
 0x144   :  { %1306 = vmatprep.subr.bf16.mxu0 %v5156_v48  ;;  %1347 = vmatprep.subr.bf16.mxu1 %v5158_v49 }
 0x146   :  { %v5269_v26 = vpop.f32.mrf.mxu0  ;;  %1229 = vmatmul.mubr.bf16.vlgmr.msra.gmra.mxu0 %v6533_v27  ;;  %1270 = vmatmul.mubr.bf16.vlgmr.msra.gmra.mxu1 %v6533_v27  ;;  %v5273_v28 = vpop.f32.mrf.mxu1 }
 0x147   :  { %1307 = vmatpush1.bf16.msra.mxu0 %v5165_v51  ;;  %1348 = vmatpush1.bf16.msra.mxu1 %v5167_v52 }
 0x148   :  { %v5277_v29 = vpop.f32.mrf.mxu0  ;;  %v5279_v30 = vpop.f32.mrf.mxu1  ;;  %1308 = vmatprep.subr.bf16.mxu0 %v5171_v53  ;;  %1349 = vmatprep.subr.bf16.mxu1 %v5173_v54 }
 0x149   :  { %6541 = vst [vmem:[#allocation13_spill] sm:$0xff] %v5279_v30  ;;  %1338 = vmatprep.mubr.bf16.mxu0 %v6535_v0  ;;  %1379 = vmatprep.mubr.bf16.mxu1 %v6535_v0 }
 0x14a   :  { %v535_v31 = vpop.f32.mrf.mxu0  ;;  %v576_v32 = vpop.f32.mrf.mxu1 }
 0x14b   :  { %1309 = vmatpush1.bf16.msra.mxu0 %v5181_v57  ;;  %1350 = vmatpush1.bf16.msra.mxu1 %v5183_v58 }
 0x14c   :  { %v536_v33 = vpop.f32.mrf.mxu0  ;;  %v577_v34 = vpop.f32.mrf.mxu1  ;;  %1310 = vmatprep.subr.bf16.mxu0 %v5191_v61  ;;  %1351 = vmatprep.subr.bf16.mxu1 %v5193_v62 }
 0x14f   :  { %1311 = vmatpush1.bf16.msra.mxu0 %v5199_v2  ;;  %1352 = vmatpush1.bf16.msra.mxu1 %v5201_v3 }
 0x150   :  { %1312 = vmatprep.subr.bf16.mxu0 %v5205_v6  ;;  %1353 = vmatprep.subr.bf16.mxu1 %v5207_v7 }
 0x153   :  { %1313 = vmatpush1.bf16.msra.mxu0 %v5211_v8  ;;  %1354 = vmatpush1.bf16.msra.mxu1 %v5213_v9 }
 0x154   :  { %1314 = vmatprep.subr.bf16.mxu0 %v5217_v10  ;;  %1355 = vmatprep.subr.bf16.mxu1 %v5219_v11 }
 0x157   :  { %1315 = vmatpush1.bf16.msra.mxu0 %v5223_v12  ;;  %1356 = vmatpush1.bf16.msra.mxu1 %v5225_v13 }
 0x158   :  { %1316 = vmatprep.subr.bf16.mxu0 %v5229_v14  ;;  %1357 = vmatprep.subr.bf16.mxu1 %v5231_v15 }
 0x15b   :  { %1317 = vmatpush1.bf16.msra.mxu0 %v5235_v16  ;;  %1358 = vmatpush1.bf16.msra.mxu1 %v5237_v17 }
 0x15c   :  { %1318 = vmatprep.subr.bf16.mxu0 %v5241_v18  ;;  %1359 = vmatprep.subr.bf16.mxu1 %v5243_v19 }
 0x15f   :  { %1319 = vmatpush1.bf16.msra.mxu0 %v5247_v20  ;;  %1360 = vmatpush1.bf16.msra.mxu1 %v5249_v21 }
 0x160   :  { %1320 = vmatprep.subr.bf16.mxu0 %v5253_v22  ;;  %1361 = vmatprep.subr.bf16.mxu1 %v5255_v23 }
 0x163   :  { %1321 = vmatpush1.bf16.msra.mxu0 %v5259_v24  ;;  %1362 = vmatpush1.bf16.msra.mxu1 %v5261_v25 }
 0x164   :  { %1417 = vmatprep.subr.bf16.mxu0 %v5156_v48  ;;  %1458 = vmatprep.subr.bf16.mxu1 %v5158_v49 }
 0x166   :  { %v5313_v35 = vpop.f32.mrf.mxu0  ;;  %v5315_v36 = vpop.f32.mrf.mxu1 }
 0x167   :  { %6542 = vst [vmem:[#allocation14_spill] sm:$0xff] %v5313_v35  ;;  %6543 = vst [vmem:[#allocation15_spill] sm:$0xff] %v5315_v36 }
 0x168   :  { %v5317_v37 = vpop.f32.mrf.mxu0  ;;  %v5319_v38 = vpop.f32.mrf.mxu1 }
 0x169   :  { %6544 = vst [vmem:[#allocation16_spill] sm:$0xff] %v5317_v37  ;;  %6545 = vst [vmem:[#allocation17_spill] sm:$0xff] %v5319_v38 }
 0x16a   :  { %v624_v39 = vpop.f32.mrf.mxu0  ;;  %v665_v44 = vpop.f32.mrf.mxu1 }
 0x16c   :  { %v625_v45 = vpop.f32.mrf.mxu0  ;;  %v666_v46 = vpop.f32.mrf.mxu1 }
 0x186   :  { %v5321_v47 = vpop.f32.mrf.mxu0  ;;  %v5323_v50 = vpop.f32.mrf.mxu1 }
 0x187   :  { %6546 = vst [vmem:[#allocation18_spill] sm:$0xff] %v5321_v47  ;;  %6547 = vst [vmem:[#allocation19_spill] sm:$0xff] %v5323_v50 }
 0x188   :  { %v5325_v63 = vpop.f32.mrf.mxu0  ;;  %v5327_v1 = vpop.f32.mrf.mxu1 }
 0x189   :  { %6548 = vst [vmem:[#allocation20_spill] sm:$0xff] %v5325_v63  ;;  %6549 = vst [vmem:[#allocation21_spill] sm:$0xff] %v5327_v1 }
 0x18a   :  { %v713_v4 = vpop.f32.mrf.mxu0  ;;  %v754_v5 = vpop.f32.mrf.mxu1 }
 0x18c   :  { %v714_v31 = vpop.f32.mrf.mxu0  ;;  %v755_v32 = vpop.f32.mrf.mxu1 }
 0x1a6   :  { %v5329_v33 = vpop.f32.mrf.mxu0  ;;  %v5331_v34 = vpop.f32.mrf.mxu1 }
 0x1a7   :  { %6550 = vst [vmem:[#allocation22_spill] sm:$0xff] %v5329_v33  ;;  %6551 = vst [vmem:[#allocation23_spill] sm:$0xff] %v5331_v34 }
 0x1a8   :  { %v5333_v39 = vpop.f32.mrf.mxu0  ;;  %v5335_v44 = vpop.f32.mrf.mxu1 }
 0x1a9   :  { %6552 = vst [vmem:[#allocation24_spill] sm:$0xff] %v5333_v39  ;;  %6553 = vst [vmem:[#allocation25_spill] sm:$0xff] %v5335_v44  ;;  %v140_v44 = vlaneseq }
 0x1aa   :  { %v802_v45 = vpop.f32.mrf.mxu0  ;;  %v843_v46 = vpop.f32.mrf.mxu1 }
 0x1ac   :  { %v803_v27 = vpop.f32.mrf.mxu0  ;;  %v844_v0 = vpop.f32.mrf.mxu1 }
 0x1c6   :  { %v5337_v50 = vpop.f32.mrf.mxu0  ;;  %v5339_v63 = vpop.f32.mrf.mxu1 }
 0x1c7   :  { %6554 = vst [vmem:[#allocation26_spill] sm:$0xff] %v5337_v50  ;;  %6555 = vst [vmem:[#allocation27_spill] sm:$0xff] %v5339_v63 }
 0x1c8   :  { %v5341_v4 = vpop.f32.mrf.mxu0  ;;  %v5343_v5 = vpop.f32.mrf.mxu1 }
 0x1c9   :  { %6556 = vst [vmem:[#allocation28_spill] sm:$0xff] %v5341_v4  ;;  %6557 = vst [vmem:[#allocation29_spill] sm:$0xff] %v5343_v5  ;;  %v5353_v4 = vshrl.u32 %v140_v44, 7 }
 0x1ca   :  { %v891_v31 = vpop.f32.mrf.mxu0  ;;  %v932_v32 = vpop.f32.mrf.mxu1 }
 0x1cb   :  { %v6537_v31 = vsub.s32 0, %v5353_v4 }
 0x1cc   :  { %v892_v33 = vpop.f32.mrf.mxu0  ;;  %v933_v34 = vpop.f32.mrf.mxu1 }
 0x1cd   :  { %v137_v33 = vld [vmem:[%s6528_s3] sm:$0xf]  ;;  %v6538_v34 = vsub.s32 1, %v5353_v4 }
 0x1ce   :  { %v5362_v32 = vrot.slane %v137_v33, %v6537_v31 }
 0x1e6   :  { %v5345_v1 = vpop.f32.mrf.mxu0  ;;  %v5347_v39 = vpop.f32.mrf.mxu1 }
 0x1e7   :  { %6558 = vst [vmem:[#allocation30_spill] sm:$0xff] %v5345_v1  ;;  %6559 = vst [vmem:[#allocation31_spill] sm:$0xff] %v5347_v39 }
 0x1e8   :  { %v5349_v45 = vpop.f32.mrf.mxu0  ;;  %v5351_v27 = vpop.f32.mrf.mxu1 }
 0x1e9   :  { %6560 = vst [vmem:[#allocation32_spill] sm:$0xff] %v5349_v45  ;;  %6561 = vst [vmem:[#allocation33_spill] sm:$0xff] %v5351_v27 }
 0x1ea   :  { %v980_v0 = vpop.f32.mrf.mxu0  ;;  %v1021_v46 = vpop.f32.mrf.mxu1 }
 0x1eb   :  { %v6539_v0 = vsub.s32 2, %v5353_v4 }
 0x1ec   :  { %v981_v50 = vpop.f32.mrf.mxu0  ;;  %v1022_v63 = vpop.f32.mrf.mxu1 }
 0x1ed   :  { %v5367_v50 = vrot.slane %v137_v33, %v6538_v34  ;;  %v355_v63 = vadd.f32 %v5118_v40, %v5362_v32  ;;  %v5373_v44 = vrot.slane %v137_v33, %v6539_v0  ;;  %v6540_v34 = vsub.s32 3, %v5353_v4 }
 0x1ef   :  { %v357_v39 = vadd.f32 %v5124_v42, %v5367_v50  ;;  %v396_v5 = vadd.f32 %v5120_v41, %v5373_v44  ;;  %v5382_v42 = vrot.slane %v137_v33, %v6540_v34 }
 0x1f1   :  { %v398_v41 = vadd.f32 %v5128_v43, %v5382_v42 }
 0x206   :  { %v1230_v46 = vpop.f32.mrf.mxu0  ;;  %v1271_v27 = vpop.f32.mrf.mxu1 }
 0x207   :  { %v1278_v31 = vadd.f32 %v1230_v46, %v355_v63  ;;  %v1280_v0 = vadd.f32 %v1271_v27, %v396_v5 }
 0x208   :  { %v1232_v45 = vpop.f32.mrf.mxu0  ;;  %v1273_v1 = vpop.f32.mrf.mxu1 }
 0x209   :  { %v1282_v47 = vmul.f32 0.5, %v1278_v31  ;;  %v1279_v38 = vadd.f32 %v1232_v45, %v357_v39  ;;  %v1281_v63 = vadd.f32 %v1273_v1, %v398_v41  ;;  %v6562_v41 = vmov 0  }
 0x20a   :  { %v1234_v40 = vpop.f32.mrf.mxu0  ;;  %v1275_v36 = vpop.f32.mrf.mxu1 }
 0x20b   :  { %4449 = vtanh.f32 %v1282_v47  ;;  %v1286_v37 = vmul.f32 0.5, %v1279_v38  ;;  %v1291_v46 = vmul.f32 0.5, %v1281_v63  ;;  %v443_v63 = vadd.f32 %v5175_v55, %v5362_v32 }
 0x20c   :  { %v1235_v35 = vpop.f32.mrf.mxu0  ;;  %v1276_v30 = vpop.f32.mrf.mxu1 }
 0x20d   :  { %4451 = vtanh.f32 %v1286_v37 }
 0x20e   :  { %4453 = vtanh.f32 %v1280_v0 }
 0x20f   :  { %4455 = vtanh.f32 %v1291_v46 }
 0x218   :  { %v4450_v31 = vpop.eup %4449 }
 0x219   :  { %v1284_v39 = vmul.f32 0.5, %v4450_v31 }
 0x21a   :  { %v4452_v45 = vpop.eup %4451 }
 0x21b   :  { %v1285_v36 = vadd.f32 0.5, %v1284_v39  ;;  %v1288_v47 = vmul.f32 0.5, %v4452_v45  ;;  %v4454_v38 = vpop.eup %4453  ;;  %v445_v39 = vadd.f32 %v5185_v59, %v5367_v50  ;;  %v486_v59 = vadd.f32 %v5189_v60, %v5382_v42 }
 0x21c   :  { %v4456_v37 = vpop.eup %4455 }
 0x21d   :  { %v1289_v35 = vadd.f32 0.5, %v1288_v47  ;;  %v1296_v30 = vmul.f32 %v4454_v38, %v1285_v36  ;;  %v1293_v33 = vmul.f32 0.5, %v4456_v37  ;;  %v484_v38 = vadd.f32 %v5177_v56, %v5373_v44 }
 0x21f   :  { %v1295_v5 = vmul.f32 0.0, %v1289_v35  ;;  %v1294_v0 = vadd.f32 0.5, %v1293_v33 }
 0x221   :  { %v5386_v27 = vadd.f32 %v1296_v30, %v1295_v5 }
 0x223   :  { %4457 = vtanh.f32 %v5386_v27 }
 0x230   :  { %v4458_v43 = vpop.eup %4457 }
 0x231   :  { %v1299_v1 = vmul.f32 %v4458_v43, %v1294_v0 }
 0x233   :  { %v1300_v40 = vpack.c.bf16 %v1299_v1, %v1299_v1 }
 0x235   :  { %1301 = vst [vmem:[#allocation4] sm:$0xf] %v1300_v40  ;;  %1339 = vmatmul.mubr.bf16.vlgmr.msra.gmra.mxu0 %v1300_v40  ;;  %1380 = vmatmul.mubr.bf16.vlgmr.msra.gmra.mxu1 %v1300_v40 }
 0x236   :  { %1418 = vmatpush1.bf16.msra.mxu0 %v5165_v51  ;;  %1459 = vmatpush1.bf16.msra.mxu1 %v5167_v52 }
 0x237   :  { %1419 = vmatprep.subr.bf16.mxu0 %v5171_v53  ;;  %1460 = vmatprep.subr.bf16.mxu1 %v5173_v54 }
 0x238   :  { %1449 = vmatprep.mubr.bf16.mxu0 %v6562_v41  ;;  %1490 = vmatprep.mubr.bf16.mxu1 %v6562_v41 }
 0x23a   :  { %1420 = vmatpush1.bf16.msra.mxu0 %v5181_v57  ;;  %1461 = vmatpush1.bf16.msra.mxu1 %v5183_v58 }
 0x23b   :  { %1421 = vmatprep.subr.bf16.mxu0 %v5191_v61  ;;  %1462 = vmatprep.subr.bf16.mxu1 %v5193_v62 }
 0x23e   :  { %1422 = vmatpush1.bf16.msra.mxu0 %v5199_v2  ;;  %1463 = vmatpush1.bf16.msra.mxu1 %v5201_v3 }
 0x23f   :  { %1423 = vmatprep.subr.bf16.mxu0 %v5205_v6  ;;  %1464 = vmatprep.subr.bf16.mxu1 %v5207_v7 }
 0x242   :  { %1424 = vmatpush1.bf16.msra.mxu0 %v5211_v8  ;;  %1465 = vmatpush1.bf16.msra.mxu1 %v5213_v9 }
 0x243   :  { %1425 = vmatprep.subr.bf16.mxu0 %v5217_v10  ;;  %1466 = vmatprep.subr.bf16.mxu1 %v5219_v11 }
 0x246   :  { %1426 = vmatpush1.bf16.msra.mxu0 %v5223_v12  ;;  %1467 = vmatpush1.bf16.msra.mxu1 %v5225_v13 }
 0x247   :  { %1427 = vmatprep.subr.bf16.mxu0 %v5229_v14  ;;  %1468 = vmatprep.subr.bf16.mxu1 %v5231_v15 }
 0x24a   :  { %1428 = vmatpush1.bf16.msra.mxu0 %v5235_v16  ;;  %1469 = vmatpush1.bf16.msra.mxu1 %v5237_v17 }
 0x24b   :  { %1429 = vmatprep.subr.bf16.mxu0 %v5241_v18  ;;  %1470 = vmatprep.subr.bf16.mxu1 %v5243_v19 }
 0x24e   :  { %1430 = vmatpush1.bf16.msra.mxu0 %v5247_v20  ;;  %1471 = vmatpush1.bf16.msra.mxu1 %v5249_v21 }
 0x24f   :  { %1431 = vmatprep.subr.bf16.mxu0 %v5253_v22  ;;  %1472 = vmatprep.subr.bf16.mxu1 %v5255_v23 }
 0x252   :  { %1432 = vmatpush1.bf16.msra.mxu0 %v5259_v24  ;;  %1473 = vmatpush1.bf16.msra.mxu1 %v5261_v25 }
 0x253   :  { %1528 = vmatprep.subr.bf16.mxu0 %v5156_v48  ;;  %1569 = vmatprep.subr.bf16.mxu1 %v5158_v49 }
 0x2f5   :  { %v1340_v46 = vpop.f32.mrf.mxu0  ;;  %v1381_v31 = vpop.f32.mrf.mxu1 }
 0x2f6   :  { %v1388_v45 = vadd.f32 %v1340_v46, %v443_v63  ;;  %v1390_v33 = vadd.f32 %v1381_v31, %v484_v38 }
 0x2f7   :  { %v1342_v36 = vpop.f32.mrf.mxu0  ;;  %v1383_v47 = vpop.f32.mrf.mxu1 }
 0x2f8   :  { %v1392_v35 = vmul.f32 0.5, %v1388_v45  ;;  %v1389_v30 = vadd.f32 %v1342_v36, %v445_v39  ;;  %v1391_v1 = vadd.f32 %v1383_v47, %v486_v59 }
 0x2f9   :  { %v1344_v5 = vpop.f32.mrf.mxu0  ;;  %v1385_v37 = vpop.f32.mrf.mxu1 }
 0x2fa   :  { %4459 = vtanh.f32 %v1392_v35  ;;  %v1396_v0 = vmul.f32 0.5, %v1389_v30  ;;  %v1401_v40 = vmul.f32 0.5, %v1391_v1 }
 0x2fb   :  { %v1345_v43 = vpop.f32.mrf.mxu0  ;;  %v1386_v55 = vpop.f32.mrf.mxu1 }
 0x2fc   :  { %4461 = vtanh.f32 %v1396_v0  ;;  %v534_v43 = vadd.f32 %v5277_v29, %v5367_v50 }
 0x2fd   :  { %4463 = vtanh.f32 %v1390_v33 }
 0x2fe   :  { %4465 = vtanh.f32 %v1401_v40  ;;  %v573_v40 = vadd.f32 %v5273_v28, %v5373_v44 }
 0x307   :  { %v4460_v63 = vpop.eup %4459 }
 0x308   :  { %v1394_v46 = vmul.f32 0.5, %v4460_v63 }
 0x309   :  { %v4462_v34 = vpop.eup %4461 }
 0x30a   :  { %v1395_v56 = vadd.f32 0.5, %v1394_v46  ;;  %v1398_v45 = vmul.f32 0.5, %v4462_v34  ;;  %v4464_v39 = vpop.eup %4463  ;;  %v532_v34 = vadd.f32 %v5269_v26, %v5362_v32 }
 0x30b   :  { %v4466_v30 = vpop.eup %4465 }
 0x30c   :  { %v1399_v36 = vadd.f32 0.5, %v1398_v45  ;;  %v1406_v35 = vmul.f32 %v4464_v39, %v1395_v56  ;;  %v1403_v5 = vmul.f32 0.5, %v4466_v30 }
 0x30e   :  { %v1405_v31 = vmul.f32 %v1399_v36, %v5386_v27  ;;  %v1404_v60 = vadd.f32 0.5, %v1403_v5 }
 0x310   :  { %v5432_v38 = vadd.f32 %v1406_v35, %v1405_v31  ;;  %v6563_v31 = vld [vmem:[#allocation13_spill] sm:$0xff] }
 0x311   :  { %v575_v29 = vadd.f32 %v6563_v31, %v5382_v42 }
 0x312   :  { %4467 = vtanh.f32 %v5432_v38 }
 0x31f   :  { %v4468_v47 = vpop.eup %4467 }
 0x320   :  { %v1409_v37 = vmul.f32 %v4468_v47, %v1404_v60 }
 0x322   :  { %v1410_v33 = vpack.c.bf16 %v1409_v37, %v1409_v37 }
 0x324   :  { %1412 = vst [vmem:[#allocation4 + $0x4] sm:$0xf] %v1410_v33  ;;  %1450 = vmatmul.mubr.bf16.vlgmr.msra.gmra.mxu0 %v1410_v33  ;;  %1491 = vmatmul.mubr.bf16.vlgmr.msra.gmra.mxu1 %v1410_v33 }
 0x325   :  { %1529 = vmatpush1.bf16.msra.mxu0 %v5165_v51  ;;  %1570 = vmatpush1.bf16.msra.mxu1 %v5167_v52 }
 0x326   :  { %1530 = vmatprep.subr.bf16.mxu0 %v5171_v53  ;;  %1571 = vmatprep.subr.bf16.mxu1 %v5173_v54 }
 0x327   :  { %1560 = vmatprep.mubr.bf16.mxu0 %v6562_v41  ;;  %1601 = vmatprep.mubr.bf16.mxu1 %v6562_v41 }
 0x329   :  { %1531 = vmatpush1.bf16.msra.mxu0 %v5181_v57  ;;  %1572 = vmatpush1.bf16.msra.mxu1 %v5183_v58 }
 0x32a   :  { %1532 = vmatprep.subr.bf16.mxu0 %v5191_v61  ;;  %1573 = vmatprep.subr.bf16.mxu1 %v5193_v62 }
 0x32d   :  { %1533 = vmatpush1.bf16.msra.mxu0 %v5199_v2  ;;  %1574 = vmatpush1.bf16.msra.mxu1 %v5201_v3 }
 0x32e   :  { %1534 = vmatprep.subr.bf16.mxu0 %v5205_v6  ;;  %1575 = vmatprep.subr.bf16.mxu1 %v5207_v7 }
 0x331   :  { %1535 = vmatpush1.bf16.msra.mxu0 %v5211_v8  ;;  %1576 = vmatpush1.bf16.msra.mxu1 %v5213_v9 }
 0x332   :  { %1536 = vmatprep.subr.bf16.mxu0 %v5217_v10  ;;  %1577 = vmatprep.subr.bf16.mxu1 %v5219_v11 }
 0x335   :  { %1537 = vmatpush1.bf16.msra.mxu0 %v5223_v12  ;;  %1578 = vmatpush1.bf16.msra.mxu1 %v5225_v13 }
 0x336   :  { %1538 = vmatprep.subr.bf16.mxu0 %v5229_v14  ;;  %1579 = vmatprep.subr.bf16.mxu1 %v5231_v15 }
 0x339   :  { %1539 = vmatpush1.bf16.msra.mxu0 %v5235_v16  ;;  %1580 = vmatpush1.bf16.msra.mxu1 %v5237_v17 }
 0x33a   :  { %1540 = vmatprep.subr.bf16.mxu0 %v5241_v18  ;;  %1581 = vmatprep.subr.bf16.mxu1 %v5243_v19 }
 0x33d   :  { %1541 = vmatpush1.bf16.msra.mxu0 %v5247_v20  ;;  %1582 = vmatpush1.bf16.msra.mxu1 %v5249_v21 }
 0x33e   :  { %1542 = vmatprep.subr.bf16.mxu0 %v5253_v22  ;;  %1583 = vmatprep.subr.bf16.mxu1 %v5255_v23 }
 0x341   :  { %1543 = vmatpush1.bf16.msra.mxu0 %v5259_v24  ;;  %1584 = vmatpush1.bf16.msra.mxu1 %v5261_v25 }
 0x342   :  { %1639 = vmatprep.subr.bf16.mxu0 %v5156_v48  ;;  %1680 = vmatprep.subr.bf16.mxu1 %v5158_v49 }
 0x3e4   :  { %v1451_v27 = vpop.f32.mrf.mxu0  ;;  %v1492_v0 = vpop.f32.mrf.mxu1 }
 0x3e5   :  { %v1499_v55 = vadd.f32 %v1451_v27, %v532_v34  ;;  %v1501_v39 = vadd.f32 %v1492_v0, %v573_v40 }
 0x3e6   :  { %v1453_v59 = vpop.f32.mrf.mxu0  ;;  %v1494_v1 = vpop.f32.mrf.mxu1 }
 0x3e7   :  { %v1503_v63 = vmul.f32 0.5, %v1499_v55  ;;  %v1500_v46 = vadd.f32 %v1453_v59, %v534_v43  ;;  %v1502_v30 = vadd.f32 %v1494_v1, %v575_v29 }
 0x3e8   :  { %v1455_v56 = vpop.f32.mrf.mxu0  ;;  %v1496_v45 = vpop.f32.mrf.mxu1 }
 0x3e9   :  { %4469 = vtanh.f32 %v1503_v63  ;;  %v1507_v36 = vmul.f32 0.5, %v1500_v46  ;;  %v1512_v5 = vmul.f32 0.5, %v1502_v30 }
 0x3ea   :  { %v1456_v35 = vpop.f32.mrf.mxu0  ;;  %v1497_v26 = vpop.f32.mrf.mxu1 }
 0x3eb   :  { %4471 = vtanh.f32 %v1507_v36  ;;  %v6565_v35 = vld [vmem:[#allocation16_spill] sm:$0xff] }
 0x3ec   :  { %4473 = vtanh.f32 %v1501_v39  ;;  %v623_v26 = vadd.f32 %v6565_v35, %v5367_v50 }
 0x3ed   :  { %4475 = vtanh.f32 %v1512_v5  ;;  %v6566_v5 = vld [vmem:[#allocation15_spill] sm:$0xff] }
 0x3f6   :  { %v4470_v60 = vpop.eup %4469 }
 0x3f7   :  { %v1505_v47 = vmul.f32 0.5, %v4470_v60  ;;  %v662_v60 = vadd.f32 %v6566_v5, %v5373_v44 }
 0x3f8   :  { %v4472_v37 = vpop.eup %4471 }
 0x3f9   :  { %v1506_v28 = vadd.f32 0.5, %v1505_v47  ;;  %v1509_v33 = vmul.f32 0.5, %v4472_v37  ;;  %v4474_v34 = vpop.eup %4473 }
 0x3fa   :  { %v4476_v59 = vpop.eup %4475 }
 0x3fb   :  { %v1510_v27 = vadd.f32 0.5, %v1509_v33  ;;  %v1517_v43 = vmul.f32 %v4474_v34, %v1506_v28  ;;  %v1514_v40 = vmul.f32 0.5, %v4476_v59  ;;  %v6567_v59 = vld [vmem:[#allocation17_spill] sm:$0xff] }
 0x3fd   :  { %v1516_v0 = vmul.f32 %v1510_v27, %v5432_v38  ;;  %v1515_v63 = vadd.f32 0.5, %v1514_v40  ;;  %v6564_v38 = vld [vmem:[#allocation14_spill] sm:$0xff]  ;;  %v664_v40 = vadd.f32 %v6567_v59, %v5382_v42 }
 0x3fe   :  { %v621_v45 = vadd.f32 %v6564_v38, %v5362_v32 }
 0x3ff   :  { %v5478_v55 = vadd.f32 %v1517_v43, %v1516_v0 }
 0x401   :  { %4477 = vtanh.f32 %v5478_v55 }
 0x40e   :  { %v4478_v1 = vpop.eup %4477 }
 0x40f   :  { %v1520_v46 = vmul.f32 %v4478_v1, %v1515_v63 }
 0x411   :  { %v1521_v56 = vpack.c.bf16 %v1520_v46, %v1520_v46 }
 0x413   :  { %1523 = vst [vmem:[#allocation4 + $0x8] sm:$0xf] %v1521_v56  ;;  %1561 = vmatmul.mubr.bf16.vlgmr.msra.gmra.mxu0 %v1521_v56  ;;  %1602 = vmatmul.mubr.bf16.vlgmr.msra.gmra.mxu1 %v1521_v56 }
 0x414   :  { %1640 = vmatpush1.bf16.msra.mxu0 %v5165_v51  ;;  %1681 = vmatpush1.bf16.msra.mxu1 %v5167_v52 }
 0x415   :  { %1641 = vmatprep.subr.bf16.mxu0 %v5171_v53  ;;  %1682 = vmatprep.subr.bf16.mxu1 %v5173_v54 }
 0x416   :  { %1671 = vmatprep.mubr.bf16.mxu0 %v6562_v41  ;;  %1712 = vmatprep.mubr.bf16.mxu1 %v6562_v41 }
 0x418   :  { %1642 = vmatpush1.bf16.msra.mxu0 %v5181_v57  ;;  %1683 = vmatpush1.bf16.msra.mxu1 %v5183_v58 }
 0x419   :  { %1643 = vmatprep.subr.bf16.mxu0 %v5191_v61  ;;  %1684 = vmatprep.subr.bf16.mxu1 %v5193_v62 }
 0x41c   :  { %1644 = vmatpush1.bf16.msra.mxu0 %v5199_v2  ;;  %1685 = vmatpush1.bf16.msra.mxu1 %v5201_v3 }
 0x41d   :  { %1645 = vmatprep.subr.bf16.mxu0 %v5205_v6  ;;  %1686 = vmatprep.subr.bf16.mxu1 %v5207_v7 }
 0x420   :  { %1646 = vmatpush1.bf16.msra.mxu0 %v5211_v8  ;;  %1687 = vmatpush1.bf16.msra.mxu1 %v5213_v9 }
 0x421   :  { %1647 = vmatprep.subr.bf16.mxu0 %v5217_v10  ;;  %1688 = vmatprep.subr.bf16.mxu1 %v5219_v11 }
 0x424   :  { %1648 = vmatpush1.bf16.msra.mxu0 %v5223_v12  ;;  %1689 = vmatpush1.bf16.msra.mxu1 %v5225_v13 }
 0x425   :  { %1649 = vmatprep.subr.bf16.mxu0 %v5229_v14  ;;  %1690 = vmatprep.subr.bf16.mxu1 %v5231_v15 }
 0x428   :  { %1650 = vmatpush1.bf16.msra.mxu0 %v5235_v16  ;;  %1691 = vmatpush1.bf16.msra.mxu1 %v5237_v17 }
 0x429   :  { %1651 = vmatprep.subr.bf16.mxu0 %v5241_v18  ;;  %1692 = vmatprep.subr.bf16.mxu1 %v5243_v19 }
 0x42c   :  { %1652 = vmatpush1.bf16.msra.mxu0 %v5247_v20  ;;  %1693 = vmatpush1.bf16.msra.mxu1 %v5249_v21 }
 0x42d   :  { %1653 = vmatprep.subr.bf16.mxu0 %v5253_v22  ;;  %1694 = vmatprep.subr.bf16.mxu1 %v5255_v23 }
 0x430   :  { %1654 = vmatpush1.bf16.msra.mxu0 %v5259_v24  ;;  %1695 = vmatpush1.bf16.msra.mxu1 %v5261_v25 }
 0x431   :  { %1750 = vmatprep.subr.bf16.mxu0 %v5156_v48  ;;  %1791 = vmatprep.subr.bf16.mxu1 %v5158_v49 }
 0x4d3   :  { %v1562_v39 = vpop.f32.mrf.mxu0  ;;  %v1603_v36 = vpop.f32.mrf.mxu1 }
 0x4d4   :  { %v1610_v31 = vadd.f32 %v1562_v39, %v621_v45  ;;  %v1612_v34 = vadd.f32 %v1603_v36, %v662_v60 }
 0x4d5   :  { %v1564_v29 = vpop.f32.mrf.mxu0  ;;  %v1605_v30 = vpop.f32.mrf.mxu1 }
 0x4d6   :  { %v1614_v47 = vmul.f32 0.5, %v1610_v31  ;;  %v1611_v37 = vadd.f32 %v1564_v29, %v623_v26  ;;  %v1613_v63 = vadd.f32 %v1605_v30, %v664_v40 }
 0x4d7   :  { %v1566_v28 = vpop.f32.mrf.mxu0  ;;  %v1607_v33 = vpop.f32.mrf.mxu1 }
 0x4d8   :  { %4479 = vtanh.f32 %v1614_v47  ;;  %v1618_v27 = vmul.f32 0.5, %v1611_v37  ;;  %v1623_v1 = vmul.f32 0.5, %v1613_v63  ;;  %v6570_v33 = vld [vmem:[#allocation19_spill] sm:$0xff] }
 0x4d9   :  { %v1567_v43 = vpop.f32.mrf.mxu0  ;;  %v1608_v0 = vpop.f32.mrf.mxu1 }
 0x4da   :  { %4481 = vtanh.f32 %v1618_v27 }
 0x4db   :  { %4483 = vtanh.f32 %v1612_v34  ;;  %v751_v34 = vadd.f32 %v6570_v33, %v5373_v44  ;;  %v5593_v33 = vld [vmem:[#allocation8 + $0xa4] ss:$16 sps:$4 sm:$0xff]  }
 0x4dc   :  { %4485 = vtanh.f32 %v1623_v1  ;;  %v6571_v1 = vld [vmem:[#allocation21_spill] sm:$0xff] }
 0x4e5   :  { %v4480_v46 = vpop.eup %4479 }
 0x4e6   :  { %v1616_v56 = vmul.f32 0.5, %v4480_v46  ;;  %v753_v46 = vadd.f32 %v6571_v1, %v5382_v42 }
 0x4e7   :  { %v4482_v38 = vpop.eup %4481 }
 0x4e8   :  { %v1617_v45 = vadd.f32 0.5, %v1616_v56  ;;  %v1620_v39 = vmul.f32 0.5, %v4482_v38  ;;  %v4484_v35 = vpop.eup %4483 }
 0x4e9   :  { %v4486_v5 = vpop.eup %4485 }
 0x4ea   :  { %v1621_v26 = vadd.f32 0.5, %v1620_v39  ;;  %v1628_v31 = vmul.f32 %v4484_v35, %v1617_v45  ;;  %v1625_v60 = vmul.f32 0.5, %v4486_v5 }
 0x4ec   :  { %v1627_v36 = vmul.f32 %v1621_v26, %v5478_v55  ;;  %v1626_v47 = vadd.f32 0.5, %v1625_v60 }
 0x4ee   :  { %v5524_v29 = vadd.f32 %v1628_v31, %v1627_v36 }
 0x4f0   :  { %4487 = vtanh.f32 %v5524_v29 }
 0x4fd   :  { %v4488_v30 = vpop.eup %4487 }
 0x4fe   :  { %v1631_v37 = vmul.f32 %v4488_v30, %v1626_v47 }
 0x500   :  { %v1632_v28 = vpack.c.bf16 %v1631_v37, %v1631_v37 }
 0x502   :  { %1634 = vst [vmem:[#allocation4 + $0xc] sm:$0xf] %v1632_v28  ;;  %1672 = vmatmul.mubr.bf16.vlgmr.msra.gmra.mxu0 %v1632_v28  ;;  %1713 = vmatmul.mubr.bf16.vlgmr.msra.gmra.mxu1 %v1632_v28 }
 0x503   :  { %1751 = vmatpush1.bf16.msra.mxu0 %v5165_v51  ;;  %1792 = vmatpush1.bf16.msra.mxu1 %v5167_v52  ;;  %v6568_v51 = vld [vmem:[#allocation18_spill] sm:$0xff] }
 0x504   :  { %1752 = vmatprep.subr.bf16.mxu0 %v5171_v53  ;;  %1793 = vmatprep.subr.bf16.mxu1 %v5173_v54  ;;  %v710_v52 = vadd.f32 %v6568_v51, %v5362_v32 }
 0x505   :  { %1782 = vmatprep.mubr.bf16.mxu0 %v6562_v41  ;;  %1823 = vmatprep.mubr.bf16.mxu1 %v6562_v41 }
 0x507   :  { %1753 = vmatpush1.bf16.msra.mxu0 %v5181_v57  ;;  %1794 = vmatpush1.bf16.msra.mxu1 %v5183_v58  ;;  %v6569_v57 = vld [vmem:[#allocation20_spill] sm:$0xff] }
 0x508   :  { %1754 = vmatprep.subr.bf16.mxu0 %v5191_v61  ;;  %1795 = vmatprep.subr.bf16.mxu1 %v5193_v62  ;;  %v712_v58 = vadd.f32 %v6569_v57, %v5367_v50  ;;  %v5573_v57 = vld [vmem:[#allocation8 + $0xe0] ss:$16 sps:$4 sm:$0xff]  }
 0x50b   :  { %1755 = vmatpush1.bf16.msra.mxu0 %v5199_v2  ;;  %1796 = vmatpush1.bf16.msra.mxu1 %v5201_v3 }
 0x50c   :  { %1756 = vmatprep.subr.bf16.mxu0 %v5205_v6  ;;  %1797 = vmatprep.subr.bf16.mxu1 %v5207_v7 }
 0x50f   :  { %1757 = vmatpush1.bf16.msra.mxu0 %v5211_v8  ;;  %1798 = vmatpush1.bf16.msra.mxu1 %v5213_v9 }
 0x510   :  { %1758 = vmatprep.subr.bf16.mxu0 %v5217_v10  ;;  %1799 = vmatprep.subr.bf16.mxu1 %v5219_v11 }
 0x513   :  { %1759 = vmatpush1.bf16.msra.mxu0 %v5223_v12  ;;  %1800 = vmatpush1.bf16.msra.mxu1 %v5225_v13 }
 0x514   :  { %1760 = vmatprep.subr.bf16.mxu0 %v5229_v14  ;;  %1801 = vmatprep.subr.bf16.mxu1 %v5231_v15 }
 0x517   :  { %1761 = vmatpush1.bf16.msra.mxu0 %v5235_v16  ;;  %1802 = vmatpush1.bf16.msra.mxu1 %v5237_v17 }
 0x518   :  { %1762 = vmatprep.subr.bf16.mxu0 %v5241_v18  ;;  %1803 = vmatprep.subr.bf16.mxu1 %v5243_v19 }
 0x51b   :  { %1763 = vmatpush1.bf16.msra.mxu0 %v5247_v20  ;;  %1804 = vmatpush1.bf16.msra.mxu1 %v5249_v21 }
 0x51c   :  { %1764 = vmatprep.subr.bf16.mxu0 %v5253_v22  ;;  %1805 = vmatprep.subr.bf16.mxu1 %v5255_v23 }
 0x51f   :  { %1765 = vmatpush1.bf16.msra.mxu0 %v5259_v24  ;;  %1806 = vmatpush1.bf16.msra.mxu1 %v5261_v25 }
 0x520   :  { %1861 = vmatprep.subr.bf16.mxu0 %v5156_v48  ;;  %1902 = vmatprep.subr.bf16.mxu1 %v5158_v49 }
 0x5c2   :  { %v1673_v53 = vpop.f32.mrf.mxu0  ;;  %v1714_v54 = vpop.f32.mrf.mxu1 }
 0x5c3   :  { %v1721_v61 = vadd.f32 %v1673_v53, %v710_v52  ;;  %v1723_v49 = vadd.f32 %v1714_v54, %v751_v34  ;;  %v5596_v34 = vld [vmem:[#allocation8 + $0xac] ss:$16 sps:$4 sm:$0xff]  }
 0x5c4   :  { %v1675_v62 = vpop.f32.mrf.mxu0  ;;  %v1716_v55 = vpop.f32.mrf.mxu1 }
 0x5c5   :  { %v1725_v27 = vmul.f32 0.5, %v1721_v61  ;;  %v1722_v43 = vadd.f32 %v1675_v62, %v712_v58  ;;  %v1724_v56 = vadd.f32 %v1716_v55, %v753_v46  ;;  %v5576_v58 = vld [vmem:[#allocation8 + $0xe8] ss:$16 sps:$4 sm:$0xff]   ;;  %v5582_v61 = vld [vmem:[#allocation8 + $0xcc] ss:$16 sps:$4 sm:$0xff]  }
 0x5c6   :  { %v1677_v0 = vpop.f32.mrf.mxu0  ;;  %v1718_v48 = vpop.f32.mrf.mxu1  ;;  %v5587_v62 = vld [vmem:[#allocation8 + $0xc0] ss:$16 sps:$4 sm:$0xff]   ;;  %v5590_v55 = vld [vmem:[#allocation8 + $0xc8] ss:$16 sps:$4 sm:$0xff]  }
 0x5c7   :  { %4489 = vtanh.f32 %v1725_v27  ;;  %v1729_v59 = vmul.f32 0.5, %v1722_v43  ;;  %v1734_v38 = vmul.f32 0.5, %v1724_v56 }
 0x5c8   :  { %v1678_v40 = vpop.f32.mrf.mxu0  ;;  %v1719_v63 = vpop.f32.mrf.mxu1 }
 0x5c9   :  { %4491 = vtanh.f32 %v1729_v59 }
 0x5ca   :  { %4493 = vtanh.f32 %v1723_v49 }
 0x5cb   :  { %4495 = vtanh.f32 %v1734_v38 }
 0x5d4   :  { %v4490_v45 = vpop.eup %4489 }
 0x5d5   :  { %v1727_v39 = vmul.f32 0.5, %v4490_v45 }
 0x5d6   :  { %v4492_v35 = vpop.eup %4491 }
 0x5d7   :  { %v1728_v26 = vadd.f32 0.5, %v1727_v39  ;;  %v1731_v31 = vmul.f32 0.5, %v4492_v35  ;;  %v4494_v36 = vpop.eup %4493 }
 0x5d8   :  { %v4496_v37 = vpop.eup %4495 }
 0x5d9   :  { %v1732_v5 = vadd.f32 0.5, %v1731_v31  ;;  %v1739_v60 = vmul.f32 %v4494_v36, %v1728_v26  ;;  %v1736_v28 = vmul.f32 0.5, %v4496_v37  ;;  %v4622_v37 = vld [vmem:[#allocation8 + $0x8c] ss:$16 sps:$4 sm:$0xff]  }
 0x5db   :  { %v1738_v47 = vmul.f32 %v1732_v5, %v5524_v29  ;;  %v1737_v51 = vadd.f32 0.5, %v1736_v28  ;;  %v5579_v29 = vld [vmem:[#allocation8 + $0xc4] ss:$16 sps:$4 sm:$0xff]   ;;  %v4623_v28 = vld [vmem:[#allocation8 + $0x80] ss:$16 sps:$4 sm:$0xff]  }
 0x5dd   :  { %v5570_v30 = vadd.f32 %v1739_v60, %v1738_v47  ;;  %v4619_v60 = vld [vmem:[#allocation8 + $0xa0] ss:$16 sps:$4 sm:$0xff]   ;;  %v4620_v47 = vld [vmem:[#allocation8 + $0xa8] ss:$16 sps:$4 sm:$0xff]  }
 0x5df   :  { %4497 = vtanh.f32 %v5570_v30 }
 0x5ec   :  { %v4498_v52 = vpop.eup %4497 }
 0x5ed   :  { %v1742_v53 = vmul.f32 %v4498_v52, %v1737_v51  ;;  %v4624_v51 = vld [vmem:[#allocation8 + $0x88] ss:$16 sps:$4 sm:$0xff]   ;;  %v4625_v52 = vld [vmem:[#allocation8 + $0x64] ss:$16 sps:$4 sm:$0xff]  }
 0x5ef   :  { %v1743_v54 = vpack.c.bf16 %v1742_v53, %v1742_v53  ;;  %v4626_v53 = vld [vmem:[#allocation8 + $0x6c] ss:$16 sps:$4 sm:$0xff]  }
 0x5f1   :  { %1745 = vst [vmem:[#allocation4 + $0x10] sm:$0xf] %v1743_v54  ;;  %1783 = vmatmul.mubr.bf16.vlgmr.msra.gmra.mxu0 %v1743_v54  ;;  %1824 = vmatmul.mubr.bf16.vlgmr.msra.gmra.mxu1 %v1743_v54  ;;  %v4627_v54 = vld [vmem:[#allocation8 + $0x60] ss:$16 sps:$4 sm:$0xff]  }
 0x5f2   :  { %1862 = vmatpush1.bf16.msra.mxu0 %v5573_v57  ;;  %1903 = vmatpush1.bf16.msra.mxu1 %v5576_v58 }
 0x5f3   :  { %1863 = vmatprep.subr.bf16.mxu0 %v5579_v29  ;;  %1904 = vmatprep.subr.bf16.mxu1 %v5582_v61 }
 0x5f4   :  { %1893 = vmatprep.mubr.bf16.mxu0 %v6562_v41  ;;  %1934 = vmatprep.mubr.bf16.mxu1 %v6562_v41 }
 0x5f6   :  { %1864 = vmatpush1.bf16.msra.mxu0 %v5587_v62  ;;  %1905 = vmatpush1.bf16.msra.mxu1 %v5590_v55 }
 0x5f7   :  { %1865 = vmatprep.subr.bf16.mxu0 %v5593_v33  ;;  %1906 = vmatprep.subr.bf16.mxu1 %v5596_v34 }
 0x5fa   :  { %1866 = vmatpush1.bf16.msra.mxu0 %v5199_v2  ;;  %1907 = vmatpush1.bf16.msra.mxu1 %v5201_v3  ;;  %v4617_v2 = vld [vmem:[#allocation8 + $0xe4] ss:$16 sps:$4 sm:$0xff]   ;;  %v4618_v3 = vld [vmem:[#allocation8 + $0xec] ss:$16 sps:$4 sm:$0xff]  }
 0x5fb   :  { %1867 = vmatprep.subr.bf16.mxu0 %v5205_v6  ;;  %1908 = vmatprep.subr.bf16.mxu1 %v5207_v7  ;;  %v6572_v6 = vld [vmem:[#allocation22_spill] sm:$0xff] }
 0x5fc   :  { %v799_v7 = vadd.f32 %v6572_v6, %v5362_v32  ;;  %v4638_v6 = vld [vmem:[#allocation8 + $0xc] ss:$16 sps:$4 sm:$0xff]  }
 0x5fe   :  { %1868 = vmatpush1.bf16.msra.mxu0 %v5211_v8  ;;  %1909 = vmatpush1.bf16.msra.mxu1 %v5213_v9 }
 0x5ff   :  { %1869 = vmatprep.subr.bf16.mxu0 %v5217_v10  ;;  %1910 = vmatprep.subr.bf16.mxu1 %v5219_v11  ;;  %v6573_v10 = vld [vmem:[#allocation24_spill] sm:$0xff] }
 0x600   :  { %v801_v11 = vadd.f32 %v6573_v10, %v5367_v50  ;;  %v5645_v10 = vld [vmem:[#allocation10 + $0xec] ss:$16 sps:$4 sm:$0xff]  }
 0x602   :  { %1870 = vmatpush1.bf16.msra.mxu0 %v5223_v12  ;;  %1911 = vmatpush1.bf16.msra.mxu1 %v5225_v13 }
 0x603   :  { %1871 = vmatprep.subr.bf16.mxu0 %v5229_v14  ;;  %1912 = vmatprep.subr.bf16.mxu1 %v5231_v15  ;;  %v6574_v15 = vld [vmem:[#allocation23_spill] sm:$0xff] }
 0x606   :  { %1872 = vmatpush1.bf16.msra.mxu0 %v5235_v16  ;;  %1913 = vmatpush1.bf16.msra.mxu1 %v5237_v17  ;;  %v840_v16 = vadd.f32 %v6574_v15, %v5373_v44  ;;  %v6577_v15 = vld [vmem:[#allocation28_spill] sm:$0xff] }
 0x607   :  { %1873 = vmatprep.subr.bf16.mxu0 %v5241_v18  ;;  %1914 = vmatprep.subr.bf16.mxu1 %v5243_v19 }
 0x60a   :  { %1874 = vmatpush1.bf16.msra.mxu0 %v5247_v20  ;;  %1915 = vmatpush1.bf16.msra.mxu1 %v5249_v21 }
 0x60b   :  { %1875 = vmatprep.subr.bf16.mxu0 %v5253_v22  ;;  %1916 = vmatprep.subr.bf16.mxu1 %v5255_v23 }
 0x60e   :  { %1876 = vmatpush1.bf16.msra.mxu0 %v5259_v24  ;;  %1917 = vmatpush1.bf16.msra.mxu1 %v5261_v25  ;;  %v6575_v25 = vld [vmem:[#allocation25_spill] sm:$0xff] }
 0x60f   :  { %1972 = vmatprep.subr.bf16.mxu0 %v4617_v2  ;;  %2013 = vmatprep.subr.bf16.mxu1 %v4618_v3  ;;  %v842_v27 = vadd.f32 %v6575_v25, %v5382_v42  ;;  %v4636_v2 = vld [vmem:[#allocation8 + $0x28] ss:$16 sps:$4 sm:$0xff]   ;;  %v4637_v3 = vld [vmem:[#allocation8 + $0x4] ss:$16 sps:$4 sm:$0xff]  }
 0x6b1   :  { %v1784_v8 = vpop.f32.mrf.mxu0  ;;  %v1825_v9 = vpop.f32.mrf.mxu1 }
 0x6b2   :  { %v1832_v12 = vadd.f32 %v1784_v8, %v799_v7  ;;  %v1834_v21 = vadd.f32 %v1825_v9, %v840_v16  ;;  %v4639_v7 = vld [vmem:[#allocation8] ss:$16 sps:$4 sm:$0xff]   ;;  %v4640_v8 = vld [vmem:[#allocation8 + $0x8] ss:$16 sps:$4 sm:$0xff]   ;;  %v5643_v9 = vld [vmem:[#allocation10 + $0xe4] ss:$16 sps:$4 sm:$0xff]   ;;  %v890_v16 = vadd.f32 %v6577_v15, %v5367_v50 }
 0x6b3   :  { %v1786_v13 = vpop.f32.mrf.mxu0  ;;  %v1827_v14 = vpop.f32.mrf.mxu1  ;;  %v5723_v15 = vld [vmem:[#allocation10 + $0x48] ss:$16 sps:$4 sm:$0xff]  }
 0x6b4   :  { %v1836_v17 = vmul.f32 0.5, %v1832_v12  ;;  %v1833_v18 = vadd.f32 %v1786_v13, %v801_v11  ;;  %v1835_v43 = vadd.f32 %v1827_v14, %v842_v27  ;;  %v6576_v11 = vld [vmem:[#allocation26_spill] sm:$0xff] }
 0x6b5   :  { %v1788_v19 = vpop.f32.mrf.mxu0  ;;  %v1829_v20 = vpop.f32.mrf.mxu1  ;;  %v888_v12 = vadd.f32 %v6576_v11, %v5362_v32  ;;  %v5711_v11 = vld [vmem:[#allocation10 + $0x68] ss:$16 sps:$4 sm:$0xff]  }
 0x6b6   :  { %4499 = vtanh.f32 %v1836_v17  ;;  %v1840_v22 = vmul.f32 0.5, %v1833_v18  ;;  %v1845_v0 = vmul.f32 0.5, %v1835_v43  ;;  %v6578_v20 = vld [vmem:[#allocation27_spill] sm:$0xff] }
 0x6b7   :  { %v1789_v23 = vpop.f32.mrf.mxu0  ;;  %v1830_v24 = vpop.f32.mrf.mxu1 }
 0x6b8   :  { %4501 = vtanh.f32 %v1840_v22 }
 0x6b9   :  { %4503 = vtanh.f32 %v1834_v21  ;;  %v929_v21 = vadd.f32 %v6578_v20, %v5373_v44  ;;  %v5739_v20 = vld [vmem:[#allocation10 + $0x4] ss:$16 sps:$4 sm:$0xff]  }
 0x6ba   :  { %4505 = vtanh.f32 %v1845_v0 }
 0x6c3   :  { %v4500_v48 = vpop.eup %4499 }
 0x6c4   :  { %v1838_v49 = vmul.f32 0.5, %v4500_v48 }
 0x6c5   :  { %v4502_v59 = vpop.eup %4501 }
 0x6c6   :  { %v1839_v40 = vadd.f32 0.5, %v1838_v49  ;;  %v1842_v63 = vmul.f32 0.5, %v4502_v59  ;;  %v4504_v1 = vpop.eup %4503  ;;  %v6579_v49 = vld [vmem:[#allocation29_spill] sm:$0xff] }
 0x6c7   :  { %v4506_v39 = vpop.eup %4505  ;;  %v931_v59 = vadd.f32 %v6579_v49, %v5382_v42 }
 0x6c8   :  { %v1843_v46 = vadd.f32 0.5, %v1842_v63  ;;  %v1850_v56 = vmul.f32 %v4504_v1, %v1839_v40  ;;  %v1847_v35 = vmul.f32 0.5, %v4506_v39 }
 0x6ca   :  { %v1849_v38 = vmul.f32 %v1843_v46, %v5570_v30  ;;  %v1848_v26 = vadd.f32 0.5, %v1847_v35  ;;  %v4621_v30 = vld [vmem:[#allocation8 + $0x84] ss:$16 sps:$4 sm:$0xff]  }
 0x6cc   :  { %v5630_v45 = vadd.f32 %v1850_v56, %v1849_v38 }
 0x6ce   :  { %4507 = vtanh.f32 %v5630_v45 }
 0x6db   :  { %v4508_v31 = vpop.eup %4507 }
 0x6dc   :  { %v1853_v36 = vmul.f32 %v4508_v31, %v1848_v26 }
 0x6de   :  { %v1854_v5 = vpack.c.bf16 %v1853_v36, %v1853_v36 }
 0x6e0   :  { %1856 = vst [vmem:[#allocation4 + $0x14] sm:$0xf] %v1854_v5  ;;  %1894 = vmatmul.mubr.bf16.vlgmr.msra.gmra.mxu0 %v1854_v5  ;;  %1935 = vmatmul.mubr.bf16.vlgmr.msra.gmra.mxu1 %v1854_v5 }
 0x6e1   :  { %1973 = vmatpush1.bf16.msra.mxu0 %v5573_v57  ;;  %2014 = vmatpush1.bf16.msra.mxu1 %v5576_v58  ;;  %v4628_v57 = vld [vmem:[#allocation8 + $0x68] ss:$16 sps:$4 sm:$0xff]   ;;  %v4629_v58 = vld [vmem:[#allocation8 + $0x44] ss:$16 sps:$4 sm:$0xff]  }
 0x6e2   :  { %1974 = vmatprep.subr.bf16.mxu0 %v5579_v29  ;;  %2015 = vmatprep.subr.bf16.mxu1 %v5582_v61  ;;  %v4630_v29 = vld [vmem:[#allocation8 + $0x4c] ss:$16 sps:$4 sm:$0xff]   ;;  %v4631_v61 = vld [vmem:[#allocation8 + $0x40] ss:$16 sps:$4 sm:$0xff]  }
 0x6e3   :  { %2004 = vmatprep.mubr.bf16.mxu0 %v6562_v41  ;;  %2045 = vmatprep.mubr.bf16.mxu1 %v6562_v41 }
 0x6e5   :  { %1975 = vmatpush1.bf16.msra.mxu0 %v5587_v62  ;;  %2016 = vmatpush1.bf16.msra.mxu1 %v5590_v55  ;;  %v4632_v62 = vld [vmem:[#allocation8 + $0x48] ss:$16 sps:$4 sm:$0xff]   ;;  %v4633_v55 = vld [vmem:[#allocation8 + $0x24] ss:$16 sps:$4 sm:$0xff]  }
 0x6e6   :  { %1976 = vmatprep.subr.bf16.mxu0 %v5593_v33  ;;  %2017 = vmatprep.subr.bf16.mxu1 %v5596_v34  ;;  %v4634_v33 = vld [vmem:[#allocation8 + $0x2c] ss:$16 sps:$4 sm:$0xff]   ;;  %v4635_v34 = vld [vmem:[#allocation8 + $0x20] ss:$16 sps:$4 sm:$0xff]  }
 0x6e9   :  { %1977 = vmatpush1.bf16.msra.mxu0 %v4619_v60  ;;  %2018 = vmatpush1.bf16.msra.mxu1 %v4620_v47 }
 0x6ea   :  { %1978 = vmatprep.subr.bf16.mxu0 %v4621_v30  ;;  %2019 = vmatprep.subr.bf16.mxu1 %v4622_v37 }
 0x6ed   :  { %1979 = vmatpush1.bf16.msra.mxu0 %v4623_v28  ;;  %2020 = vmatpush1.bf16.msra.mxu1 %v4624_v51  ;;  %v5661_v51 = vld [vmem:[#allocation10 + $0xe0] ss:$16 sps:$4 sm:$0xff]  }
 0x6ee   :  { %1980 = vmatprep.subr.bf16.mxu0 %v4625_v52  ;;  %2021 = vmatprep.subr.bf16.mxu1 %v4626_v53  ;;  %v5663_v52 = vld [vmem:[#allocation10 + $0xe8] ss:$16 sps:$4 sm:$0xff]  }
 0x6f1   :  { %1981 = vmatpush1.bf16.msra.mxu0 %v4627_v54  ;;  %2022 = vmatpush1.bf16.msra.mxu1 %v4628_v57  ;;  %v5665_v54 = vld [vmem:[#allocation10 + $0xc4] ss:$16 sps:$4 sm:$0xff]   ;;  %v5667_v57 = vld [vmem:[#allocation10 + $0xcc] ss:$16 sps:$4 sm:$0xff]  }
 0x6f2   :  { %1982 = vmatprep.subr.bf16.mxu0 %v4629_v58  ;;  %2023 = vmatprep.subr.bf16.mxu1 %v4630_v29  ;;  %v5673_v58 = vld [vmem:[#allocation10 + $0xc8] ss:$16 sps:$4 sm:$0xff]   ;;  %v5677_v29 = vld [vmem:[#allocation10 + $0xa4] ss:$16 sps:$4 sm:$0xff]  }
 0x6f5   :  { %1983 = vmatpush1.bf16.msra.mxu0 %v4631_v61  ;;  %2024 = vmatpush1.bf16.msra.mxu1 %v4632_v62  ;;  %v5679_v61 = vld [vmem:[#allocation10 + $0xac] ss:$16 sps:$4 sm:$0xff]   ;;  %v5685_v62 = vld [vmem:[#allocation10 + $0xa0] ss:$16 sps:$4 sm:$0xff]  }
 0x6f6   :  { %1984 = vmatprep.subr.bf16.mxu0 %v4633_v55  ;;  %2025 = vmatprep.subr.bf16.mxu1 %v4634_v33  ;;  %v5687_v55 = vld [vmem:[#allocation10 + $0xa8] ss:$16 sps:$4 sm:$0xff]   ;;  %v5691_v33 = vld [vmem:[#allocation10 + $0x84] ss:$16 sps:$4 sm:$0xff]  }
 0x6f9   :  { %1985 = vmatpush1.bf16.msra.mxu0 %v4635_v34  ;;  %2026 = vmatpush1.bf16.msra.mxu1 %v4636_v2  ;;  %v5693_v34 = vld [vmem:[#allocation10 + $0x8c] ss:$16 sps:$4 sm:$0xff]   ;;  %v5697_v2 = vld [vmem:[#allocation10 + $0x80] ss:$16 sps:$4 sm:$0xff]  }
 0x6fa   :  { %1986 = vmatprep.subr.bf16.mxu0 %v4637_v3  ;;  %2027 = vmatprep.subr.bf16.mxu1 %v4638_v6  ;;  %v5699_v3 = vld [vmem:[#allocation10 + $0x88] ss:$16 sps:$4 sm:$0xff]   ;;  %v5703_v6 = vld [vmem:[#allocation10 + $0x64] ss:$16 sps:$4 sm:$0xff]  }
 0x6fd   :  { %1987 = vmatpush1.bf16.msra.mxu0 %v4639_v7  ;;  %2028 = vmatpush1.bf16.msra.mxu1 %v4640_v8  ;;  %v5705_v7 = vld [vmem:[#allocation10 + $0x6c] ss:$16 sps:$4 sm:$0xff]   ;;  %v5709_v8 = vld [vmem:[#allocation10 + $0x60] ss:$16 sps:$4 sm:$0xff]  }
 0x6fe   :  { %2335 = vmatprep.subr.bf16.mxu0 %v5643_v9  ;;  %2376 = vmatprep.subr.bf16.mxu1 %v5645_v10 }
 0x7a0   :  { %v1895_v13 = vpop.f32.mrf.mxu0  ;;  %v1936_v14 = vpop.f32.mrf.mxu1 }
 0x7a1   :  { %v1943_v17 = vadd.f32 %v1895_v13, %v888_v12  ;;  %v1945_v27 = vadd.f32 %v1936_v14, %v929_v21  ;;  %v5715_v12 = vld [vmem:[#allocation10 + $0x44] ss:$16 sps:$4 sm:$0xff]   ;;  %v5717_v13 = vld [vmem:[#allocation10 + $0x4c] ss:$16 sps:$4 sm:$0xff]   ;;  %v5721_v14 = vld [vmem:[#allocation10 + $0x40] ss:$16 sps:$4 sm:$0xff]  }
 0x7a2   :  { %v1897_v18 = vpop.f32.mrf.mxu0  ;;  %v1938_v19 = vpop.f32.mrf.mxu1  ;;  %v5741_v21 = vld [vmem:[#allocation10 + $0xc] ss:$16 sps:$4 sm:$0xff]  }
 0x7a3   :  { %v1947_v22 = vmul.f32 0.5, %v1943_v17  ;;  %v1944_v23 = vadd.f32 %v1897_v18, %v890_v16  ;;  %v1946_v40 = vadd.f32 %v1938_v19, %v931_v59  ;;  %v5727_v16 = vld [vmem:[#allocation10 + $0x24] ss:$16 sps:$4 sm:$0xff]   ;;  %v5729_v17 = vld [vmem:[#allocation10 + $0x2c] ss:$16 sps:$4 sm:$0xff]  }
 0x7a4   :  { %v1899_v24 = vpop.f32.mrf.mxu0  ;;  %v1940_v25 = vpop.f32.mrf.mxu1  ;;  %v5733_v18 = vld [vmem:[#allocation10 + $0x20] ss:$16 sps:$4 sm:$0xff]   ;;  %v5735_v19 = vld [vmem:[#allocation10 + $0x28] ss:$16 sps:$4 sm:$0xff]   ;;  %v2769_v59 = vld [vmem:[#allocation4 + $0x14] sm:$0xf] }
 0x7a5   :  { %4509 = vtanh.f32 %v1947_v22  ;;  %v1951_v43 = vmul.f32 0.5, %v1944_v23  ;;  %v1956_v63 = vmul.f32 0.5, %v1946_v40  ;;  %v5745_v22 = vld [vmem:[#allocation10] ss:$16 sps:$4 sm:$0xff]   ;;  %v5747_v23 = vld [vmem:[#allocation10 + $0x8] ss:$16 sps:$4 sm:$0xff]  }
 0x7a6   :  { %v1900_v0 = vpop.f32.mrf.mxu0  ;;  %v1941_v48 = vpop.f32.mrf.mxu1  ;;  %v2153_v24 = vld [vmem:[#allocation4] sm:$0xf]  ;;  %v2421_v25 = vld [vmem:[#allocation4 + $0x4] sm:$0xf] }
 0x7a7   :  { %4511 = vtanh.f32 %v1951_v43  ;;  %v2595_v43 = vld [vmem:[#allocation4 + $0xc] sm:$0xf]  ;;  %v2682_v0 = vld [vmem:[#allocation4 + $0x10] sm:$0xf] }
 0x7a8   :  { %4513 = vtanh.f32 %v1945_v27  ;;  %v2508_v27 = vld [vmem:[#allocation4 + $0x8] sm:$0xf] }
 0x7a9   :  { %4515 = vtanh.f32 %v1956_v63  ;;  %v6580_v48 = vld [vmem:[#allocation30_spill] sm:$0xff] }
 0x7aa   :  { %v977_v49 = vadd.f32 %v6580_v48, %v5362_v32  ;;  %v6582_v32 = vld [vmem:[#allocation31_spill] sm:$0xff] }
 0x7b2   :  { %v4510_v1 = vpop.eup %4509 }
 0x7b3   :  { %v1949_v46 = vmul.f32 0.5, %v4510_v1  ;;  %v6581_v1 = vld [vmem:[#allocation32_spill] sm:$0xff] }
 0x7b4   :  { %v4512_v56 = vpop.eup %4511 }
 0x7b5   :  { %v1950_v38 = vadd.f32 0.5, %v1949_v46  ;;  %v1953_v39 = vmul.f32 0.5, %v4512_v56  ;;  %v4514_v35 = vpop.eup %4513  ;;  %v979_v46 = vadd.f32 %v6581_v1, %v5367_v50 }
 0x7b6   :  { %v4516_v60 = vpop.eup %4515 }
 0x7b7   :  { %v1954_v26 = vadd.f32 0.5, %v1953_v39  ;;  %v1961_v31 = vmul.f32 %v4514_v35, %v1950_v38  ;;  %v1958_v47 = vmul.f32 0.5, %v4516_v60  ;;  %v1018_v35 = vadd.f32 %v6582_v32, %v5373_v44  ;;  %v6583_v44 = vld [vmem:[#allocation33_spill] sm:$0xff] }
 0x7b9   :  { %v1960_v36 = vmul.f32 %v1954_v26, %v5630_v45  ;;  %v1959_v30 = vadd.f32 0.5, %v1958_v47  ;;  %v5671_v45 = vld [vmem:[#allocation10 + $0xc0] ss:$16 sps:$4 sm:$0xff]  }
 0x7bb   :  { %v5658_v5 = vadd.f32 %v1961_v31, %v1960_v36 }
 0x7bd   :  { %4517 = vtanh.f32 %v5658_v5 }
 0x7ca   :  { %v4518_v37 = vpop.eup %4517 }
 0x7cb   :  { %v1964_v28 = vmul.f32 %v4518_v37, %v1959_v30 }
 0x7cd   :  { %v1965_v53 = vpack.c.bf16 %v1964_v28, %v1964_v28  ;;  %v1020_v28 = vadd.f32 %v6583_v44, %v5382_v42  ;;  %v6094_v44 = vld [vmem:[#allocation8 + $0x124] ss:$16 sps:$4 sm:$0xff]  }
 0x7cf   :  { %1967 = vst [vmem:[#allocation4 + $0x18] sm:$0xf] %v1965_v53  ;;  %2005 = vmatmul.mubr.bf16.vlgmr.msra.gmra.mxu0 %v1965_v53  ;;  %2046 = vmatmul.mubr.bf16.vlgmr.msra.gmra.mxu1 %v1965_v53 }
 0x7d0   :  { %2336 = vmatpush1.bf16.msra.mxu0 %v5661_v51  ;;  %2377 = vmatpush1.bf16.msra.mxu1 %v5663_v52 }
 0x7d1   :  { %2337 = vmatprep.subr.bf16.mxu0 %v5665_v54  ;;  %2378 = vmatprep.subr.bf16.mxu1 %v5667_v57 }
 0x7d2   :  { %2367 = vmatprep.mubr.bf16.mxu0 %v6562_v41  ;;  %2408 = vmatprep.mubr.bf16.mxu1 %v6562_v41 }
 0x7d4   :  { %2338 = vmatpush1.bf16.msra.mxu0 %v5671_v45  ;;  %2379 = vmatpush1.bf16.msra.mxu1 %v5673_v58 }
 0x7d5   :  { %2339 = vmatprep.subr.bf16.mxu0 %v5677_v29  ;;  %2380 = vmatprep.subr.bf16.mxu1 %v5679_v61 }
 0x7d8   :  { %2340 = vmatpush1.bf16.msra.mxu0 %v5685_v62  ;;  %2381 = vmatpush1.bf16.msra.mxu1 %v5687_v55 }
 0x7d9   :  { %2341 = vmatprep.subr.bf16.mxu0 %v5691_v33  ;;  %2382 = vmatprep.subr.bf16.mxu1 %v5693_v34 }
 0x7dc   :  { %2342 = vmatpush1.bf16.msra.mxu0 %v5697_v2  ;;  %2383 = vmatpush1.bf16.msra.mxu1 %v5699_v3 }
 0x7dd   :  { %2343 = vmatprep.subr.bf16.mxu0 %v5703_v6  ;;  %2384 = vmatprep.subr.bf16.mxu1 %v5705_v7 }
 0x7e0   :  { %2344 = vmatpush1.bf16.msra.mxu0 %v5709_v8  ;;  %2385 = vmatpush1.bf16.msra.mxu1 %v5711_v11 }
 0x7e1   :  { %2345 = vmatprep.subr.bf16.mxu0 %v5715_v12  ;;  %2386 = vmatprep.subr.bf16.mxu1 %v5717_v13 }
 0x7e4   :  { %2346 = vmatpush1.bf16.msra.mxu0 %v5721_v14  ;;  %2387 = vmatpush1.bf16.msra.mxu1 %v5723_v15 }
 0x7e5   :  { %2347 = vmatprep.subr.bf16.mxu0 %v5727_v16  ;;  %2388 = vmatprep.subr.bf16.mxu1 %v5729_v17 }
 0x7e8   :  { %2348 = vmatpush1.bf16.msra.mxu0 %v5733_v18  ;;  %2389 = vmatpush1.bf16.msra.mxu1 %v5735_v19 }
 0x7e9   :  { %2349 = vmatprep.subr.bf16.mxu0 %v5739_v20  ;;  %2390 = vmatprep.subr.bf16.mxu1 %v5741_v21 }
 0x7ec   :  { %2350 = vmatpush1.bf16.msra.mxu0 %v5745_v22  ;;  %2391 = vmatpush1.bf16.msra.mxu1 %v5747_v23 }
 0x7ed   :  { %2422 = vmatprep.subr.bf16.mxu0 %v5643_v9  ;;  %2463 = vmatprep.subr.bf16.mxu1 %v5645_v10 }
 0x7ef   :  { %2368 = vmatmul.mubr.bf16.vlgmr.msra.gmra.mxu0 %v2153_v24  ;;  %2409 = vmatmul.mubr.bf16.vlgmr.msra.gmra.mxu1 %v2153_v24 }
 0x7f0   :  { %2423 = vmatpush1.bf16.msra.mxu0 %v5661_v51  ;;  %2464 = vmatpush1.bf16.msra.mxu1 %v5663_v52 }
 0x7f1   :  { %2424 = vmatprep.subr.bf16.mxu0 %v5665_v54  ;;  %2465 = vmatprep.subr.bf16.mxu1 %v5667_v57 }
 0x7f2   :  { %2454 = vmatprep.mubr.bf16.mxu0 %v6562_v41  ;;  %2495 = vmatprep.mubr.bf16.mxu1 %v6562_v41 }
 0x7f4   :  { %2425 = vmatpush1.bf16.msra.mxu0 %v5671_v45  ;;  %2466 = vmatpush1.bf16.msra.mxu1 %v5673_v58 }
 0x7f5   :  { %2426 = vmatprep.subr.bf16.mxu0 %v5677_v29  ;;  %2467 = vmatprep.subr.bf16.mxu1 %v5679_v61 }
 0x7f8   :  { %2427 = vmatpush1.bf16.msra.mxu0 %v5685_v62  ;;  %2468 = vmatpush1.bf16.msra.mxu1 %v5687_v55 }
 0x7f9   :  { %2428 = vmatprep.subr.bf16.mxu0 %v5691_v33  ;;  %2469 = vmatprep.subr.bf16.mxu1 %v5693_v34 }
 0x7fc   :  { %2429 = vmatpush1.bf16.msra.mxu0 %v5697_v2  ;;  %2470 = vmatpush1.bf16.msra.mxu1 %v5699_v3 }
 0x7fd   :  { %2430 = vmatprep.subr.bf16.mxu0 %v5703_v6  ;;  %2471 = vmatprep.subr.bf16.mxu1 %v5705_v7 }
 0x800   :  { %2431 = vmatpush1.bf16.msra.mxu0 %v5709_v8  ;;  %2472 = vmatpush1.bf16.msra.mxu1 %v5711_v11 }
 0x801   :  { %2432 = vmatprep.subr.bf16.mxu0 %v5715_v12  ;;  %2473 = vmatprep.subr.bf16.mxu1 %v5717_v13 }
 0x804   :  { %2433 = vmatpush1.bf16.msra.mxu0 %v5721_v14  ;;  %2474 = vmatpush1.bf16.msra.mxu1 %v5723_v15 }
 0x805   :  { %2434 = vmatprep.subr.bf16.mxu0 %v5727_v16  ;;  %2475 = vmatprep.subr.bf16.mxu1 %v5729_v17 }
 0x808   :  { %2435 = vmatpush1.bf16.msra.mxu0 %v5733_v18  ;;  %2476 = vmatpush1.bf16.msra.mxu1 %v5735_v19 }
 0x809   :  { %2436 = vmatprep.subr.bf16.mxu0 %v5739_v20  ;;  %2477 = vmatprep.subr.bf16.mxu1 %v5741_v21 }
 0x80c   :  { %2437 = vmatpush1.bf16.msra.mxu0 %v5745_v22  ;;  %2478 = vmatpush1.bf16.msra.mxu1 %v5747_v23 }
 0x80d   :  { %2509 = vmatprep.subr.bf16.mxu0 %v5643_v9  ;;  %2550 = vmatprep.subr.bf16.mxu1 %v5645_v10 }
 0x80f   :  { %2455 = vmatmul.mubr.bf16.vlgmr.msra.gmra.mxu0 %v2421_v25  ;;  %2496 = vmatmul.mubr.bf16.vlgmr.msra.gmra.mxu1 %v2421_v25 }
 0x810   :  { %2510 = vmatpush1.bf16.msra.mxu0 %v5661_v51  ;;  %2551 = vmatpush1.bf16.msra.mxu1 %v5663_v52 }
 0x811   :  { %2511 = vmatprep.subr.bf16.mxu0 %v5665_v54  ;;  %2552 = vmatprep.subr.bf16.mxu1 %v5667_v57 }
 0x812   :  { %2541 = vmatprep.mubr.bf16.mxu0 %v6562_v41  ;;  %2582 = vmatprep.mubr.bf16.mxu1 %v6562_v41 }
 0x814   :  { %2512 = vmatpush1.bf16.msra.mxu0 %v5671_v45  ;;  %2553 = vmatpush1.bf16.msra.mxu1 %v5673_v58 }
 0x815   :  { %2513 = vmatprep.subr.bf16.mxu0 %v5677_v29  ;;  %2554 = vmatprep.subr.bf16.mxu1 %v5679_v61 }
 0x818   :  { %2514 = vmatpush1.bf16.msra.mxu0 %v5685_v62  ;;  %2555 = vmatpush1.bf16.msra.mxu1 %v5687_v55 }
 0x819   :  { %2515 = vmatprep.subr.bf16.mxu0 %v5691_v33  ;;  %2556 = vmatprep.subr.bf16.mxu1 %v5693_v34 }
 0x81c   :  { %2516 = vmatpush1.bf16.msra.mxu0 %v5697_v2  ;;  %2557 = vmatpush1.bf16.msra.mxu1 %v5699_v3 }
 0x81d   :  { %2517 = vmatprep.subr.bf16.mxu0 %v5703_v6  ;;  %2558 = vmatprep.subr.bf16.mxu1 %v5705_v7 }
 0x820   :  { %2518 = vmatpush1.bf16.msra.mxu0 %v5709_v8  ;;  %2559 = vmatpush1.bf16.msra.mxu1 %v5711_v11 }
 0x821   :  { %2519 = vmatprep.subr.bf16.mxu0 %v5715_v12  ;;  %2560 = vmatprep.subr.bf16.mxu1 %v5717_v13 }
 0x824   :  { %2520 = vmatpush1.bf16.msra.mxu0 %v5721_v14  ;;  %2561 = vmatpush1.bf16.msra.mxu1 %v5723_v15 }
 0x825   :  { %2521 = vmatprep.subr.bf16.mxu0 %v5727_v16  ;;  %2562 = vmatprep.subr.bf16.mxu1 %v5729_v17 }
 0x828   :  { %2522 = vmatpush1.bf16.msra.mxu0 %v5733_v18  ;;  %2563 = vmatpush1.bf16.msra.mxu1 %v5735_v19 }
 0x829   :  { %2523 = vmatprep.subr.bf16.mxu0 %v5739_v20  ;;  %2564 = vmatprep.subr.bf16.mxu1 %v5741_v21 }
 0x82c   :  { %2524 = vmatpush1.bf16.msra.mxu0 %v5745_v22  ;;  %2565 = vmatpush1.bf16.msra.mxu1 %v5747_v23 }
 0x82d   :  { %2596 = vmatprep.subr.bf16.mxu0 %v5643_v9  ;;  %2637 = vmatprep.subr.bf16.mxu1 %v5645_v10 }
 0x82f   :  { %2542 = vmatmul.mubr.bf16.vlgmr.msra.gmra.mxu0 %v2508_v27  ;;  %2583 = vmatmul.mubr.bf16.vlgmr.msra.gmra.mxu1 %v2508_v27 }
 0x830   :  { %2597 = vmatpush1.bf16.msra.mxu0 %v5661_v51  ;;  %2638 = vmatpush1.bf16.msra.mxu1 %v5663_v52 }
 0x831   :  { %2598 = vmatprep.subr.bf16.mxu0 %v5665_v54  ;;  %2639 = vmatprep.subr.bf16.mxu1 %v5667_v57 }
 0x832   :  { %2628 = vmatprep.mubr.bf16.mxu0 %v6562_v41  ;;  %2669 = vmatprep.mubr.bf16.mxu1 %v6562_v41 }
 0x834   :  { %2599 = vmatpush1.bf16.msra.mxu0 %v5671_v45  ;;  %2640 = vmatpush1.bf16.msra.mxu1 %v5673_v58 }
 0x835   :  { %2600 = vmatprep.subr.bf16.mxu0 %v5677_v29  ;;  %2641 = vmatprep.subr.bf16.mxu1 %v5679_v61 }
 0x838   :  { %2601 = vmatpush1.bf16.msra.mxu0 %v5685_v62  ;;  %2642 = vmatpush1.bf16.msra.mxu1 %v5687_v55 }
 0x839   :  { %2602 = vmatprep.subr.bf16.mxu0 %v5691_v33  ;;  %2643 = vmatprep.subr.bf16.mxu1 %v5693_v34 }
 0x83c   :  { %2603 = vmatpush1.bf16.msra.mxu0 %v5697_v2  ;;  %2644 = vmatpush1.bf16.msra.mxu1 %v5699_v3 }
 0x83d   :  { %2604 = vmatprep.subr.bf16.mxu0 %v5703_v6  ;;  %2645 = vmatprep.subr.bf16.mxu1 %v5705_v7 }
 0x840   :  { %2605 = vmatpush1.bf16.msra.mxu0 %v5709_v8  ;;  %2646 = vmatpush1.bf16.msra.mxu1 %v5711_v11 }
 0x841   :  { %2606 = vmatprep.subr.bf16.mxu0 %v5715_v12  ;;  %2647 = vmatprep.subr.bf16.mxu1 %v5717_v13 }
 0x844   :  { %2607 = vmatpush1.bf16.msra.mxu0 %v5721_v14  ;;  %2648 = vmatpush1.bf16.msra.mxu1 %v5723_v15 }
 0x845   :  { %2608 = vmatprep.subr.bf16.mxu0 %v5727_v16  ;;  %2649 = vmatprep.subr.bf16.mxu1 %v5729_v17 }
 0x848   :  { %2609 = vmatpush1.bf16.msra.mxu0 %v5733_v18  ;;  %2650 = vmatpush1.bf16.msra.mxu1 %v5735_v19 }
 0x849   :  { %2610 = vmatprep.subr.bf16.mxu0 %v5739_v20  ;;  %2651 = vmatprep.subr.bf16.mxu1 %v5741_v21 }
 0x84c   :  { %2611 = vmatpush1.bf16.msra.mxu0 %v5745_v22  ;;  %2652 = vmatpush1.bf16.msra.mxu1 %v5747_v23 }
 0x84d   :  { %2683 = vmatprep.subr.bf16.mxu0 %v5643_v9  ;;  %2724 = vmatprep.subr.bf16.mxu1 %v5645_v10 }
 0x84f   :  { %2629 = vmatmul.mubr.bf16.vlgmr.msra.gmra.mxu0 %v2595_v43  ;;  %2670 = vmatmul.mubr.bf16.vlgmr.msra.gmra.mxu1 %v2595_v43 }
 0x850   :  { %2684 = vmatpush1.bf16.msra.mxu0 %v5661_v51  ;;  %2725 = vmatpush1.bf16.msra.mxu1 %v5663_v52 }
 0x851   :  { %2685 = vmatprep.subr.bf16.mxu0 %v5665_v54  ;;  %2726 = vmatprep.subr.bf16.mxu1 %v5667_v57 }
 0x852   :  { %2715 = vmatprep.mubr.bf16.mxu0 %v6562_v41  ;;  %2756 = vmatprep.mubr.bf16.mxu1 %v6562_v41 }
 0x854   :  { %2686 = vmatpush1.bf16.msra.mxu0 %v5671_v45  ;;  %2727 = vmatpush1.bf16.msra.mxu1 %v5673_v58 }
 0x855   :  { %2687 = vmatprep.subr.bf16.mxu0 %v5677_v29  ;;  %2728 = vmatprep.subr.bf16.mxu1 %v5679_v61 }
 0x858   :  { %2688 = vmatpush1.bf16.msra.mxu0 %v5685_v62  ;;  %2729 = vmatpush1.bf16.msra.mxu1 %v5687_v55 }
 0x859   :  { %2689 = vmatprep.subr.bf16.mxu0 %v5691_v33  ;;  %2730 = vmatprep.subr.bf16.mxu1 %v5693_v34 }
 0x85c   :  { %2690 = vmatpush1.bf16.msra.mxu0 %v5697_v2  ;;  %2731 = vmatpush1.bf16.msra.mxu1 %v5699_v3 }
 0x85d   :  { %2691 = vmatprep.subr.bf16.mxu0 %v5703_v6  ;;  %2732 = vmatprep.subr.bf16.mxu1 %v5705_v7 }
 0x860   :  { %2692 = vmatpush1.bf16.msra.mxu0 %v5709_v8  ;;  %2733 = vmatpush1.bf16.msra.mxu1 %v5711_v11 }
 0x861   :  { %2693 = vmatprep.subr.bf16.mxu0 %v5715_v12  ;;  %2734 = vmatprep.subr.bf16.mxu1 %v5717_v13 }
 0x864   :  { %2694 = vmatpush1.bf16.msra.mxu0 %v5721_v14  ;;  %2735 = vmatpush1.bf16.msra.mxu1 %v5723_v15 }
 0x865   :  { %2695 = vmatprep.subr.bf16.mxu0 %v5727_v16  ;;  %2736 = vmatprep.subr.bf16.mxu1 %v5729_v17 }
 0x868   :  { %2696 = vmatpush1.bf16.msra.mxu0 %v5733_v18  ;;  %2737 = vmatpush1.bf16.msra.mxu1 %v5735_v19 }
 0x869   :  { %2697 = vmatprep.subr.bf16.mxu0 %v5739_v20  ;;  %2738 = vmatprep.subr.bf16.mxu1 %v5741_v21 }
 0x86c   :  { %2698 = vmatpush1.bf16.msra.mxu0 %v5745_v22  ;;  %2739 = vmatpush1.bf16.msra.mxu1 %v5747_v23 }
 0x86d   :  { %2770 = vmatprep.subr.bf16.mxu0 %v5643_v9  ;;  %2811 = vmatprep.subr.bf16.mxu1 %v5645_v10 }
 0x86f   :  { %2716 = vmatmul.mubr.bf16.vlgmr.msra.gmra.mxu0 %v2682_v0  ;;  %2757 = vmatmul.mubr.bf16.vlgmr.msra.gmra.mxu1 %v2682_v0 }
 0x870   :  { %2771 = vmatpush1.bf16.msra.mxu0 %v5661_v51  ;;  %2812 = vmatpush1.bf16.msra.mxu1 %v5663_v52 }
 0x871   :  { %2772 = vmatprep.subr.bf16.mxu0 %v5665_v54  ;;  %2813 = vmatprep.subr.bf16.mxu1 %v5667_v57 }
 0x872   :  { %2802 = vmatprep.mubr.bf16.mxu0 %v6562_v41  ;;  %2843 = vmatprep.mubr.bf16.mxu1 %v6562_v41 }
 0x874   :  { %2773 = vmatpush1.bf16.msra.mxu0 %v5671_v45  ;;  %2814 = vmatpush1.bf16.msra.mxu1 %v5673_v58 }
 0x875   :  { %2774 = vmatprep.subr.bf16.mxu0 %v5677_v29  ;;  %2815 = vmatprep.subr.bf16.mxu1 %v5679_v61 }
 0x878   :  { %2775 = vmatpush1.bf16.msra.mxu0 %v5685_v62  ;;  %2816 = vmatpush1.bf16.msra.mxu1 %v5687_v55 }
 0x879   :  { %2776 = vmatprep.subr.bf16.mxu0 %v5691_v33  ;;  %2817 = vmatprep.subr.bf16.mxu1 %v5693_v34 }
 0x87c   :  { %2777 = vmatpush1.bf16.msra.mxu0 %v5697_v2  ;;  %2818 = vmatpush1.bf16.msra.mxu1 %v5699_v3 }
 0x87d   :  { %2778 = vmatprep.subr.bf16.mxu0 %v5703_v6  ;;  %2819 = vmatprep.subr.bf16.mxu1 %v5705_v7 }
 0x880   :  { %2779 = vmatpush1.bf16.msra.mxu0 %v5709_v8  ;;  %2820 = vmatpush1.bf16.msra.mxu1 %v5711_v11 }
 0x881   :  { %2780 = vmatprep.subr.bf16.mxu0 %v5715_v12  ;;  %2821 = vmatprep.subr.bf16.mxu1 %v5717_v13 }
 0x884   :  { %2781 = vmatpush1.bf16.msra.mxu0 %v5721_v14  ;;  %2822 = vmatpush1.bf16.msra.mxu1 %v5723_v15 }
 0x885   :  { %2782 = vmatprep.subr.bf16.mxu0 %v5727_v16  ;;  %2823 = vmatprep.subr.bf16.mxu1 %v5729_v17 }
 0x888   :  { %2783 = vmatpush1.bf16.msra.mxu0 %v5733_v18  ;;  %2824 = vmatpush1.bf16.msra.mxu1 %v5735_v19 }
 0x889   :  { %2784 = vmatprep.subr.bf16.mxu0 %v5739_v20  ;;  %2825 = vmatprep.subr.bf16.mxu1 %v5741_v21 }
 0x88c   :  { %2785 = vmatpush1.bf16.msra.mxu0 %v5745_v22  ;;  %2826 = vmatpush1.bf16.msra.mxu1 %v5747_v23 }
 0x88d   :  { %2857 = vmatprep.subr.bf16.mxu0 %v5643_v9  ;;  %2898 = vmatprep.subr.bf16.mxu1 %v5645_v10 }
 0x88f   :  { %2803 = vmatmul.mubr.bf16.vlgmr.msra.gmra.mxu0 %v2769_v59  ;;  %2844 = vmatmul.mubr.bf16.vlgmr.msra.gmra.mxu1 %v2769_v59  ;;  %v2006_v40 = vpop.f32.mrf.mxu0  ;;  %v2047_v63 = vpop.f32.mrf.mxu1 }
 0x890   :  { %v2054_v56 = vadd.f32 %v2006_v40, %v977_v49  ;;  %2858 = vmatpush1.bf16.msra.mxu0 %v5661_v51  ;;  %2899 = vmatpush1.bf16.msra.mxu1 %v5663_v52  ;;  %v2056_v60 = vadd.f32 %v2047_v63, %v1018_v35 }
 0x891   :  { %v2008_v38 = vpop.f32.mrf.mxu0  ;;  %v2049_v39 = vpop.f32.mrf.mxu1  ;;  %2859 = vmatprep.subr.bf16.mxu0 %v5665_v54  ;;  %2900 = vmatprep.subr.bf16.mxu1 %v5667_v57 }
 0x892   :  { %v2058_v26 = vmul.f32 0.5, %v2054_v56  ;;  %v2055_v31 = vadd.f32 %v2008_v38, %v979_v46  ;;  %2889 = vmatprep.mubr.bf16.mxu0 %v6562_v41  ;;  %2930 = vmatprep.mubr.bf16.mxu1 %v6562_v41  ;;  %v2057_v53 = vadd.f32 %v2049_v39, %v1020_v28  ;;  %v6096_v28 = vld [vmem:[#allocation8 + $0x12c] ss:$16 sps:$4 sm:$0xff]  }
 0x893   :  { %v2010_v50 = vpop.f32.mrf.mxu0  ;;  %v2051_v36 = vpop.f32.mrf.mxu1 }
 0x894   :  { %4519 = vtanh.f32 %v2058_v26  ;;  %v2062_v47 = vmul.f32 0.5, %v2055_v31  ;;  %2860 = vmatpush1.bf16.msra.mxu0 %v5671_v45  ;;  %2901 = vmatpush1.bf16.msra.mxu1 %v5673_v58  ;;  %v2067_v24 = vmul.f32 0.5, %v2057_v53  ;;  %v6070_v26 = vld [vmem:[#allocation8 + $0x164] ss:$16 sps:$4 sm:$0xff]   ;;  %v6072_v31 = vld [vmem:[#allocation8 + $0x16c] ss:$16 sps:$4 sm:$0xff]  }
 0x895   :  { %v2011_v30 = vpop.f32.mrf.mxu0  ;;  %v2052_v37 = vpop.f32.mrf.mxu1  ;;  %2861 = vmatprep.subr.bf16.mxu0 %v5677_v29  ;;  %2902 = vmatprep.subr.bf16.mxu1 %v5679_v61  ;;  %v6076_v50 = vld [vmem:[#allocation8 + $0x160] ss:$16 sps:$4 sm:$0xff]   ;;  %v6078_v36 = vld [vmem:[#allocation8 + $0x168] ss:$16 sps:$4 sm:$0xff]  }
 0x896   :  { %4521 = vtanh.f32 %v2062_v47  ;;  %v6084_v47 = vld [vmem:[#allocation8 + $0x14c] ss:$16 sps:$4 sm:$0xff]   ;;  %v6088_v30 = vld [vmem:[#allocation8 + $0x140] ss:$16 sps:$4 sm:$0xff]   ;;  %v6090_v37 = vld [vmem:[#allocation8 + $0x148] ss:$16 sps:$4 sm:$0xff]  }
 0x897   :  { %4523 = vtanh.f32 %v2056_v60  ;;  %v6082_v60 = vld [vmem:[#allocation8 + $0x144] ss:$16 sps:$4 sm:$0xff]   ;;  %v6100_v53 = vld [vmem:[#allocation8 + $0x120] ss:$16 sps:$4 sm:$0xff]  }
 0x898   :  { %2862 = vmatpush1.bf16.msra.mxu0 %v5685_v62  ;;  %2903 = vmatpush1.bf16.msra.mxu1 %v5687_v55  ;;  %4525 = vtanh.f32 %v2067_v24  ;;  %v6102_v24 = vld [vmem:[#allocation8 + $0x128] ss:$16 sps:$4 sm:$0xff]  }
 0x899   :  { %2863 = vmatprep.subr.bf16.mxu0 %v5691_v33  ;;  %2904 = vmatprep.subr.bf16.mxu1 %v5693_v34 }
 0x89c   :  { %2864 = vmatpush1.bf16.msra.mxu0 %v5697_v2  ;;  %2905 = vmatpush1.bf16.msra.mxu1 %v5699_v3 }
 0x89d   :  { %2865 = vmatprep.subr.bf16.mxu0 %v5703_v6  ;;  %2906 = vmatprep.subr.bf16.mxu1 %v5705_v7 }
 0x8a0   :  { %2866 = vmatpush1.bf16.msra.mxu0 %v5709_v8  ;;  %2907 = vmatpush1.bf16.msra.mxu1 %v5711_v11 }
 0x8a1   :  { %v4520_v25 = vpop.eup %4519  ;;  %2867 = vmatprep.subr.bf16.mxu0 %v5715_v12  ;;  %2908 = vmatprep.subr.bf16.mxu1 %v5717_v13 }
 0x8a2   :  { %v2060_v42 = vmul.f32 0.5, %v4520_v25  ;;  %v6106_v25 = vld [vmem:[#allocation8 + $0x104] ss:$16 sps:$4 sm:$0xff]  }
 0x8a3   :  { %v4522_v27 = vpop.eup %4521 }
 0x8a4   :  { %v2061_v43 = vadd.f32 0.5, %v2060_v42  ;;  %v2064_v0 = vmul.f32 0.5, %v4522_v27  ;;  %2868 = vmatpush1.bf16.msra.mxu0 %v5721_v14  ;;  %2909 = vmatpush1.bf16.msra.mxu1 %v5723_v15  ;;  %v4524_v48 = vpop.eup %4523  ;;  %v6108_v42 = vld [vmem:[#allocation8 + $0x10c] ss:$16 sps:$4 sm:$0xff]   ;;  %v6112_v27 = vld [vmem:[#allocation8 + $0x100] ss:$16 sps:$4 sm:$0xff]  }
 0x8a5   :  { %2869 = vmatprep.subr.bf16.mxu0 %v5727_v16  ;;  %2910 = vmatprep.subr.bf16.mxu1 %v5729_v17  ;;  %v4526_v56 = vpop.eup %4525 }
 0x8a6   :  { %v2065_v49 = vadd.f32 0.5, %v2064_v0  ;;  %v2072_v59 = vmul.f32 %v4524_v48, %v2061_v43  ;;  %v2069_v32 = vmul.f32 0.5, %v4526_v56  ;;  %v6114_v43 = vld [vmem:[#allocation8 + $0x108] ss:$16 sps:$4 sm:$0xff]  }
 0x8a8   :  { %v2071_v40 = vmul.f32 %v2065_v49, %v5658_v5  ;;  %2870 = vmatpush1.bf16.msra.mxu0 %v5733_v18  ;;  %2911 = vmatpush1.bf16.msra.mxu1 %v5735_v19  ;;  %v2856_v5 = vld [vmem:[#allocation4 + $0x18] sm:$0xf]  ;;  %v6585_v49 = vmov 0.0|0.0  }
 0x8a9   :  { %2871 = vmatprep.subr.bf16.mxu0 %v5739_v20  ;;  %2912 = vmatprep.subr.bf16.mxu1 %v5741_v21 }
 0x8aa   :  { %v2073_v63 = vadd.f32 %v2072_v59, %v2071_v40 }
 0x8ac   :  { %4527 = vtanh.f32 %v2073_v63  ;;  %2083 = vst [vmem:[%s6532_s7] sm:$0xff] %v2073_v63  ;;  %2872 = vmatpush1.bf16.msra.mxu0 %v5745_v22  ;;  %2913 = vmatpush1.bf16.msra.mxu1 %v5747_v23 }
 0x8ad   :  { %2944 = vmatprep.subr.bf16.mxu0 %v5643_v9  ;;  %2985 = vmatprep.subr.bf16.mxu1 %v5645_v10 }
 0x8af   :  { %v5971_v1 = vpop.f32.mrf.mxu0  ;;  %v5973_v46 = vpop.f32.mrf.mxu1  ;;  %2890 = vmatmul.mubr.bf16.vlgmr.msra.gmra.mxu0 %v2856_v5  ;;  %2931 = vmatmul.mubr.bf16.vlgmr.msra.gmra.mxu1 %v2856_v5 }
 0x8b0   :  { %2945 = vmatpush1.bf16.msra.mxu0 %v5661_v51  ;;  %2986 = vmatpush1.bf16.msra.mxu1 %v5663_v52 }
 0x8b1   :  { %v5977_v38 = vpop.f32.mrf.mxu0  ;;  %v5979_v39 = vpop.f32.mrf.mxu1  ;;  %2946 = vmatprep.subr.bf16.mxu0 %v5665_v54  ;;  %2987 = vmatprep.subr.bf16.mxu1 %v5667_v57  ;;  %v2070_v54 = vadd.f32 0.5, %v2069_v32 }
 0x8b2   :  { %2976 = vmatprep.mubr.bf16.mxu0 %v6562_v41  ;;  %3017 = vmatprep.mubr.bf16.mxu1 %v6562_v41 }
 0x8b3   :  { %v2373_v9 = vpop.f32.mrf.mxu0  ;;  %v2414_v10 = vpop.f32.mrf.mxu1 }
 0x8b4   :  { %2947 = vmatpush1.bf16.msra.mxu0 %v5671_v45  ;;  %2988 = vmatpush1.bf16.msra.mxu1 %v5673_v58  ;;  %v6012_v58 = vld [vmem:[#allocation8 + $0x1e4] ss:$16 sps:$4 sm:$0xff]  }
 0x8b5   :  { %v2374_v51 = vpop.f32.mrf.mxu0  ;;  %v2415_v52 = vpop.f32.mrf.mxu1  ;;  %2948 = vmatprep.subr.bf16.mxu0 %v5677_v29  ;;  %2989 = vmatprep.subr.bf16.mxu1 %v5679_v61  ;;  %v6014_v29 = vld [vmem:[#allocation8 + $0x1ec] ss:$16 sps:$4 sm:$0xff]   ;;  %v6018_v61 = vld [vmem:[#allocation8 + $0x1e0] ss:$16 sps:$4 sm:$0xff]  }
 0x8b8   :  { %2949 = vmatpush1.bf16.msra.mxu0 %v5685_v62  ;;  %2990 = vmatpush1.bf16.msra.mxu1 %v5687_v55  ;;  %v6020_v62 = vld [vmem:[#allocation8 + $0x1e8] ss:$16 sps:$4 sm:$0xff]   ;;  %v6024_v55 = vld [vmem:[#allocation8 + $0x1c4] ss:$16 sps:$4 sm:$0xff]  }
 0x8b9   :  { %v4528_v57 = vpop.eup %4527  ;;  %2950 = vmatprep.subr.bf16.mxu0 %v5691_v33  ;;  %2991 = vmatprep.subr.bf16.mxu1 %v5693_v34  ;;  %v6026_v33 = vld [vmem:[#allocation8 + $0x1cc] ss:$16 sps:$4 sm:$0xff]  }
 0x8ba   :  { %v2075_v35 = vmul.f32 %v4528_v57, %v2070_v54 }
 0x8bc   :  { %v2076_v45 = vpack.c.bf16 %v2075_v35, %v2075_v35  ;;  %2082 = vst [vmem:[%s6531_s6] sm:$0xff] %v2075_v35  ;;  %2951 = vmatpush1.bf16.msra.mxu0 %v5697_v2  ;;  %2992 = vmatpush1.bf16.msra.mxu1 %v5699_v3 }
 0x8bd   :  { %2952 = vmatprep.subr.bf16.mxu0 %v5703_v6  ;;  %2993 = vmatprep.subr.bf16.mxu1 %v5705_v7  ;;  %v6034_v6 = vld [vmem:[#allocation8 + $0x1c0] ss:$16 sps:$4 sm:$0xff]   ;;  %v6036_v7 = vld [vmem:[#allocation8 + $0x1c8] ss:$16 sps:$4 sm:$0xff]  }
 0x8be   :  { %2078 = vst [vmem:[#allocation4 + $0x1c] sm:$0xf] %v2076_v45 }
 0x8c0   :  { %2953 = vmatpush1.bf16.msra.mxu0 %v5709_v8  ;;  %2994 = vmatpush1.bf16.msra.mxu1 %v5711_v11 }
 0x8c1   :  { %2954 = vmatprep.subr.bf16.mxu0 %v5715_v12  ;;  %2995 = vmatprep.subr.bf16.mxu1 %v5717_v13  ;;  %v6044_v12 = vld [vmem:[#allocation8 + $0x1a4] ss:$16 sps:$4 sm:$0xff]   ;;  %v6046_v13 = vld [vmem:[#allocation8 + $0x1ac] ss:$16 sps:$4 sm:$0xff]  }
 0x8c4   :  { %2955 = vmatpush1.bf16.msra.mxu0 %v5721_v14  ;;  %2996 = vmatpush1.bf16.msra.mxu1 %v5723_v15 }
 0x8c5   :  { %2956 = vmatprep.subr.bf16.mxu0 %v5727_v16  ;;  %2997 = vmatprep.subr.bf16.mxu1 %v5729_v17  ;;  %v2943_v34 = vld [vmem:[#allocation4 + $0x1c] sm:$0xf]  ;;  %v6052_v16 = vld [vmem:[#allocation8 + $0x1a0] ss:$16 sps:$4 sm:$0xff]   ;;  %v6054_v17 = vld [vmem:[#allocation8 + $0x1a8] ss:$16 sps:$4 sm:$0xff]  }
 0x8c8   :  { %2957 = vmatpush1.bf16.msra.mxu0 %v5733_v18  ;;  %2998 = vmatpush1.bf16.msra.mxu1 %v5735_v19 }
 0x8c9   :  { %2958 = vmatprep.subr.bf16.mxu0 %v5739_v20  ;;  %2999 = vmatprep.subr.bf16.mxu1 %v5741_v21  ;;  %v6058_v20 = vld [vmem:[#allocation8 + $0x184] ss:$16 sps:$4 sm:$0xff]   ;;  %v6060_v21 = vld [vmem:[#allocation8 + $0x18c] ss:$16 sps:$4 sm:$0xff]  }
 0x8cc   :  { %2959 = vmatpush1.bf16.msra.mxu0 %v5745_v22  ;;  %3000 = vmatpush1.bf16.msra.mxu1 %v5747_v23  ;;  %v6064_v22 = vld [vmem:[#allocation8 + $0x180] ss:$16 sps:$4 sm:$0xff]   ;;  %v6066_v23 = vld [vmem:[#allocation8 + $0x188] ss:$16 sps:$4 sm:$0xff]  }
 0x8cd   :  { %3199 = vmatprep.subr.bf16.mxu0 %v6012_v58  ;;  %3240 = vmatprep.subr.bf16.mxu1 %v6014_v29 }
 0x8cf   :  { %v6028_v2 = vpop.f32.mrf.mxu0  ;;  %v6030_v3 = vpop.f32.mrf.mxu1  ;;  %2977 = vmatmul.mubr.bf16.vlgmr.msra.gmra.mxu0 %v2943_v34  ;;  %3018 = vmatmul.mubr.bf16.vlgmr.msra.gmra.mxu1 %v2943_v34 }
 0x8d0   :  { %3200 = vmatpush1.bf16.msra.mxu0 %v6018_v61  ;;  %3241 = vmatpush1.bf16.msra.mxu1 %v6020_v62 }
 0x8d1   :  { %v6038_v8 = vpop.f32.mrf.mxu0  ;;  %v6040_v11 = vpop.f32.mrf.mxu1  ;;  %3201 = vmatprep.subr.bf16.mxu0 %v6024_v55  ;;  %3242 = vmatprep.subr.bf16.mxu1 %v6026_v33 }
 0x8d2   :  { %3231 = vmatprep.mubr.bf16.mxu0 %v6562_v41  ;;  %3272 = vmatprep.mubr.bf16.mxu1 %v6562_v41 }
 0x8d3   :  { %v2460_v14 = vpop.f32.mrf.mxu0  ;;  %v2501_v15 = vpop.f32.mrf.mxu1 }
 0x8d4   :  { %3202 = vmatpush1.bf16.msra.mxu0 %v6034_v6  ;;  %3243 = vmatpush1.bf16.msra.mxu1 %v6036_v7 }
 0x8d5   :  { %v2461_v18 = vpop.f32.mrf.mxu0  ;;  %v2502_v19 = vpop.f32.mrf.mxu1  ;;  %3203 = vmatprep.subr.bf16.mxu0 %v6044_v12  ;;  %3244 = vmatprep.subr.bf16.mxu1 %v6046_v13 }
 0x8d8   :  { %3204 = vmatpush1.bf16.msra.mxu0 %v6052_v16  ;;  %3245 = vmatpush1.bf16.msra.mxu1 %v6054_v17 }
 0x8d9   :  { %3205 = vmatprep.subr.bf16.mxu0 %v6058_v20  ;;  %3246 = vmatprep.subr.bf16.mxu1 %v6060_v21 }
 0x8dc   :  { %3206 = vmatpush1.bf16.msra.mxu0 %v6064_v22  ;;  %3247 = vmatpush1.bf16.msra.mxu1 %v6066_v23 }
 0x8dd   :  { %3207 = vmatprep.subr.bf16.mxu0 %v6070_v26  ;;  %3248 = vmatprep.subr.bf16.mxu1 %v6072_v31 }
 0x8e0   :  { %3208 = vmatpush1.bf16.msra.mxu0 %v6076_v50  ;;  %3249 = vmatpush1.bf16.msra.mxu1 %v6078_v36 }
 0x8e1   :  { %3209 = vmatprep.subr.bf16.mxu0 %v6082_v60  ;;  %3250 = vmatprep.subr.bf16.mxu1 %v6084_v47 }
 0x8e4   :  { %3210 = vmatpush1.bf16.msra.mxu0 %v6088_v30  ;;  %3251 = vmatpush1.bf16.msra.mxu1 %v6090_v37 }
 0x8e5   :  { %3211 = vmatprep.subr.bf16.mxu0 %v6094_v44  ;;  %3252 = vmatprep.subr.bf16.mxu1 %v6096_v28 }
 0x8e8   :  { %3212 = vmatpush1.bf16.msra.mxu0 %v6100_v53  ;;  %3253 = vmatpush1.bf16.msra.mxu1 %v6102_v24 }
 0x8e9   :  { %3213 = vmatprep.subr.bf16.mxu0 %v6106_v25  ;;  %3254 = vmatprep.subr.bf16.mxu1 %v6108_v42 }
 0x8ec   :  { %3214 = vmatpush1.bf16.msra.mxu0 %v6112_v27  ;;  %3255 = vmatpush1.bf16.msra.mxu1 %v6114_v43 }
 0x8ed   :  { %3309 = vmatprep.subr.bf16.mxu0 %v6012_v58  ;;  %3350 = vmatprep.subr.bf16.mxu1 %v6014_v29 }
 0x8ef   :  { %v6122_v0 = vpop.f32.mrf.mxu0  ;;  %v6124_v48 = vpop.f32.mrf.mxu1  ;;  %3232 = vmatmul.mubr.bf16.vlgmr.msra.gmra.mxu0 %v6585_v49  ;;  %3273 = vmatmul.mubr.bf16.vlgmr.msra.gmra.mxu1 %v6585_v49 }
 0x8f0   :  { %6584 = vst [vmem:[#allocation13_spill] sm:$0xff] %v6124_v48  ;;  %3310 = vmatpush1.bf16.msra.mxu0 %v6018_v61  ;;  %3351 = vmatpush1.bf16.msra.mxu1 %v6020_v62  ;;  %v6611_v48 = vsub.s32 3, %v5353_v4 }
 0x8f1   :  { %v6130_v59 = vpop.f32.mrf.mxu0  ;;  %v6132_v40 = vpop.f32.mrf.mxu1  ;;  %3311 = vmatprep.subr.bf16.mxu0 %v6024_v55  ;;  %3352 = vmatprep.subr.bf16.mxu1 %v6026_v33 }
 0x8f2   :  { %6586 = vst [vmem:[#allocation14_spill] sm:$0xff] %v6130_v59  ;;  %6587 = vst [vmem:[#allocation16_spill] sm:$0xff] %v6132_v40  ;;  %3341 = vmatprep.mubr.bf16.mxu0 %v6562_v41  ;;  %3382 = vmatprep.mubr.bf16.mxu1 %v6562_v41 }
 0x8f3   :  { %v2547_v63 = vpop.f32.mrf.mxu0  ;;  %v2588_v5 = vpop.f32.mrf.mxu1 }
 0x8f4   :  { %3312 = vmatpush1.bf16.msra.mxu0 %v6034_v6  ;;  %3353 = vmatpush1.bf16.msra.mxu1 %v6036_v7 }
 0x8f5   :  { %v2548_v56 = vpop.f32.mrf.mxu0  ;;  %v2589_v9 = vpop.f32.mrf.mxu1  ;;  %3313 = vmatprep.subr.bf16.mxu0 %v6044_v12  ;;  %3354 = vmatprep.subr.bf16.mxu1 %v6046_v13 }
 0x8f8   :  { %3314 = vmatpush1.bf16.msra.mxu0 %v6052_v16  ;;  %3355 = vmatpush1.bf16.msra.mxu1 %v6054_v17 }
 0x8f9   :  { %3315 = vmatprep.subr.bf16.mxu0 %v6058_v20  ;;  %3356 = vmatprep.subr.bf16.mxu1 %v6060_v21 }
 0x8fc   :  { %3316 = vmatpush1.bf16.msra.mxu0 %v6064_v22  ;;  %3357 = vmatpush1.bf16.msra.mxu1 %v6066_v23 }
 0x8fd   :  { %3317 = vmatprep.subr.bf16.mxu0 %v6070_v26  ;;  %3358 = vmatprep.subr.bf16.mxu1 %v6072_v31 }
 0x900   :  { %3318 = vmatpush1.bf16.msra.mxu0 %v6076_v50  ;;  %3359 = vmatpush1.bf16.msra.mxu1 %v6078_v36 }
 0x901   :  { %3319 = vmatprep.subr.bf16.mxu0 %v6082_v60  ;;  %3360 = vmatprep.subr.bf16.mxu1 %v6084_v47 }
 0x904   :  { %3320 = vmatpush1.bf16.msra.mxu0 %v6088_v30  ;;  %3361 = vmatpush1.bf16.msra.mxu1 %v6090_v37 }
 0x905   :  { %3321 = vmatprep.subr.bf16.mxu0 %v6094_v44  ;;  %3362 = vmatprep.subr.bf16.mxu1 %v6096_v28 }
 0x908   :  { %3322 = vmatpush1.bf16.msra.mxu0 %v6100_v53  ;;  %3363 = vmatpush1.bf16.msra.mxu1 %v6102_v24 }
 0x909   :  { %3323 = vmatprep.subr.bf16.mxu0 %v6106_v25  ;;  %3364 = vmatprep.subr.bf16.mxu1 %v6108_v42 }
 0x90c   :  { %3324 = vmatpush1.bf16.msra.mxu0 %v6112_v27  ;;  %3365 = vmatpush1.bf16.msra.mxu1 %v6114_v43 }
 0x90d   :  { %3420 = vmatprep.subr.bf16.mxu0 %v6012_v58  ;;  %3461 = vmatprep.subr.bf16.mxu1 %v6014_v29 }
 0x90f   :  { %v6166_v10 = vpop.f32.mrf.mxu0  ;;  %v6168_v32 = vpop.f32.mrf.mxu1 }
 0x910   :  { %6588 = vst [vmem:[#allocation15_spill] sm:$0xff] %v6166_v10  ;;  %6589 = vst [vmem:[#allocation17_spill] sm:$0xff] %v6168_v32 }
 0x911   :  { %v6170_v51 = vpop.f32.mrf.mxu0  ;;  %v6172_v52 = vpop.f32.mrf.mxu1 }
 0x912   :  { %6590 = vst [vmem:[#allocation18_spill] sm:$0xff] %v6170_v51  ;;  %6591 = vst [vmem:[#allocation20_spill] sm:$0xff] %v6172_v52 }
 0x913   :  { %v2634_v54 = vpop.f32.mrf.mxu0  ;;  %v2675_v57 = vpop.f32.mrf.mxu1 }
 0x915   :  { %v2635_v35 = vpop.f32.mrf.mxu0  ;;  %v2676_v45 = vpop.f32.mrf.mxu1 }
 0x92f   :  { %v6174_v34 = vpop.f32.mrf.mxu0  ;;  %v6176_v14 = vpop.f32.mrf.mxu1 }
 0x930   :  { %6592 = vst [vmem:[#allocation19_spill] sm:$0xff] %v6174_v34  ;;  %6593 = vst [vmem:[#allocation21_spill] sm:$0xff] %v6176_v14 }
 0x931   :  { %v6178_v15 = vpop.f32.mrf.mxu0  ;;  %v6180_v18 = vpop.f32.mrf.mxu1 }
 0x932   :  { %6594 = vst [vmem:[#allocation22_spill] sm:$0xff] %v6178_v15  ;;  %6595 = vst [vmem:[#allocation24_spill] sm:$0xff] %v6180_v18 }
 0x933   :  { %v2721_v19 = vpop.f32.mrf.mxu0  ;;  %v2762_v49 = vpop.f32.mrf.mxu1 }
 0x935   :  { %v2722_v63 = vpop.f32.mrf.mxu0  ;;  %v2763_v5 = vpop.f32.mrf.mxu1 }
 0x94f   :  { %v6182_v56 = vpop.f32.mrf.mxu0  ;;  %v6184_v9 = vpop.f32.mrf.mxu1 }
 0x950   :  { %6596 = vst [vmem:[#allocation23_spill] sm:$0xff] %v6182_v56  ;;  %6597 = vst [vmem:[#allocation25_spill] sm:$0xff] %v6184_v9 }
 0x951   :  { %v6186_v54 = vpop.f32.mrf.mxu0  ;;  %v6188_v57 = vpop.f32.mrf.mxu1 }
 0x952   :  { %6598 = vst [vmem:[#allocation26_spill] sm:$0xff] %v6186_v54  ;;  %6599 = vst [vmem:[#allocation28_spill] sm:$0xff] %v6188_v57 }
 0x953   :  { %v2808_v35 = vpop.f32.mrf.mxu0  ;;  %v2849_v45 = vpop.f32.mrf.mxu1 }
 0x955   :  { %v2809_v34 = vpop.f32.mrf.mxu0  ;;  %v2850_v14 = vpop.f32.mrf.mxu1 }
 0x96f   :  { %v6190_v52 = vpop.f32.mrf.mxu0  ;;  %v6192_v15 = vpop.f32.mrf.mxu1 }
 0x970   :  { %6600 = vst [vmem:[#allocation27_spill] sm:$0xff] %v6190_v52  ;;  %6601 = vst [vmem:[#allocation29_spill] sm:$0xff] %v6192_v15 }
 0x971   :  { %v6194_v19 = vpop.f32.mrf.mxu0  ;;  %v6196_v49 = vpop.f32.mrf.mxu1 }
 0x972   :  { %6602 = vst [vmem:[#allocation30_spill] sm:$0xff] %v6194_v19  ;;  %6603 = vst [vmem:[#allocation32_spill] sm:$0xff] %v6196_v49  ;;  %v4176_v49 = vld [vmem:[%s6528_s3 + $0x4] sm:$0xf] }
 0x973   :  { %v2895_v63 = vpop.f32.mrf.mxu0  ;;  %v2936_v5 = vpop.f32.mrf.mxu1  ;;  %v6229_v59 = vrot.slane %v4176_v49, %v6611_v48 }
 0x974   :  { %v6608_v63 = vsub.s32 0, %v5353_v4 }
 0x975   :  { %v2896_v56 = vpop.f32.mrf.mxu0  ;;  %v2937_v9 = vpop.f32.mrf.mxu1 }
 0x976   :  { %v6211_v56 = vrot.slane %v4176_v49, %v6608_v63  ;;  %v6609_v9 = vsub.s32 1, %v5353_v4 }
 0x978   :  { %v6215_v5 = vrot.slane %v4176_v49, %v6609_v9 }
 0x98f   :  { %v6198_v18 = vpop.f32.mrf.mxu0  ;;  %v6200_v54 = vpop.f32.mrf.mxu1 }
 0x990   :  { %6604 = vst [vmem:[#allocation31_spill] sm:$0xff] %v6198_v18  ;;  %6605 = vst [vmem:[#allocation33_spill] sm:$0xff] %v6200_v54  ;;  %v2370_v54 = vadd.f32 %v5971_v1, %v6211_v56 }
 0x991   :  { %v6202_v35 = vpop.f32.mrf.mxu0  ;;  %v6204_v34 = vpop.f32.mrf.mxu1 }
 0x992   :  { %6606 = vst [vmem:[#allocation34_spill] sm:$0xff] %v6202_v35  ;;  %6607 = vst [vmem:[#allocation35_spill] sm:$0xff] %v6204_v34  ;;  %v2372_v34 = vadd.f32 %v5977_v38, %v6215_v5  ;;  %v2413_v38 = vadd.f32 %v5979_v39, %v6229_v59 }
 0x993   :  { %v2982_v14 = vpop.f32.mrf.mxu0  ;;  %v3023_v45 = vpop.f32.mrf.mxu1 }
 0x994   :  { %v6610_v14 = vsub.s32 2, %v5353_v4 }
 0x995   :  { %v2983_v52 = vpop.f32.mrf.mxu0  ;;  %v3024_v15 = vpop.f32.mrf.mxu1 }
 0x996   :  { %v6221_v45 = vrot.slane %v4176_v49, %v6610_v14 }
 0x998   :  { %v2411_v19 = vadd.f32 %v5973_v46, %v6221_v45 }
 0x9af   :  { %v3233_v52 = vpop.f32.mrf.mxu0  ;;  %v3274_v15 = vpop.f32.mrf.mxu1 }
 0x9b0   :  { %v3281_v35 = vadd.f32 %v3233_v52, %v2370_v54  ;;  %v3283_v1 = vadd.f32 %v3274_v15, %v2411_v19 }
 0x9b1   :  { %v3235_v18 = vpop.f32.mrf.mxu0  ;;  %v3276_v63 = vpop.f32.mrf.mxu1 }
 0x9b2   :  { %v3285_v9 = vmul.f32 0.5, %v3281_v35  ;;  %v3282_v57 = vadd.f32 %v3235_v18, %v2372_v34  ;;  %v3284_v54 = vadd.f32 %v3276_v63, %v2413_v38  ;;  %v2459_v38 = vadd.f32 %v6038_v8, %v6215_v5 }
 0x9b3   :  { %v3237_v32 = vpop.f32.mrf.mxu0  ;;  %v3278_v51 = vpop.f32.mrf.mxu1  ;;  %v2500_v8 = vadd.f32 %v6040_v11, %v6229_v59 }
 0x9b4   :  { %4529 = vtanh.f32 %v3285_v9  ;;  %v3289_v10 = vmul.f32 0.5, %v3282_v57  ;;  %v3294_v46 = vmul.f32 0.5, %v3284_v54  ;;  %v2457_v9 = vadd.f32 %v6028_v2, %v6211_v56 }
 0x9b5   :  { %v3238_v14 = vpop.f32.mrf.mxu0  ;;  %v3279_v40 = vpop.f32.mrf.mxu1 }
 0x9b6   :  { %4531 = vtanh.f32 %v3289_v10 }
 0x9b7   :  { %4533 = vtanh.f32 %v3283_v1 }
 0x9b8   :  { %4535 = vtanh.f32 %v3294_v46 }
 0x9c1   :  { %v4530_v35 = vpop.eup %4529 }
 0x9c2   :  { %v3287_v18 = vmul.f32 0.5, %v4530_v35 }
 0x9c3   :  { %v4532_v32 = vpop.eup %4531 }
 0x9c4   :  { %v3288_v51 = vadd.f32 0.5, %v3287_v18  ;;  %v3291_v34 = vmul.f32 0.5, %v4532_v32  ;;  %v4534_v57 = vpop.eup %4533  ;;  %v2498_v18 = vadd.f32 %v6030_v3, %v6221_v45 }
 0x9c5   :  { %v4536_v48 = vpop.eup %4535 }
 0x9c6   :  { %v3292_v19 = vadd.f32 0.5, %v3291_v34  ;;  %v3299_v40 = vmul.f32 %v4534_v57, %v3288_v51  ;;  %v3296_v10 = vmul.f32 0.5, %v4536_v48 }
 0x9c8   :  { %v3298_v52 = vmul.f32 0.0, %v3292_v19  ;;  %v3297_v49 = vadd.f32 0.5, %v3296_v10 }
 0x9ca   :  { %v6233_v4 = vadd.f32 %v3299_v40, %v3298_v52 }
 0x9cc   :  { %4537 = vtanh.f32 %v6233_v4 }
 0x9d9   :  { %v4538_v39 = vpop.eup %4537 }
 0x9da   :  { %v3302_v15 = vmul.f32 %v4538_v39, %v3297_v49 }
 0x9dc   :  { %v3303_v63 = vpack.c.bf16 %v3302_v15, %v3302_v15 }
 0x9de   :  { %3304 = vst [vmem:[%s6530_s5] sm:$0xf] %v3303_v63  ;;  %3342 = vmatmul.mubr.bf16.vlgmr.msra.gmra.mxu0 %v3303_v63  ;;  %3383 = vmatmul.mubr.bf16.vlgmr.msra.gmra.mxu1 %v3303_v63 }
 0x9df   :  { %3421 = vmatpush1.bf16.msra.mxu0 %v6018_v61  ;;  %3462 = vmatpush1.bf16.msra.mxu1 %v6020_v62 }
 0x9e0   :  { %3422 = vmatprep.subr.bf16.mxu0 %v6024_v55  ;;  %3463 = vmatprep.subr.bf16.mxu1 %v6026_v33 }
 0x9e1   :  { %3452 = vmatprep.mubr.bf16.mxu0 %v6562_v41  ;;  %3493 = vmatprep.mubr.bf16.mxu1 %v6562_v41 }
 0x9e3   :  { %3423 = vmatpush1.bf16.msra.mxu0 %v6034_v6  ;;  %3464 = vmatpush1.bf16.msra.mxu1 %v6036_v7 }
 0x9e4   :  { %3424 = vmatprep.subr.bf16.mxu0 %v6044_v12  ;;  %3465 = vmatprep.subr.bf16.mxu1 %v6046_v13 }
 0x9e7   :  { %3425 = vmatpush1.bf16.msra.mxu0 %v6052_v16  ;;  %3466 = vmatpush1.bf16.msra.mxu1 %v6054_v17 }
 0x9e8   :  { %3426 = vmatprep.subr.bf16.mxu0 %v6058_v20  ;;  %3467 = vmatprep.subr.bf16.mxu1 %v6060_v21 }
 0x9eb   :  { %3427 = vmatpush1.bf16.msra.mxu0 %v6064_v22  ;;  %3468 = vmatpush1.bf16.msra.mxu1 %v6066_v23 }
 0x9ec   :  { %3428 = vmatprep.subr.bf16.mxu0 %v6070_v26  ;;  %3469 = vmatprep.subr.bf16.mxu1 %v6072_v31 }
 0x9ef   :  { %3429 = vmatpush1.bf16.msra.mxu0 %v6076_v50  ;;  %3470 = vmatpush1.bf16.msra.mxu1 %v6078_v36 }
 0x9f0   :  { %3430 = vmatprep.subr.bf16.mxu0 %v6082_v60  ;;  %3471 = vmatprep.subr.bf16.mxu1 %v6084_v47 }
 0x9f3   :  { %3431 = vmatpush1.bf16.msra.mxu0 %v6088_v30  ;;  %3472 = vmatpush1.bf16.msra.mxu1 %v6090_v37 }
 0x9f4   :  { %3432 = vmatprep.subr.bf16.mxu0 %v6094_v44  ;;  %3473 = vmatprep.subr.bf16.mxu1 %v6096_v28 }
 0x9f7   :  { %3433 = vmatpush1.bf16.msra.mxu0 %v6100_v53  ;;  %3474 = vmatpush1.bf16.msra.mxu1 %v6102_v24 }
 0x9f8   :  { %3434 = vmatprep.subr.bf16.mxu0 %v6106_v25  ;;  %3475 = vmatprep.subr.bf16.mxu1 %v6108_v42 }
 0x9fb   :  { %3435 = vmatpush1.bf16.msra.mxu0 %v6112_v27  ;;  %3476 = vmatpush1.bf16.msra.mxu1 %v6114_v43 }
 0x9fc   :  { %3531 = vmatprep.subr.bf16.mxu0 %v6012_v58  ;;  %3572 = vmatprep.subr.bf16.mxu1 %v6014_v29 }
 0xa9e   :  { %v3343_v1 = vpop.f32.mrf.mxu0  ;;  %v3384_v14 = vpop.f32.mrf.mxu1 }
 0xa9f   :  { %v3391_v54 = vadd.f32 %v3343_v1, %v2457_v9  ;;  %v3393_v19 = vadd.f32 %v3384_v14, %v2498_v18 }
 0xaa0   :  { %v3345_v46 = vpop.f32.mrf.mxu0  ;;  %v3386_v35 = vpop.f32.mrf.mxu1 }
 0xaa1   :  { %v3395_v32 = vmul.f32 0.5, %v3391_v54  ;;  %v3392_v51 = vadd.f32 %v3345_v46, %v2459_v38  ;;  %v3394_v48 = vadd.f32 %v3386_v35, %v2500_v8 }
 0xaa2   :  { %v3347_v34 = vpop.f32.mrf.mxu0  ;;  %v3388_v57 = vpop.f32.mrf.mxu1 }
 0xaa3   :  { %4539 = vtanh.f32 %v3395_v32  ;;  %v3399_v40 = vmul.f32 0.5, %v3392_v51  ;;  %v3404_v10 = vmul.f32 0.5, %v3394_v48  ;;  %v6613_v48 = vld [vmem:[#allocation13_spill] sm:$0xff] }
 0xaa4   :  { %v3348_v52 = vpop.f32.mrf.mxu0  ;;  %v3389_v2 = vpop.f32.mrf.mxu1 }
 0xaa5   :  { %4541 = vtanh.f32 %v3399_v40 }
 0xaa6   :  { %4543 = vtanh.f32 %v3393_v19  ;;  %v6612_v19 = vld [vmem:[#allocation14_spill] sm:$0xff] }
 0xaa7   :  { %4545 = vtanh.f32 %v3404_v10  ;;  %v2546_v40 = vadd.f32 %v6612_v19, %v6215_v5  ;;  %v2585_v10 = vadd.f32 %v6613_v48, %v6221_v45 }
 0xab0   :  { %v4540_v49 = vpop.eup %4539 }
 0xab1   :  { %v3397_v39 = vmul.f32 0.5, %v4540_v49 }
 0xab2   :  { %v4542_v15 = vpop.eup %4541 }
 0xab3   :  { %v3398_v3 = vadd.f32 0.5, %v3397_v39  ;;  %v3401_v63 = vmul.f32 0.5, %v4542_v15  ;;  %v4544_v9 = vpop.eup %4543 }
 0xab4   :  { %v4546_v46 = vpop.eup %4545 }
 0xab5   :  { %v3402_v1 = vadd.f32 0.5, %v3401_v63  ;;  %v3409_v38 = vmul.f32 %v4544_v9, %v3398_v3  ;;  %v3406_v18 = vmul.f32 0.5, %v4546_v46 }
 0xab7   :  { %v3408_v14 = vmul.f32 %v3402_v1, %v6233_v4  ;;  %v3407_v11 = vadd.f32 0.5, %v3406_v18  ;;  %v2544_v4 = vadd.f32 %v6122_v0, %v6211_v56 }
 0xab9   :  { %v6282_v54 = vadd.f32 %v3409_v38, %v3408_v14  ;;  %v6614_v38 = vld [vmem:[#allocation16_spill] sm:$0xff] }
 0xaba   :  { %v2587_v14 = vadd.f32 %v6614_v38, %v6229_v59 }
 0xabb   :  { %4547 = vtanh.f32 %v6282_v54 }
 0xac8   :  { %v4548_v35 = vpop.eup %4547 }
 0xac9   :  { %v3412_v32 = vmul.f32 %v4548_v35, %v3407_v11 }
 0xacb   :  { %v3413_v51 = vpack.c.bf16 %v3412_v32, %v3412_v32 }
 0xacd   :  { %4241 = vst [vmem:[%s6530_s5 + $0x4] sm:$0xf] %v3413_v51  ;;  %3453 = vmatmul.mubr.bf16.vlgmr.msra.gmra.mxu0 %v3413_v51  ;;  %3494 = vmatmul.mubr.bf16.vlgmr.msra.gmra.mxu1 %v3413_v51 }
 0xace   :  { %3532 = vmatpush1.bf16.msra.mxu0 %v6018_v61  ;;  %3573 = vmatpush1.bf16.msra.mxu1 %v6020_v62 }
 0xacf   :  { %3533 = vmatprep.subr.bf16.mxu0 %v6024_v55  ;;  %3574 = vmatprep.subr.bf16.mxu1 %v6026_v33 }
 0xad0   :  { %3563 = vmatprep.mubr.bf16.mxu0 %v6562_v41  ;;  %3604 = vmatprep.mubr.bf16.mxu1 %v6562_v41 }
 0xad2   :  { %3534 = vmatpush1.bf16.msra.mxu0 %v6034_v6  ;;  %3575 = vmatpush1.bf16.msra.mxu1 %v6036_v7 }
 0xad3   :  { %3535 = vmatprep.subr.bf16.mxu0 %v6044_v12  ;;  %3576 = vmatprep.subr.bf16.mxu1 %v6046_v13 }
 0xad6   :  { %3536 = vmatpush1.bf16.msra.mxu0 %v6052_v16  ;;  %3577 = vmatpush1.bf16.msra.mxu1 %v6054_v17 }
 0xad7   :  { %3537 = vmatprep.subr.bf16.mxu0 %v6058_v20  ;;  %3578 = vmatprep.subr.bf16.mxu1 %v6060_v21 }
 0xada   :  { %3538 = vmatpush1.bf16.msra.mxu0 %v6064_v22  ;;  %3579 = vmatpush1.bf16.msra.mxu1 %v6066_v23 }
 0xadb   :  { %3539 = vmatprep.subr.bf16.mxu0 %v6070_v26  ;;  %3580 = vmatprep.subr.bf16.mxu1 %v6072_v31 }
 0xade   :  { %3540 = vmatpush1.bf16.msra.mxu0 %v6076_v50  ;;  %3581 = vmatpush1.bf16.msra.mxu1 %v6078_v36 }
 0xadf   :  { %3541 = vmatprep.subr.bf16.mxu0 %v6082_v60  ;;  %3582 = vmatprep.subr.bf16.mxu1 %v6084_v47 }
 0xae2   :  { %3542 = vmatpush1.bf16.msra.mxu0 %v6088_v30  ;;  %3583 = vmatpush1.bf16.msra.mxu1 %v6090_v37 }
 0xae3   :  { %3543 = vmatprep.subr.bf16.mxu0 %v6094_v44  ;;  %3584 = vmatprep.subr.bf16.mxu1 %v6096_v28 }
 0xae6   :  { %3544 = vmatpush1.bf16.msra.mxu0 %v6100_v53  ;;  %3585 = vmatpush1.bf16.msra.mxu1 %v6102_v24 }
 0xae7   :  { %3545 = vmatprep.subr.bf16.mxu0 %v6106_v25  ;;  %3586 = vmatprep.subr.bf16.mxu1 %v6108_v42 }
 0xaea   :  { %3546 = vmatpush1.bf16.msra.mxu0 %v6112_v27  ;;  %3587 = vmatpush1.bf16.msra.mxu1 %v6114_v43 }
 0xaeb   :  { %3642 = vmatprep.subr.bf16.mxu0 %v6012_v58  ;;  %3683 = vmatprep.subr.bf16.mxu1 %v6014_v29 }
 0xb8d   :  { %v3454_v34 = vpop.f32.mrf.mxu0  ;;  %v3495_v57 = vpop.f32.mrf.mxu1 }
 0xb8e   :  { %v3502_v52 = vadd.f32 %v3454_v34, %v2544_v4  ;;  %v3504_v63 = vadd.f32 %v3495_v57, %v2585_v10 }
 0xb8f   :  { %v3456_v2 = vpop.f32.mrf.mxu0  ;;  %v3497_v8 = vpop.f32.mrf.mxu1 }
 0xb90   :  { %v3506_v49 = vmul.f32 0.5, %v3502_v52  ;;  %v3503_v39 = vadd.f32 %v3456_v2, %v2546_v40  ;;  %v3505_v46 = vadd.f32 %v3497_v8, %v2587_v14 }
 0xb91   :  { %v3458_v15 = vpop.f32.mrf.mxu0  ;;  %v3499_v3 = vpop.f32.mrf.mxu1 }
 0xb92   :  { %4549 = vtanh.f32 %v3506_v49  ;;  %v3510_v9 = vmul.f32 0.5, %v3503_v39  ;;  %v3515_v18 = vmul.f32 0.5, %v3505_v46  ;;  %v6617_v46 = vld [vmem:[#allocation17_spill] sm:$0xff] }
 0xb93   :  { %v3459_v1 = vpop.f32.mrf.mxu0  ;;  %v3500_v0 = vpop.f32.mrf.mxu1 }
 0xb94   :  { %4551 = vtanh.f32 %v3510_v9  ;;  %v6616_v9 = vld [vmem:[#allocation18_spill] sm:$0xff] }
 0xb95   :  { %4553 = vtanh.f32 %v3504_v63  ;;  %v2633_v1 = vadd.f32 %v6616_v9, %v6215_v5 }
 0xb96   :  { %4555 = vtanh.f32 %v3515_v18  ;;  %v2672_v18 = vadd.f32 %v6617_v46, %v6221_v45 }
 0xb9f   :  { %v4550_v11 = vpop.eup %4549 }
 0xba0   :  { %v3508_v35 = vmul.f32 0.5, %v4550_v11 }
 0xba1   :  { %v4552_v32 = vpop.eup %4551 }
 0xba2   :  { %v3509_v51 = vadd.f32 0.5, %v3508_v35  ;;  %v3512_v4 = vmul.f32 0.5, %v4552_v32  ;;  %v4554_v34 = vpop.eup %4553 }
 0xba3   :  { %v4556_v2 = vpop.eup %4555 }
 0xba4   :  { %v3513_v19 = vadd.f32 0.5, %v3512_v4  ;;  %v3520_v40 = vmul.f32 %v4554_v34, %v3509_v51  ;;  %v3517_v48 = vmul.f32 0.5, %v4556_v2 }
 0xba6   :  { %v3519_v57 = vmul.f32 %v3513_v19, %v6282_v54  ;;  %v3518_v10 = vadd.f32 0.5, %v3517_v48  ;;  %v6615_v54 = vld [vmem:[#allocation15_spill] sm:$0xff] }
 0xba7   :  { %v2631_v15 = vadd.f32 %v6615_v54, %v6211_v56 }
 0xba8   :  { %v6331_v52 = vadd.f32 %v3520_v40, %v3519_v57  ;;  %v6618_v57 = vld [vmem:[#allocation20_spill] sm:$0xff] }
 0xba9   :  { %v2674_v2 = vadd.f32 %v6618_v57, %v6229_v59 }
 0xbaa   :  { %4557 = vtanh.f32 %v6331_v52 }
 0xbb7   :  { %v4558_v8 = vpop.eup %4557 }
 0xbb8   :  { %v3523_v49 = vmul.f32 %v4558_v8, %v3518_v10 }
 0xbba   :  { %v3524_v39 = vpack.c.bf16 %v3523_v49, %v3523_v49 }
 0xbbc   :  { %4242 = vst [vmem:[%s6530_s5 + $0x8] sm:$0xf] %v3524_v39  ;;  %3564 = vmatmul.mubr.bf16.vlgmr.msra.gmra.mxu0 %v3524_v39  ;;  %3605 = vmatmul.mubr.bf16.vlgmr.msra.gmra.mxu1 %v3524_v39 }
 0xbbd   :  { %3643 = vmatpush1.bf16.msra.mxu0 %v6018_v61  ;;  %3684 = vmatpush1.bf16.msra.mxu1 %v6020_v62 }
 0xbbe   :  { %3644 = vmatprep.subr.bf16.mxu0 %v6024_v55  ;;  %3685 = vmatprep.subr.bf16.mxu1 %v6026_v33 }
 0xbbf   :  { %3674 = vmatprep.mubr.bf16.mxu0 %v6562_v41  ;;  %3715 = vmatprep.mubr.bf16.mxu1 %v6562_v41 }
 0xbc1   :  { %3645 = vmatpush1.bf16.msra.mxu0 %v6034_v6  ;;  %3686 = vmatpush1.bf16.msra.mxu1 %v6036_v7 }
 0xbc2   :  { %3646 = vmatprep.subr.bf16.mxu0 %v6044_v12  ;;  %3687 = vmatprep.subr.bf16.mxu1 %v6046_v13 }
 0xbc5   :  { %3647 = vmatpush1.bf16.msra.mxu0 %v6052_v16  ;;  %3688 = vmatpush1.bf16.msra.mxu1 %v6054_v17 }
 0xbc6   :  { %3648 = vmatprep.subr.bf16.mxu0 %v6058_v20  ;;  %3689 = vmatprep.subr.bf16.mxu1 %v6060_v21 }
 0xbc9   :  { %3649 = vmatpush1.bf16.msra.mxu0 %v6064_v22  ;;  %3690 = vmatpush1.bf16.msra.mxu1 %v6066_v23 }
 0xbca   :  { %3650 = vmatprep.subr.bf16.mxu0 %v6070_v26  ;;  %3691 = vmatprep.subr.bf16.mxu1 %v6072_v31 }
 0xbcd   :  { %3651 = vmatpush1.bf16.msra.mxu0 %v6076_v50  ;;  %3692 = vmatpush1.bf16.msra.mxu1 %v6078_v36 }
 0xbce   :  { %3652 = vmatprep.subr.bf16.mxu0 %v6082_v60  ;;  %3693 = vmatprep.subr.bf16.mxu1 %v6084_v47 }
 0xbd1   :  { %3653 = vmatpush1.bf16.msra.mxu0 %v6088_v30  ;;  %3694 = vmatpush1.bf16.msra.mxu1 %v6090_v37 }
 0xbd2   :  { %3654 = vmatprep.subr.bf16.mxu0 %v6094_v44  ;;  %3695 = vmatprep.subr.bf16.mxu1 %v6096_v28 }
 0xbd5   :  { %3655 = vmatpush1.bf16.msra.mxu0 %v6100_v53  ;;  %3696 = vmatpush1.bf16.msra.mxu1 %v6102_v24 }
 0xbd6   :  { %3656 = vmatprep.subr.bf16.mxu0 %v6106_v25  ;;  %3697 = vmatprep.subr.bf16.mxu1 %v6108_v42 }
 0xbd9   :  { %3657 = vmatpush1.bf16.msra.mxu0 %v6112_v27  ;;  %3698 = vmatpush1.bf16.msra.mxu1 %v6114_v43 }
 0xbda   :  { %3753 = vmatprep.subr.bf16.mxu0 %v6012_v58  ;;  %3794 = vmatprep.subr.bf16.mxu1 %v6014_v29 }
 0xc7c   :  { %v3565_v3 = vpop.f32.mrf.mxu0  ;;  %v3606_v63 = vpop.f32.mrf.mxu1 }
 0xc7d   :  { %v3613_v0 = vadd.f32 %v3565_v3, %v2631_v15  ;;  %v3615_v4 = vadd.f32 %v3606_v63, %v2672_v18 }
 0xc7e   :  { %v3567_v38 = vpop.f32.mrf.mxu0  ;;  %v3608_v14 = vpop.f32.mrf.mxu1 }
 0xc7f   :  { %v3617_v11 = vmul.f32 0.5, %v3613_v0  ;;  %v3614_v35 = vadd.f32 %v3567_v38, %v2633_v1  ;;  %v3616_v48 = vadd.f32 %v3608_v14, %v2674_v2 }
 0xc80   :  { %v3569_v32 = vpop.f32.mrf.mxu0  ;;  %v3610_v51 = vpop.f32.mrf.mxu1 }
 0xc81   :  { %4559 = vtanh.f32 %v3617_v11  ;;  %v3621_v34 = vmul.f32 0.5, %v3614_v35  ;;  %v3626_v10 = vmul.f32 0.5, %v3616_v48 }
 0xc82   :  { %v3570_v19 = vpop.f32.mrf.mxu0  ;;  %v3611_v40 = vpop.f32.mrf.mxu1 }
 0xc83   :  { %4561 = vtanh.f32 %v3621_v34  ;;  %v6621_v19 = vld [vmem:[#allocation21_spill] sm:$0xff] }
 0xc84   :  { %4563 = vtanh.f32 %v3615_v4  ;;  %v2759_v40 = vadd.f32 %v6621_v19, %v6221_v45  ;;  %v6444_v19 = vld [vmem:[#allocation8 + $0x1cc] ss:$16 sps:$4 sm:$0xff]  }
 0xc85   :  { %4565 = vtanh.f32 %v3626_v10 }
 0xc8e   :  { %v4560_v8 = vpop.eup %4559 }
 0xc8f   :  { %v3619_v49 = vmul.f32 0.5, %v4560_v8 }
 0xc90   :  { %v4562_v39 = vpop.eup %4561 }
 0xc91   :  { %v3620_v54 = vadd.f32 0.5, %v3619_v49  ;;  %v3623_v15 = vmul.f32 0.5, %v4562_v39  ;;  %v4564_v3 = vpop.eup %4563  ;;  %v6622_v39 = vld [vmem:[#allocation24_spill] sm:$0xff] }
 0xc92   :  { %v4566_v38 = vpop.eup %4565 }
 0xc93   :  { %v3624_v9 = vadd.f32 0.5, %v3623_v15  ;;  %v3631_v1 = vmul.f32 %v4564_v3, %v3620_v54  ;;  %v3628_v46 = vmul.f32 0.5, %v4566_v38  ;;  %v2761_v54 = vadd.f32 %v6622_v39, %v6229_v59 }
 0xc95   :  { %v3630_v63 = vmul.f32 %v3624_v9, %v6331_v52  ;;  %v3629_v18 = vadd.f32 0.5, %v3628_v46  ;;  %v6620_v52 = vld [vmem:[#allocation22_spill] sm:$0xff] }
 0xc96   :  { %v2720_v32 = vadd.f32 %v6620_v52, %v6215_v5 }
 0xc97   :  { %v6380_v0 = vadd.f32 %v3631_v1, %v3630_v63 }
 0xc99   :  { %4567 = vtanh.f32 %v6380_v0 }
 0xca6   :  { %v4568_v14 = vpop.eup %4567 }
 0xca7   :  { %v3634_v11 = vmul.f32 %v4568_v14, %v3629_v18 }
 0xca9   :  { %v3635_v35 = vpack.c.bf16 %v3634_v11, %v3634_v11 }
 0xcab   :  { %4243 = vst [vmem:[%s6530_s5 + $0xc] sm:$0xf] %v3635_v35  ;;  %3675 = vmatmul.mubr.bf16.vlgmr.msra.gmra.mxu0 %v3635_v35  ;;  %3716 = vmatmul.mubr.bf16.vlgmr.msra.gmra.mxu1 %v3635_v35 }
 0xcac   :  { %3754 = vmatpush1.bf16.msra.mxu0 %v6018_v61  ;;  %3795 = vmatpush1.bf16.msra.mxu1 %v6020_v62  ;;  %v6619_v61 = vld [vmem:[#allocation19_spill] sm:$0xff] }
 0xcad   :  { %3755 = vmatprep.subr.bf16.mxu0 %v6024_v55  ;;  %3796 = vmatprep.subr.bf16.mxu1 %v6026_v33  ;;  %v2718_v62 = vadd.f32 %v6619_v61, %v6211_v56 }
 0xcae   :  { %3785 = vmatprep.mubr.bf16.mxu0 %v6562_v41  ;;  %3826 = vmatprep.mubr.bf16.mxu1 %v6562_v41 }
 0xcb0   :  { %3756 = vmatpush1.bf16.msra.mxu0 %v6034_v6  ;;  %3797 = vmatpush1.bf16.msra.mxu1 %v6036_v7 }
 0xcb1   :  { %3757 = vmatprep.subr.bf16.mxu0 %v6044_v12  ;;  %3798 = vmatprep.subr.bf16.mxu1 %v6046_v13 }
 0xcb4   :  { %3758 = vmatpush1.bf16.msra.mxu0 %v6052_v16  ;;  %3799 = vmatpush1.bf16.msra.mxu1 %v6054_v17 }
 0xcb5   :  { %3759 = vmatprep.subr.bf16.mxu0 %v6058_v20  ;;  %3800 = vmatprep.subr.bf16.mxu1 %v6060_v21 }
 0xcb8   :  { %3760 = vmatpush1.bf16.msra.mxu0 %v6064_v22  ;;  %3801 = vmatpush1.bf16.msra.mxu1 %v6066_v23 }
 0xcb9   :  { %3761 = vmatprep.subr.bf16.mxu0 %v6070_v26  ;;  %3802 = vmatprep.subr.bf16.mxu1 %v6072_v31 }
 0xcbc   :  { %3762 = vmatpush1.bf16.msra.mxu0 %v6076_v50  ;;  %3803 = vmatpush1.bf16.msra.mxu1 %v6078_v36 }
 0xcbd   :  { %3763 = vmatprep.subr.bf16.mxu0 %v6082_v60  ;;  %3804 = vmatprep.subr.bf16.mxu1 %v6084_v47 }
 0xcc0   :  { %3764 = vmatpush1.bf16.msra.mxu0 %v6088_v30  ;;  %3805 = vmatpush1.bf16.msra.mxu1 %v6090_v37 }
 0xcc1   :  { %3765 = vmatprep.subr.bf16.mxu0 %v6094_v44  ;;  %3806 = vmatprep.subr.bf16.mxu1 %v6096_v28 }
 0xcc4   :  { %3766 = vmatpush1.bf16.msra.mxu0 %v6100_v53  ;;  %3807 = vmatpush1.bf16.msra.mxu1 %v6102_v24 }
 0xcc5   :  { %3767 = vmatprep.subr.bf16.mxu0 %v6106_v25  ;;  %3808 = vmatprep.subr.bf16.mxu1 %v6108_v42 }
 0xcc8   :  { %3768 = vmatpush1.bf16.msra.mxu0 %v6112_v27  ;;  %3809 = vmatpush1.bf16.msra.mxu1 %v6114_v43 }
 0xcc9   :  { %3864 = vmatprep.subr.bf16.mxu0 %v6012_v58  ;;  %3905 = vmatprep.subr.bf16.mxu1 %v6014_v29 }
 0xd6b   :  { %v3676_v55 = vpop.f32.mrf.mxu0  ;;  %v3717_v33 = vpop.f32.mrf.mxu1 }
 0xd6c   :  { %v3724_v51 = vadd.f32 %v3676_v55, %v2718_v62  ;;  %v3726_v29 = vadd.f32 %v3717_v33, %v2759_v40 }
 0xd6d   :  { %v3678_v4 = vpop.f32.mrf.mxu0  ;;  %v3719_v34 = vpop.f32.mrf.mxu1 }
 0xd6e   :  { %v3728_v57 = vmul.f32 0.5, %v3724_v51  ;;  %v3725_v2 = vadd.f32 %v3678_v4, %v2720_v32  ;;  %v3727_v15 = vadd.f32 %v3719_v34, %v2761_v54  ;;  %v6435_v4 = vld [vmem:[#allocation8 + $0x1e0] ss:$16 sps:$4 sm:$0xff]   ;;  %v6441_v34 = vld [vmem:[#allocation8 + $0x1c4] ss:$16 sps:$4 sm:$0xff]  }
 0xd6f   :  { %v3680_v48 = vpop.f32.mrf.mxu0  ;;  %v3721_v58 = vpop.f32.mrf.mxu1 }
 0xd70   :  { %4569 = vtanh.f32 %v3728_v57  ;;  %v3732_v10 = vmul.f32 0.5, %v3725_v2  ;;  %v3737_v3 = vmul.f32 0.5, %v3727_v15 }
 0xd71   :  { %v3681_v8 = vpop.f32.mrf.mxu0  ;;  %v3722_v49 = vpop.f32.mrf.mxu1 }
 0xd72   :  { %4571 = vtanh.f32 %v3732_v10 }
 0xd73   :  { %4573 = vtanh.f32 %v3726_v29 }
 0xd74   :  { %4575 = vtanh.f32 %v3737_v3 }
 0xd7d   :  { %v4570_v9 = vpop.eup %4569 }
 0xd7e   :  { %v3730_v1 = vmul.f32 0.5, %v4570_v9 }
 0xd7f   :  { %v4572_v63 = vpop.eup %4571 }
 0xd80   :  { %v3731_v38 = vadd.f32 0.5, %v3730_v1  ;;  %v3734_v46 = vmul.f32 0.5, %v4572_v63  ;;  %v4574_v18 = vpop.eup %4573  ;;  %v4647_v63 = vld [vmem:[#allocation8 + $0x1c0] ss:$16 sps:$4 sm:$0xff]  }
 0xd81   :  { %v4576_v62 = vpop.eup %4575 }
 0xd82   :  { %v3735_v14 = vadd.f32 0.5, %v3734_v46  ;;  %v3742_v11 = vmul.f32 %v4574_v18, %v3731_v38  ;;  %v3739_v55 = vmul.f32 0.5, %v4576_v62  ;;  %v4648_v38 = vld [vmem:[#allocation8 + $0x1c8] ss:$16 sps:$4 sm:$0xff]   ;;  %v4649_v46 = vld [vmem:[#allocation8 + $0x1a4] ss:$16 sps:$4 sm:$0xff]  }
 0xd83   :  { %v4650_v18 = vld [vmem:[#allocation8 + $0x1ac] ss:$16 sps:$4 sm:$0xff]   ;;  %v4655_v62 = vld [vmem:[#allocation8 + $0x180] ss:$16 sps:$4 sm:$0xff]  }
 0xd84   :  { %v3741_v35 = vmul.f32 %v3735_v14, %v6380_v0  ;;  %v3740_v33 = vadd.f32 0.5, %v3739_v55  ;;  %v6438_v0 = vld [vmem:[#allocation8 + $0x1e8] ss:$16 sps:$4 sm:$0xff]   ;;  %v4651_v14 = vld [vmem:[#allocation8 + $0x1a0] ss:$16 sps:$4 sm:$0xff]  }
 0xd85   :  { %v4656_v55 = vld [vmem:[#allocation8 + $0x188] ss:$16 sps:$4 sm:$0xff]  }
 0xd86   :  { %v6429_v61 = vadd.f32 %v3742_v11, %v3741_v35  ;;  %v4652_v11 = vld [vmem:[#allocation8 + $0x1a8] ss:$16 sps:$4 sm:$0xff]   ;;  %v4653_v35 = vld [vmem:[#allocation8 + $0x184] ss:$16 sps:$4 sm:$0xff]  }
 0xd88   :  { %4577 = vtanh.f32 %v6429_v61 }
 0xd95   :  { %v4578_v52 = vpop.eup %4577 }
 0xd96   :  { %v3745_v32 = vmul.f32 %v4578_v52, %v3740_v33  ;;  %v4658_v33 = vld [vmem:[#allocation8 + $0x16c] ss:$16 sps:$4 sm:$0xff]   ;;  %v4659_v52 = vld [vmem:[#allocation8 + $0x160] ss:$16 sps:$4 sm:$0xff]  }
 0xd98   :  { %v3746_v51 = vpack.c.bf16 %v3745_v32, %v3745_v32  ;;  %v4660_v32 = vld [vmem:[#allocation8 + $0x168] ss:$16 sps:$4 sm:$0xff]  }
 0xd9a   :  { %4244 = vst [vmem:[%s6530_s5 + $0x10] sm:$0xf] %v3746_v51  ;;  %3786 = vmatmul.mubr.bf16.vlgmr.msra.gmra.mxu0 %v3746_v51  ;;  %3827 = vmatmul.mubr.bf16.vlgmr.msra.gmra.mxu1 %v3746_v51  ;;  %v4661_v51 = vld [vmem:[#allocation8 + $0x144] ss:$16 sps:$4 sm:$0xff]  }
 0xd9b   :  { %3865 = vmatpush1.bf16.msra.mxu0 %v6435_v4  ;;  %3906 = vmatpush1.bf16.msra.mxu1 %v6438_v0 }
 0xd9c   :  { %3866 = vmatprep.subr.bf16.mxu0 %v6441_v34  ;;  %3907 = vmatprep.subr.bf16.mxu1 %v6444_v19 }
 0xd9d   :  { %3896 = vmatprep.mubr.bf16.mxu0 %v6562_v41  ;;  %3937 = vmatprep.mubr.bf16.mxu1 %v6562_v41 }
 0xd9f   :  { %3867 = vmatpush1.bf16.msra.mxu0 %v6034_v6  ;;  %3908 = vmatpush1.bf16.msra.mxu1 %v6036_v7  ;;  %v4645_v6 = vld [vmem:[#allocation8 + $0x1e4] ss:$16 sps:$4 sm:$0xff]   ;;  %v4646_v7 = vld [vmem:[#allocation8 + $0x1ec] ss:$16 sps:$4 sm:$0xff]  }
 0xda0   :  { %3868 = vmatprep.subr.bf16.mxu0 %v6044_v12  ;;  %3909 = vmatprep.subr.bf16.mxu1 %v6046_v13  ;;  %v6623_v12 = vld [vmem:[#allocation23_spill] sm:$0xff] }
 0xda1   :  { %v2805_v13 = vadd.f32 %v6623_v12, %v6211_v56  ;;  %v4668_v12 = vld [vmem:[#allocation8 + $0x128] ss:$16 sps:$4 sm:$0xff]  }
 0xda3   :  { %3869 = vmatpush1.bf16.msra.mxu0 %v6052_v16  ;;  %3910 = vmatpush1.bf16.msra.mxu1 %v6054_v17 }
 0xda4   :  { %3870 = vmatprep.subr.bf16.mxu0 %v6058_v20  ;;  %3911 = vmatprep.subr.bf16.mxu1 %v6060_v21  ;;  %v6624_v20 = vld [vmem:[#allocation26_spill] sm:$0xff] }
 0xda5   :  { %v2807_v21 = vadd.f32 %v6624_v20, %v6215_v5  ;;  %v4672_v20 = vld [vmem:[#allocation8 + $0x108] ss:$16 sps:$4 sm:$0xff]  }
 0xda7   :  { %3871 = vmatpush1.bf16.msra.mxu0 %v6064_v22  ;;  %3912 = vmatpush1.bf16.msra.mxu1 %v6066_v23 }
 0xda8   :  { %3872 = vmatprep.subr.bf16.mxu0 %v6070_v26  ;;  %3913 = vmatprep.subr.bf16.mxu1 %v6072_v31  ;;  %v6625_v31 = vld [vmem:[#allocation25_spill] sm:$0xff] }
 0xdab   :  { %3873 = vmatpush1.bf16.msra.mxu0 %v6076_v50  ;;  %3914 = vmatpush1.bf16.msra.mxu1 %v6078_v36  ;;  %v2846_v50 = vadd.f32 %v6625_v31, %v6221_v45  ;;  %v6628_v31 = vld [vmem:[#allocation30_spill] sm:$0xff] }
 0xdac   :  { %3874 = vmatprep.subr.bf16.mxu0 %v6082_v60  ;;  %3915 = vmatprep.subr.bf16.mxu1 %v6084_v47 }
 0xdaf   :  { %3875 = vmatpush1.bf16.msra.mxu0 %v6088_v30  ;;  %3916 = vmatpush1.bf16.msra.mxu1 %v6090_v37 }
 0xdb0   :  { %3876 = vmatprep.subr.bf16.mxu0 %v6094_v44  ;;  %3917 = vmatprep.subr.bf16.mxu1 %v6096_v28 }
 0xdb3   :  { %3877 = vmatpush1.bf16.msra.mxu0 %v6100_v53  ;;  %3918 = vmatpush1.bf16.msra.mxu1 %v6102_v24  ;;  %v6626_v24 = vld [vmem:[#allocation28_spill] sm:$0xff] }
 0xdb4   :  { %3878 = vmatprep.subr.bf16.mxu0 %v6106_v25  ;;  %3919 = vmatprep.subr.bf16.mxu1 %v6108_v42  ;;  %v2848_v25 = vadd.f32 %v6626_v24, %v6229_v59 }
 0xdb7   :  { %3879 = vmatpush1.bf16.msra.mxu0 %v6112_v27  ;;  %3920 = vmatpush1.bf16.msra.mxu1 %v6114_v43 }
 0xdb8   :  { %3975 = vmatprep.subr.bf16.mxu0 %v4645_v6  ;;  %4016 = vmatprep.subr.bf16.mxu1 %v4646_v7  ;;  %v4666_v6 = vld [vmem:[#allocation8 + $0x12c] ss:$16 sps:$4 sm:$0xff]   ;;  %v4667_v7 = vld [vmem:[#allocation8 + $0x120] ss:$16 sps:$4 sm:$0xff]  }
 0xe5a   :  { %v3787_v16 = vpop.f32.mrf.mxu0  ;;  %v3828_v17 = vpop.f32.mrf.mxu1 }
 0xe5b   :  { %v3835_v22 = vadd.f32 %v3787_v16, %v2805_v13  ;;  %v3837_v37 = vadd.f32 %v3828_v17, %v2846_v50  ;;  %v4669_v13 = vld [vmem:[#allocation8 + $0x104] ss:$16 sps:$4 sm:$0xff]   ;;  %v4670_v16 = vld [vmem:[#allocation8 + $0x10c] ss:$16 sps:$4 sm:$0xff]   ;;  %v4671_v17 = vld [vmem:[#allocation8 + $0x100] ss:$16 sps:$4 sm:$0xff]   ;;  %v2894_v50 = vadd.f32 %v6628_v31, %v6215_v5 }
 0xe5c   :  { %v3789_v23 = vpop.f32.mrf.mxu0  ;;  %v3830_v26 = vpop.f32.mrf.mxu1 }
 0xe5d   :  { %v3839_v36 = vmul.f32 0.5, %v3835_v22  ;;  %v3836_v60 = vadd.f32 %v3789_v23, %v2807_v21  ;;  %v3838_v42 = vadd.f32 %v3830_v26, %v2848_v25  ;;  %v6627_v21 = vld [vmem:[#allocation27_spill] sm:$0xff] }
 0xe5e   :  { %v3791_v47 = vpop.f32.mrf.mxu0  ;;  %v3832_v30 = vpop.f32.mrf.mxu1  ;;  %v2892_v22 = vadd.f32 %v6627_v21, %v6211_v56 }
 0xe5f   :  { %4579 = vtanh.f32 %v3839_v36  ;;  %v3843_v44 = vmul.f32 0.5, %v3836_v60  ;;  %v3848_v27 = vmul.f32 0.5, %v3838_v42  ;;  %v6629_v30 = vld [vmem:[#allocation29_spill] sm:$0xff] }
 0xe60   :  { %v3792_v28 = vpop.f32.mrf.mxu0  ;;  %v3833_v53 = vpop.f32.mrf.mxu1 }
 0xe61   :  { %4581 = vtanh.f32 %v3843_v44 }
 0xe62   :  { %4583 = vtanh.f32 %v3837_v37  ;;  %v2933_v37 = vadd.f32 %v6629_v30, %v6221_v45 }
 0xe63   :  { %4585 = vtanh.f32 %v3848_v27 }
 0xe6c   :  { %v4580_v43 = vpop.eup %4579 }
 0xe6d   :  { %v3841_v40 = vmul.f32 0.5, %v4580_v43 }
 0xe6e   :  { %v4582_v57 = vpop.eup %4581 }
 0xe6f   :  { %v3842_v2 = vadd.f32 0.5, %v3841_v40  ;;  %v3845_v48 = vmul.f32 0.5, %v4582_v57  ;;  %v4584_v58 = vpop.eup %4583  ;;  %v6630_v40 = vld [vmem:[#allocation32_spill] sm:$0xff] }
 0xe70   :  { %v4586_v39 = vpop.eup %4585  ;;  %v2935_v57 = vadd.f32 %v6630_v40, %v6229_v59 }
 0xe71   :  { %v3846_v29 = vadd.f32 0.5, %v3845_v48  ;;  %v3853_v10 = vmul.f32 %v4584_v58, %v3842_v2  ;;  %v3850_v54 = vmul.f32 0.5, %v4586_v39 }
 0xe73   :  { %v3852_v8 = vmul.f32 %v3846_v29, %v6429_v61  ;;  %v3851_v15 = vadd.f32 0.5, %v3850_v54  ;;  %v4654_v61 = vld [vmem:[#allocation8 + $0x18c] ss:$16 sps:$4 sm:$0xff]  }
 0xe75   :  { %v6484_v49 = vadd.f32 %v3853_v10, %v3852_v8 }
 0xe77   :  { %4587 = vtanh.f32 %v6484_v49 }
 0xe84   :  { %v4588_v3 = vpop.eup %4587 }
 0xe85   :  { %v3856_v9 = vmul.f32 %v4588_v3, %v3851_v15 }
 0xe87   :  { %v3857_v1 = vpack.c.bf16 %v3856_v9, %v3856_v9 }
 0xe89   :  { %4245 = vst [vmem:[%s6530_s5 + $0x14] sm:$0xf] %v3857_v1  ;;  %3897 = vmatmul.mubr.bf16.vlgmr.msra.gmra.mxu0 %v3857_v1  ;;  %3938 = vmatmul.mubr.bf16.vlgmr.msra.gmra.mxu1 %v3857_v1 }
 0xe8a   :  { %3976 = vmatpush1.bf16.msra.mxu0 %v6435_v4  ;;  %4017 = vmatpush1.bf16.msra.mxu1 %v6438_v0  ;;  %v4662_v4 = vld [vmem:[#allocation8 + $0x14c] ss:$16 sps:$4 sm:$0xff]   ;;  %v4663_v0 = vld [vmem:[#allocation8 + $0x140] ss:$16 sps:$4 sm:$0xff]  }
 0xe8b   :  { %3977 = vmatprep.subr.bf16.mxu0 %v6441_v34  ;;  %4018 = vmatprep.subr.bf16.mxu1 %v6444_v19  ;;  %v4664_v34 = vld [vmem:[#allocation8 + $0x148] ss:$16 sps:$4 sm:$0xff]   ;;  %v4665_v19 = vld [vmem:[#allocation8 + $0x124] ss:$16 sps:$4 sm:$0xff]  }
 0xe8c   :  { %4007 = vmatprep.mubr.bf16.mxu0 %v6562_v41  ;;  %4048 = vmatprep.mubr.bf16.mxu1 %v6562_v41  ;;  %v4657_v41 = vld [vmem:[#allocation8 + $0x164] ss:$16 sps:$4 sm:$0xff]  }
 0xe8e   :  { %3978 = vmatpush1.bf16.msra.mxu0 %v4647_v63  ;;  %4019 = vmatpush1.bf16.msra.mxu1 %v4648_v38 }
 0xe8f   :  { %3979 = vmatprep.subr.bf16.mxu0 %v4649_v46  ;;  %4020 = vmatprep.subr.bf16.mxu1 %v4650_v18 }
 0xe92   :  { %3980 = vmatpush1.bf16.msra.mxu0 %v4651_v14  ;;  %4021 = vmatpush1.bf16.msra.mxu1 %v4652_v11 }
 0xe93   :  { %3981 = vmatprep.subr.bf16.mxu0 %v4653_v35  ;;  %4022 = vmatprep.subr.bf16.mxu1 %v4654_v61  ;;  %v6631_v35 = vld [vmem:[#allocation31_spill] sm:$0xff] }
 0xe94   :  { %v2979_v61 = vadd.f32 %v6631_v35, %v6211_v56 }
 0xe96   :  { %3982 = vmatpush1.bf16.msra.mxu0 %v4655_v62  ;;  %4023 = vmatpush1.bf16.msra.mxu1 %v4656_v55 }
 0xe97   :  { %3983 = vmatprep.subr.bf16.mxu0 %v4657_v41  ;;  %4024 = vmatprep.subr.bf16.mxu1 %v4658_v33 }
 0xe9a   :  { %3984 = vmatpush1.bf16.msra.mxu0 %v4659_v52  ;;  %4025 = vmatpush1.bf16.msra.mxu1 %v4660_v32 }
 0xe9b   :  { %3985 = vmatprep.subr.bf16.mxu0 %v4661_v51  ;;  %4026 = vmatprep.subr.bf16.mxu1 %v4662_v4  ;;  %v6633_v51 = vld [vmem:[#allocation33_spill] sm:$0xff] }
 0xe9c   :  { %v3020_v4 = vadd.f32 %v6633_v51, %v6221_v45 }
 0xe9e   :  { %3986 = vmatpush1.bf16.msra.mxu0 %v4663_v0  ;;  %4027 = vmatpush1.bf16.msra.mxu1 %v4664_v34 }
 0xe9f   :  { %3987 = vmatprep.subr.bf16.mxu0 %v4665_v19  ;;  %4028 = vmatprep.subr.bf16.mxu1 %v4666_v6 }
 0xea2   :  { %3988 = vmatpush1.bf16.msra.mxu0 %v4667_v7  ;;  %4029 = vmatpush1.bf16.msra.mxu1 %v4668_v12 }
 0xea3   :  { %3989 = vmatprep.subr.bf16.mxu0 %v4669_v13  ;;  %4030 = vmatprep.subr.bf16.mxu1 %v4670_v16  ;;  %v6634_v16 = vld [vmem:[#allocation35_spill] sm:$0xff] }
 0xea6   :  { %3990 = vmatpush1.bf16.msra.mxu0 %v4671_v17  ;;  %4031 = vmatpush1.bf16.msra.mxu1 %v4672_v20 }
 0xf49   :  { %v3898_v23 = vpop.f32.mrf.mxu0  ;;  %v3939_v26 = vpop.f32.mrf.mxu1 }
 0xf4a   :  { %v3946_v36 = vadd.f32 %v3898_v23, %v2892_v22  ;;  %v3948_v25 = vadd.f32 %v3939_v26, %v2933_v37 }
 0xf4b   :  { %v3900_v60 = vpop.f32.mrf.mxu0  ;;  %v3941_v47 = vpop.f32.mrf.mxu1 }
 0xf4c   :  { %v3950_v44 = vmul.f32 0.5, %v3946_v36  ;;  %v3947_v28 = vadd.f32 %v3900_v60, %v2894_v50  ;;  %v3949_v2 = vadd.f32 %v3941_v47, %v2935_v57 }
 0xf4d   :  { %v3902_v53 = vpop.f32.mrf.mxu0  ;;  %v3943_v24 = vpop.f32.mrf.mxu1 }
 0xf4e   :  { %4589 = vtanh.f32 %v3950_v44  ;;  %v3954_v42 = vmul.f32 0.5, %v3947_v28  ;;  %v3959_v48 = vmul.f32 0.5, %v3949_v2 }
 0xf4f   :  { %v3903_v27 = vpop.f32.mrf.mxu0  ;;  %v3944_v43 = vpop.f32.mrf.mxu1 }
 0xf50   :  { %4591 = vtanh.f32 %v3954_v42 }
 0xf51   :  { %4593 = vtanh.f32 %v3948_v25 }
 0xf52   :  { %4595 = vtanh.f32 %v3959_v48 }
 0xf5b   :  { %v4590_v58 = vpop.eup %4589 }
 0xf5c   :  { %v3952_v29 = vmul.f32 0.5, %v4590_v58 }
 0xf5d   :  { %v4592_v10 = vpop.eup %4591 }
 0xf5e   :  { %v3953_v8 = vadd.f32 0.5, %v3952_v29  ;;  %v3956_v39 = vmul.f32 0.5, %v4592_v10  ;;  %v4594_v54 = vpop.eup %4593 }
 0xf5f   :  { %v4596_v63 = vpop.eup %4595 }
 0xf60   :  { %v3957_v15 = vadd.f32 0.5, %v3956_v39  ;;  %v3964_v3 = vmul.f32 %v4594_v54, %v3953_v8  ;;  %v3961_v38 = vmul.f32 0.5, %v4596_v63 }
 0xf62   :  { %v3963_v9 = vmul.f32 %v3957_v15, %v6484_v49  ;;  %v3962_v46 = vadd.f32 0.5, %v3961_v38  ;;  %v6632_v49 = vld [vmem:[#allocation34_spill] sm:$0xff] }
 0xf63   :  { %v2981_v41 = vadd.f32 %v6632_v49, %v6215_v5  ;;  %v3022_v5 = vadd.f32 %v6634_v16, %v6229_v59 }
 0xf64   :  { %v3965_v1 = vadd.f32 %v3964_v3, %v3963_v9 }
 0xf66   :  { %4597 = vtanh.f32 %v3965_v1 }
 0xf73   :  { %v4598_v18 = vpop.eup %4597 }
 0xf74   :  { %v3967_v14 = vmul.f32 %v4598_v18, %v3962_v46 }
 0xf76   :  { %v3968_v11 = vpack.c.bf16 %v3967_v14, %v3967_v14 }
 0xf78   :  { %4246 = vst [vmem:[%s6530_s5 + $0x18] sm:$0xf] %v3968_v11  ;;  %4008 = vmatmul.mubr.bf16.vlgmr.msra.gmra.mxu0 %v3968_v11  ;;  %4049 = vmatmul.mubr.bf16.vlgmr.msra.gmra.mxu1 %v3968_v11 }
0x1038   :  { %v4009_v62 = vpop.f32.mrf.mxu0  ;;  %v4050_v55 = vpop.f32.mrf.mxu1 }
0x1039   :  { %v4057_v33 = vadd.f32 %v4009_v62, %v2979_v61  ;;  %v4059_v7 = vadd.f32 %v4050_v55, %v3020_v4 }
0x103a   :  { %v4011_v52 = vpop.f32.mrf.mxu0  ;;  %v4052_v32 = vpop.f32.mrf.mxu1 }
0x103b   :  { %v4061_v0 = vmul.f32 0.5, %v4057_v33  ;;  %v4058_v34 = vadd.f32 %v4011_v52, %v2981_v41  ;;  %v4060_v17 = vadd.f32 %v4052_v32, %v3022_v5 }
0x103c   :  { %v4013_v19 = vpop.f32.mrf.mxu0  ;;  %v4054_v6 = vpop.f32.mrf.mxu1 }
0x103d   :  { %4599 = vtanh.f32 %v4061_v0  ;;  %v4065_v12 = vmul.f32 0.5, %v4058_v34  ;;  %v4070_v20 = vmul.f32 0.5, %v4060_v17 }
0x103e   :  { %v4014_v13 = vpop.f32.mrf.mxu0  ;;  %v4055_v56 = vpop.f32.mrf.mxu1 }
0x103f   :  { %4601 = vtanh.f32 %v4065_v12 }
0x1040   :  { %4603 = vtanh.f32 %v4059_v7 }
0x1041   :  { %4605 = vtanh.f32 %v4070_v20 }
0x104a   :  { %v4600_v21 = vpop.eup %4599 }
0x104b   :  { %v4063_v22 = vmul.f32 0.5, %v4600_v21 }
0x104c   :  { %v4602_v23 = vpop.eup %4601 }
0x104d   :  { %v4064_v45 = vadd.f32 0.5, %v4063_v22  ;;  %v4067_v26 = vmul.f32 0.5, %v4602_v23  ;;  %v4604_v31 = vpop.eup %4603 }
0x104e   :  { %v4606_v30 = vpop.eup %4605 }
0x104f   :  { %v4068_v50 = vadd.f32 0.5, %v4067_v26  ;;  %v4075_v36 = vmul.f32 %v4604_v31, %v4064_v45  ;;  %v4072_v59 = vmul.f32 0.5, %v4606_v30 }
0x1051   :  { %v4074_v60 = vmul.f32 %v4068_v50, %v3965_v1  ;;  %v4073_v37 = vadd.f32 0.5, %v4072_v59 }
0x1053   :  { %v4076_v47 = vadd.f32 %v4075_v36, %v4074_v60 }
0x1055   :  { %4607 = vtanh.f32 %v4076_v47  ;;  %4249 = vst [vmem:[%s6532_s7 + $0x8] sm:$0xff] %v4076_v47 }
0x1062   :  { %v4608_v44 = vpop.eup %4607 }
0x1063   :  { %v4078_v28 = vmul.f32 %v4608_v44, %v4073_v37 }
0x1065   :  { %v4079_v53 = vpack.c.bf16 %v4078_v28, %v4078_v28  ;;  %4248 = vst [vmem:[%s6531_s6 + $0x8] sm:$0xff] %v4078_v28 }
0x1067   :  { %4247 = vst [vmem:[%s6530_s5 + $0x1c] sm:$0xf] %v4079_v53 }
0x1068   :  { %4103 = vsyncpa [#allocation7], 1 }
0x1069   :  { %4104 = vsyncpa [#allocation9], 1 }

</bundles_post_ra>
